<compile_context>
chip_gen: v6e
topology: v6e:2x2x1
jax: 0.10.0
libtpu: 0.0.40
codegen_flags: <defaults>
</compile_context>

<pallas_src>
import functools
import math

import jax
import jax.numpy as jnp
from jax.experimental import pallas as pl
from jax.experimental.pallas import tpu as pltpu


# ----------------------------- helpers ------------------------------------- #

_VMEM_LIMIT_BYTES = 48 * 1024 * 1024  # fits v7x's 64 MiB physical, > v5e 16 MiB default


def _cparams(dims):
    return pltpu.CompilerParams(dimension_semantics=dims,
                                vmem_limit_bytes=_VMEM_LIMIT_BYTES)


def _pick_tile(dim, preferred, align):
    """Largest tile <= preferred that divides `dim` and is a multiple of `align`;
    falls back to the full dim (always a legal block shape)."""
    if dim <= preferred:
        return dim
    t = (preferred // align) * align
    while t >= align:
        if dim % t == 0:
            return t
        t -= align
    return dim


# ----------------------------- tiled matmul -------------------------------- #

def _matmul_kernel(x_ref, w_ref, b_ref, o_ref, acc_ref, *, activation):
    @pl.when(pl.program_id(2) == 0)
    def _():
        acc_ref[...] = jnp.zeros_like(acc_ref)

    x = x_ref[...].astype(jnp.bfloat16)          # bf16 MXU inputs, f32 accumulate
    w = w_ref[...].astype(jnp.bfloat16)
    acc_ref[...] += jnp.dot(x, w, preferred_element_type=jnp.float32)

    @pl.when(pl.program_id(2) == pl.num_programs(2) - 1)
    def _():
        y = acc_ref[...] + b_ref[...].astype(jnp.float32)
        if activation == "relu":
            y = jnp.maximum(y, 0.0)
        o_ref[...] = y.astype(o_ref.dtype)


def linear(x, w, b, activation=None):
    """x: (M, K) f32, w: (K, N) bf16 (pre-transposed), b: (N,) f32 -> (M, N) f32."""
    M, K = x.shape
    K2, N = w.shape
    assert K == K2, (x.shape, w.shape)
    tm = _pick_tile(M, 256, 8)
    tn = _pick_tile(N, 512, 128)
    tk = _pick_tile(K, 512, 128)
    grid = (M // tm, N // tn, K // tk)
    return pl.pallas_call(
        functools.partial(_matmul_kernel, activation=activation),
        out_shape=jax.ShapeDtypeStruct((M, N), jnp.float32),
        grid=grid,
        in_specs=[
            pl.BlockSpec((tm, tk), lambda i, j, k: (i, k)),
            pl.BlockSpec((tk, tn), lambda i, j, k: (k, j)),
            pl.BlockSpec((1, tn), lambda i, j, k: (0, j)),
        ],
        out_specs=pl.BlockSpec((tm, tn), lambda i, j, k: (i, j)),
        scratch_shapes=[pltpu.VMEM((tm, tn), jnp.float32)],
        compiler_params=_cparams(("parallel", "parallel", "arbitrary")),
    )(x, w, b.reshape(1, N))


# --------------------------- flash attention -------------------------------- #

def _flash_attn_kernel(q_ref, k_ref, v_ref, o_ref, m_sc, l_sc, acc_sc, *, scale):
    ki = pl.program_id(3)

    @pl.when(ki == 0)
    def _():
        m_sc[...] = jnp.full(m_sc.shape, -jnp.inf, dtype=m_sc.dtype)
        l_sc[...] = jnp.zeros_like(l_sc)
        acc_sc[...] = jnp.zeros_like(acc_sc)

    q = q_ref[...].astype(jnp.bfloat16)                      # (tq, hd)
    k = k_ref[...].astype(jnp.bfloat16)                      # (tk, hd)
    # scores: contract over head_dim, lane dim of the result is Sk (lane-dense)
    s = jax.lax.dot_general(q, k, (((1,), (1,)), ((), ())),
                            preferred_element_type=jnp.float32) * scale

    m_prev = m_sc[...]
    m_new = jnp.maximum(m_prev, jnp.max(s, axis=-1, keepdims=True))
    alpha = jnp.exp(m_prev - m_new)
    p = jnp.exp(s - m_new)
    l_sc[...] = alpha * l_sc[...] + jnp.sum(p, axis=-1, keepdims=True)
    acc_sc[...] = alpha * acc_sc[...] + jnp.dot(
        p.astype(jnp.bfloat16), v_ref[...].astype(jnp.bfloat16),
        preferred_element_type=jnp.float32)
    m_sc[...] = m_new

    @pl.when(ki == pl.num_programs(3) - 1)
    def _():
        inv_l = pl.reciprocal(l_sc[...], approx=True)        # EUP slot, ~free
        o_ref[...] = (acc_sc[...] * inv_l).astype(o_ref.dtype)


def attention(q_arr, k_arr, v_arr, *, n_heads, head_dim, q_off, k_off, v_off, scale):
    """Full (non-causal) multi-head attention.

    q_arr/k_arr/v_arr are packed projection outputs (B, S, n_blocks*head_dim);
    `*_off` are the head-block column offsets of Q/K/V inside them, so the head
    split is pure BlockSpec index_map plumbing (no reshape/transpose).
    Output is head-merged (B, Sq, n_heads*head_dim).
    """
    B, Sq, _ = q_arr.shape
    Sk = k_arr.shape[1]
    hd = head_dim
    # TODO(synk): add a padded-head / folded-head path for head_dim % 128 != 0.
    assert hd % 128 == 0, "lane-dense attention path requires head_dim % 128 == 0"

    tq = _pick_tile(Sq, 256, 8)
    tk = _pick_tile(Sk, 512, 8)
    grid = (B, n_heads, Sq // tq, Sk // tk)

    q_spec = pl.BlockSpec((None, tq, hd), lambda b, h, qi, ki: (b, qi, q_off + h))
    k_spec = pl.BlockSpec((None, tk, hd), lambda b, h, qi, ki: (b, ki, k_off + h))
    v_spec = pl.BlockSpec((None, tk, hd), lambda b, h, qi, ki: (b, ki, v_off + h))
    o_spec = pl.BlockSpec((None, tq, hd), lambda b, h, qi, ki: (b, qi, h))

    return pl.pallas_call(
        functools.partial(_flash_attn_kernel, scale=scale),
        out_shape=jax.ShapeDtypeStruct((B, Sq, n_heads * hd), jnp.float32),
        grid=grid,
        in_specs=[q_spec, k_spec, v_spec],
        out_specs=o_spec,
        scratch_shapes=[pltpu.VMEM((tq, 1), jnp.float32),     # running max m
                        pltpu.VMEM((tq, 1), jnp.float32),     # running sum l
                        pltpu.VMEM((tq, hd), jnp.float32)],   # output accumulator
        compiler_params=_cparams(("parallel", "parallel", "parallel", "arbitrary")),
    )(q_arr, k_arr, v_arr)


# ----------------------- (residual) add + LayerNorm -------------------------- #

def _ln_math(x, g, b, eps):
    mean = jnp.mean(x, axis=-1, keepdims=True)
    var = jnp.mean(jnp.square(x - mean), axis=-1, keepdims=True)     # biased, like PyTorch
    return (x - mean) * jax.lax.rsqrt(var + eps) * g + b


def _add_ln_kernel(x_ref, r_ref, g_ref, b_ref, o_ref, *, eps):
    x = x_ref[...] + r_ref[...]
    o_ref[...] = _ln_math(x, g_ref[...], b_ref[...], eps).astype(o_ref.dtype)


def _ln_kernel(x_ref, g_ref, b_ref, o_ref, *, eps):
    o_ref[...] = _ln_math(x_ref[...], g_ref[...], b_ref[...], eps).astype(o_ref.dtype)


def add_layernorm(x, residual, gamma, beta, eps=1e-5):
    M, D = x.shape
    tm = _pick_tile(M, 512, 8)
    return pl.pallas_call(
        functools.partial(_add_ln_kernel, eps=eps),
        out_shape=jax.ShapeDtypeStruct((M, D), jnp.float32),
        grid=(M // tm,),
        in_specs=[pl.BlockSpec((tm, D), lambda i: (i, 0)),
                  pl.BlockSpec((tm, D), lambda i: (i, 0)),
                  pl.BlockSpec((1, D), lambda i: (0, 0)),
                  pl.BlockSpec((1, D), lambda i: (0, 0))],
        out_specs=pl.BlockSpec((tm, D), lambda i: (i, 0)),
        compiler_params=_cparams(("parallel",)),
    )(x, residual, gamma.reshape(1, D), beta.reshape(1, D))


def layernorm(x, gamma, beta, eps=1e-5):
    M, D = x.shape
    tm = _pick_tile(M, 512, 8)
    return pl.pallas_call(
        functools.partial(_ln_kernel, eps=eps),
        out_shape=jax.ShapeDtypeStruct((M, D), jnp.float32),
        grid=(M // tm,),
        in_specs=[pl.BlockSpec((tm, D), lambda i: (i, 0)),
                  pl.BlockSpec((1, D), lambda i: (0, 0)),
                  pl.BlockSpec((1, D), lambda i: (0, 0))],
        out_specs=pl.BlockSpec((tm, D), lambda i: (i, 0)),
        compiler_params=_cparams(("parallel",)),
    )(x, gamma.reshape(1, D), beta.reshape(1, D))


# ------------------------------ model (glue) --------------------------------- #

def _self_attention(x, p, n_heads):
    B, S, D = x.shape
    hd = D // n_heads
    # fused QKV projection: one MXU pass over x with N = 3D
    qkv = linear(x.reshape(B * S, D), p["sa_w"], p["sa_b"]).reshape(B, S, 3 * D)
    o = attention(qkv, qkv, qkv, n_heads=n_heads, head_dim=hd,
                  q_off=0, k_off=n_heads, v_off=2 * n_heads,
                  scale=1.0 / math.sqrt(hd))
    o = linear(o.reshape(B * S, D), p["sa_out_w"], p["sa_out_b"])
    return o  # (B*S, D)


def _cross_attention(x, mem, p, n_heads):
    B, S, D = x.shape
    hd = D // n_heads
    q = linear(x.reshape(B * S, D), p["ca_q_w"], p["ca_q_b"]).reshape(B, S, D)
    # fused K/V projection of the memory: one MXU pass with N = 2D
    kv = linear(mem.reshape(B * S, D), p["ca_kv_w"], p["ca_kv_b"]).reshape(B, S, 2 * D)
    o = attention(q, kv, kv, n_heads=n_heads, head_dim=hd,
                  q_off=0, k_off=0, v_off=n_heads,
                  scale=1.0 / math.sqrt(hd))
    o = linear(o.reshape(B * S, D), p["ca_out_w"], p["ca_out_b"])
    return o  # (B*S, D)


def decoder_layer(h, p, n_heads):
    """nn.TransformerDecoderLayer (post-norm, relu FFN); memory == layer input h."""
    B, S, D = h.shape
    x2 = h.reshape(B * S, D)

    # self-attention block
    sa = _self_attention(h, p, n_heads)
    x2 = add_layernorm(x2, sa, p["norm1_g"], p["norm1_b"])

    # cross-attention block (memory is the original layer input h)
    ca = _cross_attention(x2.reshape(B, S, D), h, p, n_heads)
    x2 = add_layernorm(x2, ca, p["norm2_g"], p["norm2_b"])

    # feed-forward block (bias + relu fused into the first matmul's epilogue)
    ff = linear(x2, p["lin1_w"], p["lin1_b"], activation="relu")
    ff = linear(ff, p["lin2_w"], p["lin2_b"])
    x2 = add_layernorm(x2, ff, p["norm3_g"], p["norm3_b"])
    return x2.reshape(B, S, D)


def transformer_forward(tokens, params, n_heads):
    # tokens: (S, B) int32
    # TODO(synk): embedding gather could be a scalar-prefetch Pallas gather kernel.
    h = jnp.take(params["emb"], tokens.T, axis=0)            # (B, S, D), no extra transpose
    for p in params["layers"]:
        h = decoder_layer(h, p, n_heads)
    B, S, D = h.shape
    h2 = layernorm(h.reshape(B * S, D), params["norm_g"], params["norm_b"])
    out = linear(h2, params["out_w"], params["out_b"])       # (B*S, vocab), N-tiled
    V = out.shape[-1]
    return out.reshape(B, S, V).transpose(1, 0, 2)           # (S, B, vocab)


# ------------------------------- parameters ---------------------------------- #

def init_params(key, dim, n_layers, n_heads, vocab, dff):
    del n_heads  # head count only affects runtime slicing, not parameter shapes
    keys = jax.random.split(key, 2 + n_layers)

    def w(kk, shape, scale=0.02, dtype=jnp.bfloat16):
        # weights stored pre-transposed as (in_features, out_features), bf16
        return (jax.random.normal(kk, shape, jnp.float32) * scale).astype(dtype)

    params = {
        "emb": w(keys[0], (vocab, dim), dtype=jnp.float32),
        "out_w": w(keys[1], (dim, vocab)),
        "out_b": jnp.zeros((vocab,), jnp.float32),
        "norm_g": jnp.ones((dim,), jnp.float32),
        "norm_b": jnp.zeros((dim,), jnp.float32),
        "layers": [],
    }
    for l in range(n_layers):
        k = jax.random.split(keys[2 + l], 12)
        params["layers"].append(dict(
            # self-attention: packed QKV projection (D, 3D), columns [Q | K | V]
            sa_w=w(k[0], (dim, 3 * dim)), sa_b=w(k[1], (3 * dim,), dtype=jnp.float32),
            sa_out_w=w(k[2], (dim, dim)), sa_out_b=jnp.zeros((dim,), jnp.float32),
            # cross-attention: Q projection and packed KV projection (D, 2D) = [K | V]
            ca_q_w=w(k[3], (dim, dim)), ca_q_b=w(k[4], (dim,), dtype=jnp.float32),
            ca_kv_w=w(k[5], (dim, 2 * dim)), ca_kv_b=w(k[6], (2 * dim,), dtype=jnp.float32),
            ca_out_w=w(k[7], (dim, dim)), ca_out_b=jnp.zeros((dim,), jnp.float32),
            # FFN
            lin1_w=w(k[8], (dim, dff)), lin1_b=w(k[9], (dff,), dtype=jnp.float32),
            lin2_w=w(k[10], (dff, dim)), lin2_b=w(k[11], (dim,), dtype=jnp.float32),
            # norms
            norm1_g=jnp.ones((dim,), jnp.float32), norm1_b=jnp.zeros((dim,), jnp.float32),
            norm2_g=jnp.ones((dim,), jnp.float32), norm2_b=jnp.zeros((dim,), jnp.float32),
            norm3_g=jnp.ones((dim,), jnp.float32), norm3_b=jnp.zeros((dim,), jnp.float32),
        ))
    return params


if __name__ == "__main__":
    # Small, lane-friendly config: head_dim = dim / n_heads = 128 (matches the spec's
    # default 512/4 = 128).  dim_feedforward keeps the PyTorch default 2048 so the
    # FFN actually exercises N- and K-tiling.
    dim, n_layers, n_heads, vocab = 256, 2, 2, 512
    dff = 2048
    S, B = 16, 2

    key = jax.random.PRNGKey(0)
    k_tok, k_par = jax.random.split(key)
    tokens = jax.random.randint(k_tok, (S, B), 0, vocab, dtype=jnp.int32)
    params = init_params(k_par, dim, n_layers, n_heads, vocab, dff)

    fwd = jax.jit(functools.partial(transformer_forward, n_heads=n_heads))
    logits = fwd(tokens, params)
    jax.block_until_ready(logits)

    assert logits.shape == (S, B, vocab), logits.shape
    assert bool(jnp.all(jnp.isfinite(logits)))
    print("KERNEL_OK")
</pallas_src>

<mosaic_0001>
module attributes {stable_mosaic.version = 11 : i64} {
  func.func @_matmul_kernel(%arg0: i32, %arg1: i32, %arg2: i32, %arg3: memref<32x256xf32, #tpu.memory_space<vmem>>, %arg4: memref<256x384xbf16, #tpu.memory_space<vmem>>, %arg5: memref<1x384xf32, #tpu.memory_space<vmem>>, %arg6: memref<32x384xf32, #tpu.memory_space<vmem>>, %arg7: memref<32x384xf32, #tpu.memory_space<vmem>>) attributes {dimension_semantics = [#tpu.dimension_semantics<parallel>, #tpu.dimension_semantics<parallel>, #tpu.dimension_semantics<arbitrary>], iteration_bounds = array<i64: 1, 2, 1>, scalar_prefetch = 0 : i64, scratch_operands = 1 : i64, tpu.core_type = #tpu.core_type<tc>, window_params = [{transform_indices = @transform_0, window_bounds = array<i64: 32, 256>}, {transform_indices = @transform_1, window_bounds = array<i64: 256, 384>}, {transform_indices = @transform_2, window_bounds = array<i64: 1, 384>}, {transform_indices = @transform_3, window_bounds = array<i64: 32, 384>}]} {
    %c0_i32 = arith.constant 0 : i32
    %0 = arith.cmpi eq, %arg2, %c0_i32 : i32
    %1 = arith.extui %0 : i1 to i32
    %c0_i32_0 = arith.constant 0 : i32
    %2 = arith.cmpi ne, %1, %c0_i32_0 : i32
    scf.if %2 {
      %cst_10 = arith.constant 0.000000e+00 : f32
      %13 = vector.broadcast %cst_10 : f32 to vector<32x384xf32>
      %c0_11 = arith.constant 0 : index
      %c0_12 = arith.constant 0 : index
      %14 = vector.load %arg7[%c0_11, %c0_12] : memref<32x384xf32, #tpu.memory_space<vmem>>, vector<32x384xf32>
      tpu.vector_store %arg7[%c0_11, %c0_12], %13 {strides = array<i32>} : memref<32x384xf32, #tpu.memory_space<vmem>>, vector<32x384xf32>,
    } else {
    }
    %c0 = arith.constant 0 : index
    %c0_1 = arith.constant 0 : index
    %3 = vector.load %arg3[%c0, %c0_1] : memref<32x256xf32, #tpu.memory_space<vmem>>, vector<32x256xf32>
    %4 = arith.truncf %3 : vector<32x256xf32> to vector<32x256xbf16>
    %c0_2 = arith.constant 0 : index
    %c0_3 = arith.constant 0 : index
    %5 = vector.load %arg4[%c0_2, %c0_3] : memref<256x384xbf16, #tpu.memory_space<vmem>>, vector<256x384xbf16>
    %c0_4 = arith.constant 0 : index
    %c0_5 = arith.constant 0 : index
    %6 = vector.load %arg7[%c0_4, %c0_5] : memref<32x384xf32, #tpu.memory_space<vmem>>, vector<32x384xf32>
    %cst = arith.constant dense<0.000000e+00> : vector<32x384xf32>
    %7 = tpu.matmul %4, %5, %cst {dimension_numbers = #tpu.dot_dimension_numbers<[1], [0], [0], [1], [0, 0, 1, 1], [], []>} : vector<32x256xbf16>, vector<256x384xbf16>, vector<32x384xf32> -> vector<32x384xf32>
    %8 = arith.addf %6, %7 : vector<32x384xf32>
    %c0_6 = arith.constant 0 : index
    %c0_7 = arith.constant 0 : index
    %9 = vector.load %arg7[%c0_6, %c0_7] : memref<32x384xf32, #tpu.memory_space<vmem>>, vector<32x384xf32>
    tpu.vector_store %arg7[%c0_6, %c0_7], %8 {strides = array<i32>} : memref<32x384xf32, #tpu.memory_space<vmem>>, vector<32x384xf32>,
    %c0_i32_8 = arith.constant 0 : i32
    %10 = arith.cmpi eq, %arg2, %c0_i32_8 : i32
    %11 = arith.extui %10 : i1 to i32
    %c0_i32_9 = arith.constant 0 : i32
    %12 = arith.cmpi ne, %11, %c0_i32_9 : i32
    scf.if %12 {
      %c0_10 = arith.constant 0 : index
      %c0_11 = arith.constant 0 : index
      %13 = vector.load %arg7[%c0_10, %c0_11] : memref<32x384xf32, #tpu.memory_space<vmem>>, vector<32x384xf32>
      %c0_12 = arith.constant 0 : index
      %c0_13 = arith.constant 0 : index
      %14 = vector.load %arg5[%c0_12, %c0_13] : memref<1x384xf32, #tpu.memory_space<vmem>>, vector<1x384xf32>
      %15 = vector.broadcast %14 : vector<1x384xf32> to vector<32x384xf32>
      %16 = arith.addf %13, %15 : vector<32x384xf32>
      %c0_14 = arith.constant 0 : index
      %c0_15 = arith.constant 0 : index
      %17 = vector.load %arg6[%c0_14, %c0_15] : memref<32x384xf32, #tpu.memory_space<vmem>>, vector<32x384xf32>
      tpu.vector_store %arg6[%c0_14, %c0_15], %16 {strides = array<i32>} : memref<32x384xf32, #tpu.memory_space<vmem>>, vector<32x384xf32>,
    } else {
    }
    return
  }
  func.func @transform_0(%arg0: i32, %arg1: i32, %arg2: i32) -> (i32, i32) {
    %c0_i32 = arith.constant 0 : i32
    return %arg0, %arg2 : i32, i32
  }
  func.func @transform_1(%arg0: i32, %arg1: i32, %arg2: i32) -> (i32, i32) {
    %c0_i32 = arith.constant 0 : i32
    return %arg2, %arg1 : i32, i32
  }
  func.func @transform_2(%arg0: i32, %arg1: i32, %arg2: i32) -> (i32, i32) {
    %c0_i32 = arith.constant 0 : i32
    %c0_i32_0 = arith.constant 0 : i32
    return %c0_i32, %arg1 : i32, i32
  }
  func.func @transform_3(%arg0: i32, %arg1: i32, %arg2: i32) -> (i32, i32) {
    %c0_i32 = arith.constant 0 : i32
    return %arg0, %arg1 : i32, i32
  }
}

module attributes {stable_mosaic.version = 11 : i64} {
  func.func @_matmul_kernel(%arg0: i32, %arg1: i32, %arg2: i32, %arg3: memref<32x256xf32, #tpu.memory_space<vmem>>, %arg4: memref<256x256xbf16, #tpu.memory_space<vmem>>, %arg5: memref<1x256xf32, #tpu.memory_space<vmem>>, %arg6: memref<32x256xf32, #tpu.memory_space<vmem>>, %arg7: memref<32x256xf32, #tpu.memory_space<vmem>>) attributes {dimension_semantics = [#tpu.dimension_semantics<parallel>, #tpu.dimension_semantics<parallel>, #tpu.dimension_semantics<arbitrary>], iteration_bounds = array<i64: 1, 1, 1>, scalar_prefetch = 0 : i64, scratch_operands = 1 : i64, tpu.core_type = #tpu.core_type<tc>, window_params = [{transform_indices = @transform_0, window_bounds = array<i64: 32, 256>}, {transform_indices = @transform_1, window_bounds = array<i64: 256, 256>}, {transform_indices = @transform_2, window_bounds = array<i64: 1, 256>}, {transform_indices = @transform_3, window_bounds = array<i64: 32, 256>}]} {
    %c0_i32 = arith.constant 0 : i32
    %0 = arith.cmpi eq, %arg2, %c0_i32 : i32
    %1 = arith.extui %0 : i1 to i32
    %c0_i32_0 = arith.constant 0 : i32
    %2 = arith.cmpi ne, %1, %c0_i32_0 : i32
    scf.if %2 {
      %cst_10 = arith.constant 0.000000e+00 : f32
      %13 = vector.broadcast %cst_10 : f32 to vector<32x256xf32>
      %c0_11 = arith.constant 0 : index
      %c0_12 = arith.constant 0 : index
      %14 = vector.load %arg7[%c0_11, %c0_12] : memref<32x256xf32, #tpu.memory_space<vmem>>, vector<32x256xf32>
      tpu.vector_store %arg7[%c0_11, %c0_12], %13 {strides = array<i32>} : memref<32x256xf32, #tpu.memory_space<vmem>>, vector<32x256xf32>,
    } else {
    }
    %c0 = arith.constant 0 : index
    %c0_1 = arith.constant 0 : index
    %3 = vector.load %arg3[%c0, %c0_1] : memref<32x256xf32, #tpu.memory_space<vmem>>, vector<32x256xf32>
    %4 = arith.truncf %3 : vector<32x256xf32> to vector<32x256xbf16>
    %c0_2 = arith.constant 0 : index
    %c0_3 = arith.constant 0 : index
    %5 = vector.load %arg4[%c0_2, %c0_3] : memref<256x256xbf16, #tpu.memory_space<vmem>>, vector<256x256xbf16>
    %c0_4 = arith.constant 0 : index
    %c0_5 = arith.constant 0 : index
    %6 = vector.load %arg7[%c0_4, %c0_5] : memref<32x256xf32, #tpu.memory_space<vmem>>, vector<32x256xf32>
    %cst = arith.constant dense<0.000000e+00> : vector<32x256xf32>
    %7 = tpu.matmul %4, %5, %cst {dimension_numbers = #tpu.dot_dimension_numbers<[1], [0], [0], [1], [0, 0, 1, 1], [], []>} : vector<32x256xbf16>, vector<256x256xbf16>, vector<32x256xf32> -> vector<32x256xf32>
    %8 = arith.addf %6, %7 : vector<32x256xf32>
    %c0_6 = arith.constant 0 : index
    %c0_7 = arith.constant 0 : index
    %9 = vector.load %arg7[%c0_6, %c0_7] : memref<32x256xf32, #tpu.memory_space<vmem>>, vector<32x256xf32>
    tpu.vector_store %arg7[%c0_6, %c0_7], %8 {strides = array<i32>} : memref<32x256xf32, #tpu.memory_space<vmem>>, vector<32x256xf32>,
    %c0_i32_8 = arith.constant 0 : i32
    %10 = arith.cmpi eq, %arg2, %c0_i32_8 : i32
    %11 = arith.extui %10 : i1 to i32
    %c0_i32_9 = arith.constant 0 : i32
    %12 = arith.cmpi ne, %11, %c0_i32_9 : i32
    scf.if %12 {
      %c0_10 = arith.constant 0 : index
      %c0_11 = arith.constant 0 : index
      %13 = vector.load %arg7[%c0_10, %c0_11] : memref<32x256xf32, #tpu.memory_space<vmem>>, vector<32x256xf32>
      %c0_12 = arith.constant 0 : index
      %c0_13 = arith.constant 0 : index
      %14 = vector.load %arg5[%c0_12, %c0_13] : memref<1x256xf32, #tpu.memory_space<vmem>>, vector<1x256xf32>
      %15 = vector.broadcast %14 : vector<1x256xf32> to vector<32x256xf32>
      %16 = arith.addf %13, %15 : vector<32x256xf32>
      %c0_14 = arith.constant 0 : index
      %c0_15 = arith.constant 0 : index
      %17 = vector.load %arg6[%c0_14, %c0_15] : memref<32x256xf32, #tpu.memory_space<vmem>>, vector<32x256xf32>
      tpu.vector_store %arg6[%c0_14, %c0_15], %16 {strides = array<i32>} : memref<32x256xf32, #tpu.memory_space<vmem>>, vector<32x256xf32>,
    } else {
    }
    return
  }
  func.func @transform_0(%arg0: i32, %arg1: i32, %arg2: i32) -> (i32, i32) {
    %c0_i32 = arith.constant 0 : i32
    return %arg0, %arg2 : i32, i32
  }
  func.func @transform_1(%arg0: i32, %arg1: i32, %arg2: i32) -> (i32, i32) {
    %c0_i32 = arith.constant 0 : i32
    return %arg2, %arg1 : i32, i32
  }
  func.func @transform_2(%arg0: i32, %arg1: i32, %arg2: i32) -> (i32, i32) {
    %c0_i32 = arith.constant 0 : i32
    %c0_i32_0 = arith.constant 0 : i32
    return %c0_i32, %arg1 : i32, i32
  }
  func.func @transform_3(%arg0: i32, %arg1: i32, %arg2: i32) -> (i32, i32) {
    %c0_i32 = arith.constant 0 : i32
    return %arg0, %arg1 : i32, i32
  }
}

module attributes {stable_mosaic.version = 11 : i64} {
  func.func @_flash_attn_kernel(%arg0: i32, %arg1: i32, %arg2: i32, %arg3: i32, %arg4: memref<1x16x128xf32, #tpu.memory_space<vmem>>, %arg5: memref<1x16x128xf32, #tpu.memory_space<vmem>>, %arg6: memref<1x16x128xf32, #tpu.memory_space<vmem>>, %arg7: memref<1x16x128xf32, #tpu.memory_space<vmem>>, %arg8: memref<16x1xf32, #tpu.memory_space<vmem>>, %arg9: memref<16x1xf32, #tpu.memory_space<vmem>>, %arg10: memref<16x128xf32, #tpu.memory_space<vmem>>) attributes {dimension_semantics = [#tpu.dimension_semantics<parallel>, #tpu.dimension_semantics<parallel>, #tpu.dimension_semantics<parallel>, #tpu.dimension_semantics<arbitrary>], iteration_bounds = array<i64: 2, 2, 1, 1>, scalar_prefetch = 0 : i64, scratch_operands = 3 : i64, tpu.core_type = #tpu.core_type<tc>, window_params = [{transform_indices = @transform_0, window_bounds = array<i64: 1, 16, 128>}, {transform_indices = @transform_1, window_bounds = array<i64: 1, 16, 128>}, {transform_indices = @transform_2, window_bounds = array<i64: 1, 16, 128>}, {transform_indices = @transform_3, window_bounds = array<i64: 1, 16, 128>}]} {
    %c0_i32 = arith.constant 0 : i32
    %0 = arith.cmpi eq, %arg3, %c0_i32 : i32
    %1 = arith.extui %0 : i1 to i32
    %c0_i32_0 = arith.constant 0 : i32
    %2 = arith.cmpi ne, %1, %c0_i32_0 : i32
    scf.if %2 {
      %cst_27 = arith.constant 0xFF800000 : f32
      %41 = vector.broadcast %cst_27 : f32 to vector<16x1xf32>
      %c0_28 = arith.constant 0 : index
      %c0_29 = arith.constant 0 : index
      %42 = vector.load %arg8[%c0_28, %c0_29] : memref<16x1xf32, #tpu.memory_space<vmem>>, vector<16x1xf32>
      tpu.vector_store %arg8[%c0_28, %c0_29], %41 {strides = array<i32>} : memref<16x1xf32, #tpu.memory_space<vmem>>, vector<16x1xf32>,
      %cst_30 = arith.constant 0.000000e+00 : f32
      %43 = vector.broadcast %cst_30 : f32 to vector<16x1xf32>
      %c0_31 = arith.constant 0 : index
      %c0_32 = arith.constant 0 : index
      %44 = vector.load %arg9[%c0_31, %c0_32] : memref<16x1xf32, #tpu.memory_space<vmem>>, vector<16x1xf32>
      tpu.vector_store %arg9[%c0_31, %c0_32], %43 {strides = array<i32>} : memref<16x1xf32, #tpu.memory_space<vmem>>, vector<16x1xf32>,
      %cst_33 = arith.constant 0.000000e+00 : f32
      %45 = vector.broadcast %cst_33 : f32 to vector<16x128xf32>
      %c0_34 = arith.constant 0 : index
      %c0_35 = arith.constant 0 : index
      %46 = vector.load %arg10[%c0_34, %c0_35] : memref<16x128xf32, #tpu.memory_space<vmem>>, vector<16x128xf32>
      tpu.vector_store %arg10[%c0_34, %c0_35], %45 {strides = array<i32>} : memref<16x128xf32, #tpu.memory_space<vmem>>, vector<16x128xf32>,
    } else {
    }
    %c0 = arith.constant 0 : index
    %c0_1 = arith.constant 0 : index
    %c0_2 = arith.constant 0 : index
    %3 = vector.load %arg4[%c0, %c0_1, %c0_2] : memref<1x16x128xf32, #tpu.memory_space<vmem>>, vector<1x16x128xf32>
    %4 = vector.shape_cast %3 : vector<1x16x128xf32> to vector<16x128xf32>
    %5 = arith.truncf %4 : vector<16x128xf32> to vector<16x128xbf16>
    %c0_3 = arith.constant 0 : index
    %c0_4 = arith.constant 0 : index
    %c0_5 = arith.constant 0 : index
    %6 = vector.load %arg5[%c0_3, %c0_4, %c0_5] : memref<1x16x128xf32, #tpu.memory_space<vmem>>, vector<1x16x128xf32>
    %7 = vector.shape_cast %6 : vector<1x16x128xf32> to vector<16x128xf32>
    %8 = arith.truncf %7 : vector<16x128xf32> to vector<16x128xbf16>
    %cst = arith.constant dense<0.000000e+00> : vector<16x16xf32>
    %9 = tpu.matmul %5, %8, %cst {dimension_numbers = #tpu.dot_dimension_numbers<[1], [1], [0], [0], [0, 0, 1, 0], [], []>} : vector<16x128xbf16>, vector<16x128xbf16>, vector<16x16xf32> -> vector<16x16xf32>
    %cst_6 = arith.constant 0.0883883461 : f32
    %10 = vector.broadcast %cst_6 : f32 to vector<16x16xf32>
    %11 = arith.mulf %9, %10 : vector<16x16xf32>
    %c0_7 = arith.constant 0 : index
    %c0_8 = arith.constant 0 : index
    %12 = vector.load %arg8[%c0_7, %c0_8] : memref<16x1xf32, #tpu.memory_space<vmem>>, vector<16x1xf32>
    %cst_9 = arith.constant dense<0xFF800000> : vector<16xf32>
    %13 = vector.multi_reduction <maximumf>, %11, %cst_9 [1] : vector<16x16xf32> to vector<16xf32>
    %14 = vector.shape_cast %13 : vector<16xf32> to vector<16x1xf32>
    %15 = arith.maximumf %12, %14 : vector<16x1xf32>
    %16 = arith.subf %12, %15 : vector<16x1xf32>
    %17 = math.exp %16 : vector<16x1xf32>
    %18 = vector.broadcast %15 : vector<16x1xf32> to vector<16x16xf32>
    %19 = arith.subf %11, %18 : vector<16x16xf32>
    %20 = math.exp %19 : vector<16x16xf32>
    %c0_10 = arith.constant 0 : index
    %c0_11 = arith.constant 0 : index
    %21 = vector.load %arg9[%c0_10, %c0_11] : memref<16x1xf32, #tpu.memory_space<vmem>>, vector<16x1xf32>
    %22 = arith.mulf %17, %21 : vector<16x1xf32>
    %cst_12 = arith.constant dense<0.000000e+00> : vector<16xf32>
    %23 = vector.multi_reduction <add>, %20, %cst_12 [1] : vector<16x16xf32> to vector<16xf32>
    %24 = vector.shape_cast %23 : vector<16xf32> to vector<16x1xf32>
    %25 = arith.addf %22, %24 : vector<16x1xf32>
    %c0_13 = arith.constant 0 : index
    %c0_14 = arith.constant 0 : index
    %26 = vector.load %arg9[%c0_13, %c0_14] : memref<16x1xf32, #tpu.memory_space<vmem>>, vector<16x1xf32>
    tpu.vector_store %arg9[%c0_13, %c0_14], %25 {strides = array<i32>} : memref<16x1xf32, #tpu.memory_space<vmem>>, vector<16x1xf32>,
    %c0_15 = arith.constant 0 : index
    %c0_16 = arith.constant 0 : index
    %27 = vector.load %arg10[%c0_15, %c0_16] : memref<16x128xf32, #tpu.memory_space<vmem>>, vector<16x128xf32>
    %28 = vector.broadcast %17 : vector<16x1xf32> to vector<16x128xf32>
    %29 = arith.mulf %28, %27 : vector<16x128xf32>
    %30 = arith.truncf %20 : vector<16x16xf32> to vector<16x16xbf16>
    %c0_17 = arith.constant 0 : index
    %c0_18 = arith.constant 0 : index
    %c0_19 = arith.constant 0 : index
    %31 = vector.load %arg6[%c0_17, %c0_18, %c0_19] : memref<1x16x128xf32, #tpu.memory_space<vmem>>, vector<1x16x128xf32>
    %32 = vector.shape_cast %31 : vector<1x16x128xf32> to vector<16x128xf32>
    %33 = arith.truncf %32 : vector<16x128xf32> to vector<16x128xbf16>
    %cst_20 = arith.constant dense<0.000000e+00> : vector<16x128xf32>
    %34 = tpu.matmul %30, %33, %cst_20 {dimension_numbers = #tpu.dot_dimension_numbers<[1], [0], [0], [1], [0, 0, 1, 1], [], []>} : vector<16x16xbf16>, vector<16x128xbf16>, vector<16x128xf32> -> vector<16x128xf32>
    %35 = arith.addf %29, %34 : vector<16x128xf32>
    %c0_21 = arith.constant 0 : index
    %c0_22 = arith.constant 0 : index
    %36 = vector.load %arg10[%c0_21, %c0_22] : memref<16x128xf32, #tpu.memory_space<vmem>>, vector<16x128xf32>
    tpu.vector_store %arg10[%c0_21, %c0_22], %35 {strides = array<i32>} : memref<16x128xf32, #tpu.memory_space<vmem>>, vector<16x128xf32>,
    %c0_23 = arith.constant 0 : index
    %c0_24 = arith.constant 0 : index
    %37 = vector.load %arg8[%c0_23, %c0_24] : memref<16x1xf32, #tpu.memory_space<vmem>>, vector<16x1xf32>
    tpu.vector_store %arg8[%c0_23, %c0_24], %15 {strides = array<i32>} : memref<16x1xf32, #tpu.memory_space<vmem>>, vector<16x1xf32>,
    %c0_i32_25 = arith.constant 0 : i32
    %38 = arith.cmpi eq, %arg3, %c0_i32_25 : i32
    %39 = arith.extui %38 : i1 to i32
    %c0_i32_26 = arith.constant 0 : i32
    %40 = arith.cmpi ne, %39, %c0_i32_26 : i32
    scf.if %40 {
      %c0_27 = arith.constant 0 : index
      %c0_28 = arith.constant 0 : index
      %41 = vector.load %arg9[%c0_27, %c0_28] : memref<16x1xf32, #tpu.memory_space<vmem>>, vector<16x1xf32>
      %42 = tpu.reciprocal %41 {approx = true} : vector<16x1xf32> -> vector<16x1xf32>
      %c0_29 = arith.constant 0 : index
      %c0_30 = arith.constant 0 : index
      %43 = vector.load %arg10[%c0_29, %c0_30] : memref<16x128xf32, #tpu.memory_space<vmem>>, vector<16x128xf32>
      %44 = vector.broadcast %42 : vector<16x1xf32> to vector<16x128xf32>
      %45 = arith.mulf %43, %44 : vector<16x128xf32>
      %c0_31 = arith.constant 0 : index
      %c0_32 = arith.constant 0 : index
      %c0_33 = arith.constant 0 : index
      %46 = vector.load %arg7[%c0_31, %c0_32, %c0_33] : memref<1x16x128xf32, #tpu.memory_space<vmem>>, vector<1x16x128xf32>
      %47 = vector.shape_cast %46 : vector<1x16x128xf32> to vector<16x128xf32>
      %48 = vector.shape_cast %45 : vector<16x128xf32> to vector<1x16x128xf32>
      tpu.vector_store %arg7[%c0_31, %c0_32, %c0_33], %48 {strides = array<i32>} : memref<1x16x128xf32, #tpu.memory_space<vmem>>, vector<1x16x128xf32>,
    } else {
    }
    return
  }
  func.func @transform_0(%arg0: i32, %arg1: i32, %arg2: i32, %arg3: i32) -> (i32, i32, i32) {
    %c0_i32 = arith.constant 0 : i32
    %0 = arith.addi %c0_i32, %arg1 : i32
    %c0_i32_0 = arith.constant 0 : i32
    return %arg0, %arg2, %0 : i32, i32, i32
  }
  func.func @transform_1(%arg0: i32, %arg1: i32, %arg2: i32, %arg3: i32) -> (i32, i32, i32) {
    %c2_i32 = arith.constant 2 : i32
    %0 = arith.addi %c2_i32, %arg1 : i32
    %c0_i32 = arith.constant 0 : i32
    return %arg0, %arg3, %0 : i32, i32, i32
  }
  func.func @transform_2(%arg0: i32, %arg1: i32, %arg2: i32, %arg3: i32) -> (i32, i32, i32) {
    %c4_i32 = arith.constant 4 : i32
    %0 = arith.addi %c4_i32, %arg1 : i32
    %c0_i32 = arith.constant 0 : i32
    return %arg0, %arg3, %0 : i32, i32, i32
  }
  func.func @transform_3(%arg0: i32, %arg1: i32, %arg2: i32, %arg3: i32) -> (i32, i32, i32) {
    %c0_i32 = arith.constant 0 : i32
    return %arg0, %arg2, %arg1 : i32, i32, i32
  }
}

module attributes {stable_mosaic.version = 11 : i64} {
  func.func @_add_ln_kernel(%arg0: i32, %arg1: memref<32x256xf32, #tpu.memory_space<vmem>>, %arg2: memref<32x256xf32, #tpu.memory_space<vmem>>, %arg3: memref<1x256xf32, #tpu.memory_space<vmem>>, %arg4: memref<1x256xf32, #tpu.memory_space<vmem>>, %arg5: memref<32x256xf32, #tpu.memory_space<vmem>>) attributes {dimension_semantics = [#tpu.dimension_semantics<parallel>], iteration_bounds = array<i64: 1>, scalar_prefetch = 0 : i64, scratch_operands = 0 : i64, tpu.core_type = #tpu.core_type<tc>, window_params = [{transform_indices = @transform_0, window_bounds = array<i64: 32, 256>}, {transform_indices = @transform_1, window_bounds = array<i64: 32, 256>}, {pipeline_mode = #tpu.pipeline_mode<synchronous>, transform_indices = @transform_2, window_bounds = array<i64: 1, 256>}, {pipeline_mode = #tpu.pipeline_mode<synchronous>, transform_indices = @transform_3, window_bounds = array<i64: 1, 256>}, {transform_indices = @transform_4, window_bounds = array<i64: 32, 256>}]} {
    %c0 = arith.constant 0 : index
    %c0_0 = arith.constant 0 : index
    %0 = vector.load %arg1[%c0, %c0_0] : memref<32x256xf32, #tpu.memory_space<vmem>>, vector<32x256xf32>
    %c0_1 = arith.constant 0 : index
    %c0_2 = arith.constant 0 : index
    %1 = vector.load %arg2[%c0_1, %c0_2] : memref<32x256xf32, #tpu.memory_space<vmem>>, vector<32x256xf32>
    %2 = arith.addf %0, %1 : vector<32x256xf32>
    %c0_3 = arith.constant 0 : index
    %c0_4 = arith.constant 0 : index
    %3 = vector.load %arg3[%c0_3, %c0_4] : memref<1x256xf32, #tpu.memory_space<vmem>>, vector<1x256xf32>
    %c0_5 = arith.constant 0 : index
    %c0_6 = arith.constant 0 : index
    %4 = vector.load %arg4[%c0_5, %c0_6] : memref<1x256xf32, #tpu.memory_space<vmem>>, vector<1x256xf32>
    %cst = arith.constant dense<0.000000e+00> : vector<32xf32>
    %5 = vector.multi_reduction <add>, %2, %cst [1] : vector<32x256xf32> to vector<32xf32>
    %6 = vector.shape_cast %5 : vector<32xf32> to vector<32x1xf32>
    %cst_7 = arith.constant 2.560000e+02 : f32
    %7 = vector.broadcast %cst_7 : f32 to vector<32x1xf32>
    %8 = arith.divf %6, %7 : vector<32x1xf32>
    %9 = vector.broadcast %8 : vector<32x1xf32> to vector<32x256xf32>
    %10 = arith.subf %2, %9 : vector<32x256xf32>
    %11 = arith.mulf %10, %10 : vector<32x256xf32>
    %cst_8 = arith.constant dense<0.000000e+00> : vector<32xf32>
    %12 = vector.multi_reduction <add>, %11, %cst_8 [1] : vector<32x256xf32> to vector<32xf32>
    %13 = vector.shape_cast %12 : vector<32xf32> to vector<32x1xf32>
    %cst_9 = arith.constant 2.560000e+02 : f32
    %14 = vector.broadcast %cst_9 : f32 to vector<32x1xf32>
    %15 = arith.divf %13, %14 : vector<32x1xf32>
    %16 = vector.broadcast %8 : vector<32x1xf32> to vector<32x256xf32>
    %17 = arith.subf %2, %16 : vector<32x256xf32>
    %cst_10 = arith.constant 9.99999974E-6 : f32
    %18 = vector.broadcast %cst_10 : f32 to vector<32x1xf32>
    %19 = arith.addf %15, %18 : vector<32x1xf32>
    %20 = math.rsqrt %19 : vector<32x1xf32>
    %21 = vector.broadcast %20 : vector<32x1xf32> to vector<32x256xf32>
    %22 = arith.mulf %17, %21 : vector<32x256xf32>
    %23 = vector.broadcast %3 : vector<1x256xf32> to vector<32x256xf32>
    %24 = arith.mulf %22, %23 : vector<32x256xf32>
    %25 = vector.broadcast %4 : vector<1x256xf32> to vector<32x256xf32>
    %26 = arith.addf %24, %25 : vector<32x256xf32>
    %c0_11 = arith.constant 0 : index
    %c0_12 = arith.constant 0 : index
    %27 = vector.load %arg5[%c0_11, %c0_12] : memref<32x256xf32, #tpu.memory_space<vmem>>, vector<32x256xf32>
    tpu.vector_store %arg5[%c0_11, %c0_12], %26 {strides = array<i32>} : memref<32x256xf32, #tpu.memory_space<vmem>>, vector<32x256xf32>,
    return
  }
  func.func @transform_0(%arg0: i32) -> (i32, i32) {
    %c0_i32 = arith.constant 0 : i32
    %c0_i32_0 = arith.constant 0 : i32
    return %arg0, %c0_i32 : i32, i32
  }
  func.func @transform_1(%arg0: i32) -> (i32, i32) {
    %c0_i32 = arith.constant 0 : i32
    %c0_i32_0 = arith.constant 0 : i32
    return %arg0, %c0_i32 : i32, i32
  }
  func.func @transform_2(%arg0: i32) -> (i32, i32) {
    %c0_i32 = arith.constant 0 : i32
    %c0_i32_0 = arith.constant 0 : i32
    %c0_i32_1 = arith.constant 0 : i32
    return %c0_i32, %c0_i32_0 : i32, i32
  }
  func.func @transform_3(%arg0: i32) -> (i32, i32) {
    %c0_i32 = arith.constant 0 : i32
    %c0_i32_0 = arith.constant 0 : i32
    %c0_i32_1 = arith.constant 0 : i32
    return %c0_i32, %c0_i32_0 : i32, i32
  }
  func.func @transform_4(%arg0: i32) -> (i32, i32) {
    %c0_i32 = arith.constant 0 : i32
    %c0_i32_0 = arith.constant 0 : i32
    return %arg0, %c0_i32 : i32, i32
  }
}

module attributes {stable_mosaic.version = 11 : i64} {
  func.func @_matmul_kernel(%arg0: i32, %arg1: i32, %arg2: i32, %arg3: memref<32x256xf32, #tpu.memory_space<vmem>>, %arg4: memref<256x512xbf16, #tpu.memory_space<vmem>>, %arg5: memref<1x512xf32, #tpu.memory_space<vmem>>, %arg6: memref<32x512xf32, #tpu.memory_space<vmem>>, %arg7: memref<32x512xf32, #tpu.memory_space<vmem>>) attributes {dimension_semantics = [#tpu.dimension_semantics<parallel>, #tpu.dimension_semantics<parallel>, #tpu.dimension_semantics<arbitrary>], iteration_bounds = array<i64: 1, 1, 1>, scalar_prefetch = 0 : i64, scratch_operands = 1 : i64, tpu.core_type = #tpu.core_type<tc>, window_params = [{transform_indices = @transform_0, window_bounds = array<i64: 32, 256>}, {transform_indices = @transform_1, window_bounds = array<i64: 256, 512>}, {transform_indices = @transform_2, window_bounds = array<i64: 1, 512>}, {transform_indices = @transform_3, window_bounds = array<i64: 32, 512>}]} {
    %c0_i32 = arith.constant 0 : i32
    %0 = arith.cmpi eq, %arg2, %c0_i32 : i32
    %1 = arith.extui %0 : i1 to i32
    %c0_i32_0 = arith.constant 0 : i32
    %2 = arith.cmpi ne, %1, %c0_i32_0 : i32
    scf.if %2 {
      %cst_10 = arith.constant 0.000000e+00 : f32
      %13 = vector.broadcast %cst_10 : f32 to vector<32x512xf32>
      %c0_11 = arith.constant 0 : index
      %c0_12 = arith.constant 0 : index
      %14 = vector.load %arg7[%c0_11, %c0_12] : memref<32x512xf32, #tpu.memory_space<vmem>>, vector<32x512xf32>
      tpu.vector_store %arg7[%c0_11, %c0_12], %13 {strides = array<i32>} : memref<32x512xf32, #tpu.memory_space<vmem>>, vector<32x512xf32>,
    } else {
    }
    %c0 = arith.constant 0 : index
    %c0_1 = arith.constant 0 : index
    %3 = vector.load %arg3[%c0, %c0_1] : memref<32x256xf32, #tpu.memory_space<vmem>>, vector<32x256xf32>
    %4 = arith.truncf %3 : vector<32x256xf32> to vector<32x256xbf16>
    %c0_2 = arith.constant 0 : index
    %c0_3 = arith.constant 0 : index
    %5 = vector.load %arg4[%c0_2, %c0_3] : memref<256x512xbf16, #tpu.memory_space<vmem>>, vector<256x512xbf16>
    %c0_4 = arith.constant 0 : index
    %c0_5 = arith.constant 0 : index
    %6 = vector.load %arg7[%c0_4, %c0_5] : memref<32x512xf32, #tpu.memory_space<vmem>>, vector<32x512xf32>
    %cst = arith.constant dense<0.000000e+00> : vector<32x512xf32>
    %7 = tpu.matmul %4, %5, %cst {dimension_numbers = #tpu.dot_dimension_numbers<[1], [0], [0], [1], [0, 0, 1, 1], [], []>} : vector<32x256xbf16>, vector<256x512xbf16>, vector<32x512xf32> -> vector<32x512xf32>
    %8 = arith.addf %6, %7 : vector<32x512xf32>
    %c0_6 = arith.constant 0 : index
    %c0_7 = arith.constant 0 : index
    %9 = vector.load %arg7[%c0_6, %c0_7] : memref<32x512xf32, #tpu.memory_space<vmem>>, vector<32x512xf32>
    tpu.vector_store %arg7[%c0_6, %c0_7], %8 {strides = array<i32>} : memref<32x512xf32, #tpu.memory_space<vmem>>, vector<32x512xf32>,
    %c0_i32_8 = arith.constant 0 : i32
    %10 = arith.cmpi eq, %arg2, %c0_i32_8 : i32
    %11 = arith.extui %10 : i1 to i32
    %c0_i32_9 = arith.constant 0 : i32
    %12 = arith.cmpi ne, %11, %c0_i32_9 : i32
    scf.if %12 {
      %c0_10 = arith.constant 0 : index
      %c0_11 = arith.constant 0 : index
      %13 = vector.load %arg7[%c0_10, %c0_11] : memref<32x512xf32, #tpu.memory_space<vmem>>, vector<32x512xf32>
      %c0_12 = arith.constant 0 : index
      %c0_13 = arith.constant 0 : index
      %14 = vector.load %arg5[%c0_12, %c0_13] : memref<1x512xf32, #tpu.memory_space<vmem>>, vector<1x512xf32>
      %15 = vector.broadcast %14 : vector<1x512xf32> to vector<32x512xf32>
      %16 = arith.addf %13, %15 : vector<32x512xf32>
      %c0_14 = arith.constant 0 : index
      %c0_15 = arith.constant 0 : index
      %17 = vector.load %arg6[%c0_14, %c0_15] : memref<32x512xf32, #tpu.memory_space<vmem>>, vector<32x512xf32>
      tpu.vector_store %arg6[%c0_14, %c0_15], %16 {strides = array<i32>} : memref<32x512xf32, #tpu.memory_space<vmem>>, vector<32x512xf32>,
    } else {
    }
    return
  }
  func.func @transform_0(%arg0: i32, %arg1: i32, %arg2: i32) -> (i32, i32) {
    %c0_i32 = arith.constant 0 : i32
    return %arg0, %arg2 : i32, i32
  }
  func.func @transform_1(%arg0: i32, %arg1: i32, %arg2: i32) -> (i32, i32) {
    %c0_i32 = arith.constant 0 : i32
    return %arg2, %arg1 : i32, i32
  }
  func.func @transform_2(%arg0: i32, %arg1: i32, %arg2: i32) -> (i32, i32) {
    %c0_i32 = arith.constant 0 : i32
    %c0_i32_0 = arith.constant 0 : i32
    return %c0_i32, %arg1 : i32, i32
  }
  func.func @transform_3(%arg0: i32, %arg1: i32, %arg2: i32) -> (i32, i32) {
    %c0_i32 = arith.constant 0 : i32
    return %arg0, %arg1 : i32, i32
  }
}

module attributes {stable_mosaic.version = 11 : i64} {
  func.func @_matmul_kernel(%arg0: i32, %arg1: i32, %arg2: i32, %arg3: memref<32x256xf32, #tpu.memory_space<vmem>>, %arg4: memref<256x256xbf16, #tpu.memory_space<vmem>>, %arg5: memref<1x256xf32, #tpu.memory_space<vmem>>, %arg6: memref<32x256xf32, #tpu.memory_space<vmem>>, %arg7: memref<32x256xf32, #tpu.memory_space<vmem>>) attributes {dimension_semantics = [#tpu.dimension_semantics<parallel>, #tpu.dimension_semantics<parallel>, #tpu.dimension_semantics<arbitrary>], iteration_bounds = array<i64: 1, 1, 1>, scalar_prefetch = 0 : i64, scratch_operands = 1 : i64, tpu.core_type = #tpu.core_type<tc>, window_params = [{transform_indices = @transform_0, window_bounds = array<i64: 32, 256>}, {transform_indices = @transform_1, window_bounds = array<i64: 256, 256>}, {transform_indices = @transform_2, window_bounds = array<i64: 1, 256>}, {transform_indices = @transform_3, window_bounds = array<i64: 32, 256>}]} {
    %c0_i32 = arith.constant 0 : i32
    %0 = arith.cmpi eq, %arg2, %c0_i32 : i32
    %1 = arith.extui %0 : i1 to i32
    %c0_i32_0 = arith.constant 0 : i32
    %2 = arith.cmpi ne, %1, %c0_i32_0 : i32
    scf.if %2 {
      %cst_10 = arith.constant 0.000000e+00 : f32
      %13 = vector.broadcast %cst_10 : f32 to vector<32x256xf32>
      %c0_11 = arith.constant 0 : index
      %c0_12 = arith.constant 0 : index
      %14 = vector.load %arg7[%c0_11, %c0_12] : memref<32x256xf32, #tpu.memory_space<vmem>>, vector<32x256xf32>
      tpu.vector_store %arg7[%c0_11, %c0_12], %13 {strides = array<i32>} : memref<32x256xf32, #tpu.memory_space<vmem>>, vector<32x256xf32>,
    } else {
    }
    %c0 = arith.constant 0 : index
    %c0_1 = arith.constant 0 : index
    %3 = vector.load %arg3[%c0, %c0_1] : memref<32x256xf32, #tpu.memory_space<vmem>>, vector<32x256xf32>
    %4 = arith.truncf %3 : vector<32x256xf32> to vector<32x256xbf16>
    %c0_2 = arith.constant 0 : index
    %c0_3 = arith.constant 0 : index
    %5 = vector.load %arg4[%c0_2, %c0_3] : memref<256x256xbf16, #tpu.memory_space<vmem>>, vector<256x256xbf16>
    %c0_4 = arith.constant 0 : index
    %c0_5 = arith.constant 0 : index
    %6 = vector.load %arg7[%c0_4, %c0_5] : memref<32x256xf32, #tpu.memory_space<vmem>>, vector<32x256xf32>
    %cst = arith.constant dense<0.000000e+00> : vector<32x256xf32>
    %7 = tpu.matmul %4, %5, %cst {dimension_numbers = #tpu.dot_dimension_numbers<[1], [0], [0], [1], [0, 0, 1, 1], [], []>} : vector<32x256xbf16>, vector<256x256xbf16>, vector<32x256xf32> -> vector<32x256xf32>
    %8 = arith.addf %6, %7 : vector<32x256xf32>
    %c0_6 = arith.constant 0 : index
    %c0_7 = arith.constant 0 : index
    %9 = vector.load %arg7[%c0_6, %c0_7] : memref<32x256xf32, #tpu.memory_space<vmem>>, vector<32x256xf32>
    tpu.vector_store %arg7[%c0_6, %c0_7], %8 {strides = array<i32>} : memref<32x256xf32, #tpu.memory_space<vmem>>, vector<32x256xf32>,
    %c0_i32_8 = arith.constant 0 : i32
    %10 = arith.cmpi eq, %arg2, %c0_i32_8 : i32
    %11 = arith.extui %10 : i1 to i32
    %c0_i32_9 = arith.constant 0 : i32
    %12 = arith.cmpi ne, %11, %c0_i32_9 : i32
    scf.if %12 {
      %c0_10 = arith.constant 0 : index
      %c0_11 = arith.constant 0 : index
      %13 = vector.load %arg7[%c0_10, %c0_11] : memref<32x256xf32, #tpu.memory_space<vmem>>, vector<32x256xf32>
      %c0_12 = arith.constant 0 : index
      %c0_13 = arith.constant 0 : index
      %14 = vector.load %arg5[%c0_12, %c0_13] : memref<1x256xf32, #tpu.memory_space<vmem>>, vector<1x256xf32>
      %15 = vector.broadcast %14 : vector<1x256xf32> to vector<32x256xf32>
      %16 = arith.addf %13, %15 : vector<32x256xf32>
      %c0_14 = arith.constant 0 : index
      %c0_15 = arith.constant 0 : index
      %17 = vector.load %arg6[%c0_14, %c0_15] : memref<32x256xf32, #tpu.memory_space<vmem>>, vector<32x256xf32>
      tpu.vector_store %arg6[%c0_14, %c0_15], %16 {strides = array<i32>} : memref<32x256xf32, #tpu.memory_space<vmem>>, vector<32x256xf32>,
    } else {
    }
    return
  }
  func.func @transform_0(%arg0: i32, %arg1: i32, %arg2: i32) -> (i32, i32) {
    %c0_i32 = arith.constant 0 : i32
    return %arg0, %arg2 : i32, i32
  }
  func.func @transform_1(%arg0: i32, %arg1: i32, %arg2: i32) -> (i32, i32) {
    %c0_i32 = arith.constant 0 : i32
    return %arg2, %arg1 : i32, i32
  }
  func.func @transform_2(%arg0: i32, %arg1: i32, %arg2: i32) -> (i32, i32) {
    %c0_i32 = arith.constant 0 : i32
    %c0_i32_0 = arith.constant 0 : i32
    return %c0_i32, %arg1 : i32, i32
  }
  func.func @transform_3(%arg0: i32, %arg1: i32, %arg2: i32) -> (i32, i32) {
    %c0_i32 = arith.constant 0 : i32
    return %arg0, %arg1 : i32, i32
  }
}

module attributes {stable_mosaic.version = 11 : i64} {
  func.func @_flash_attn_kernel(%arg0: i32, %arg1: i32, %arg2: i32, %arg3: i32, %arg4: memref<1x16x128xf32, #tpu.memory_space<vmem>>, %arg5: memref<1x16x128xf32, #tpu.memory_space<vmem>>, %arg6: memref<1x16x128xf32, #tpu.memory_space<vmem>>, %arg7: memref<1x16x128xf32, #tpu.memory_space<vmem>>, %arg8: memref<16x1xf32, #tpu.memory_space<vmem>>, %arg9: memref<16x1xf32, #tpu.memory_space<vmem>>, %arg10: memref<16x128xf32, #tpu.memory_space<vmem>>) attributes {dimension_semantics = [#tpu.dimension_semantics<parallel>, #tpu.dimension_semantics<parallel>, #tpu.dimension_semantics<parallel>, #tpu.dimension_semantics<arbitrary>], iteration_bounds = array<i64: 2, 2, 1, 1>, scalar_prefetch = 0 : i64, scratch_operands = 3 : i64, tpu.core_type = #tpu.core_type<tc>, window_params = [{transform_indices = @transform_0, window_bounds = array<i64: 1, 16, 128>}, {transform_indices = @transform_1, window_bounds = array<i64: 1, 16, 128>}, {transform_indices = @transform_2, window_bounds = array<i64: 1, 16, 128>}, {transform_indices = @transform_3, window_bounds = array<i64: 1, 16, 128>}]} {
    %c0_i32 = arith.constant 0 : i32
    %0 = arith.cmpi eq, %arg3, %c0_i32 : i32
    %1 = arith.extui %0 : i1 to i32
    %c0_i32_0 = arith.constant 0 : i32
    %2 = arith.cmpi ne, %1, %c0_i32_0 : i32
    scf.if %2 {
      %cst_27 = arith.constant 0xFF800000 : f32
      %41 = vector.broadcast %cst_27 : f32 to vector<16x1xf32>
      %c0_28 = arith.constant 0 : index
      %c0_29 = arith.constant 0 : index
      %42 = vector.load %arg8[%c0_28, %c0_29] : memref<16x1xf32, #tpu.memory_space<vmem>>, vector<16x1xf32>
      tpu.vector_store %arg8[%c0_28, %c0_29], %41 {strides = array<i32>} : memref<16x1xf32, #tpu.memory_space<vmem>>, vector<16x1xf32>,
      %cst_30 = arith.constant 0.000000e+00 : f32
      %43 = vector.broadcast %cst_30 : f32 to vector<16x1xf32>
      %c0_31 = arith.constant 0 : index
      %c0_32 = arith.constant 0 : index
      %44 = vector.load %arg9[%c0_31, %c0_32] : memref<16x1xf32, #tpu.memory_space<vmem>>, vector<16x1xf32>
      tpu.vector_store %arg9[%c0_31, %c0_32], %43 {strides = array<i32>} : memref<16x1xf32, #tpu.memory_space<vmem>>, vector<16x1xf32>,
      %cst_33 = arith.constant 0.000000e+00 : f32
      %45 = vector.broadcast %cst_33 : f32 to vector<16x128xf32>
      %c0_34 = arith.constant 0 : index
      %c0_35 = arith.constant 0 : index
      %46 = vector.load %arg10[%c0_34, %c0_35] : memref<16x128xf32, #tpu.memory_space<vmem>>, vector<16x128xf32>
      tpu.vector_store %arg10[%c0_34, %c0_35], %45 {strides = array<i32>} : memref<16x128xf32, #tpu.memory_space<vmem>>, vector<16x128xf32>,
    } else {
    }
    %c0 = arith.constant 0 : index
    %c0_1 = arith.constant 0 : index
    %c0_2 = arith.constant 0 : index
    %3 = vector.load %arg4[%c0, %c0_1, %c0_2] : memref<1x16x128xf32, #tpu.memory_space<vmem>>, vector<1x16x128xf32>
    %4 = vector.shape_cast %3 : vector<1x16x128xf32> to vector<16x128xf32>
    %5 = arith.truncf %4 : vector<16x128xf32> to vector<16x128xbf16>
    %c0_3 = arith.constant 0 : index
    %c0_4 = arith.constant 0 : index
    %c0_5 = arith.constant 0 : index
    %6 = vector.load %arg5[%c0_3, %c0_4, %c0_5] : memref<1x16x128xf32, #tpu.memory_space<vmem>>, vector<1x16x128xf32>
    %7 = vector.shape_cast %6 : vector<1x16x128xf32> to vector<16x128xf32>
    %8 = arith.truncf %7 : vector<16x128xf32> to vector<16x128xbf16>
    %cst = arith.constant dense<0.000000e+00> : vector<16x16xf32>
    %9 = tpu.matmul %5, %8, %cst {dimension_numbers = #tpu.dot_dimension_numbers<[1], [1], [0], [0], [0, 0, 1, 0], [], []>} : vector<16x128xbf16>, vector<16x128xbf16>, vector<16x16xf32> -> vector<16x16xf32>
    %cst_6 = arith.constant 0.0883883461 : f32
    %10 = vector.broadcast %cst_6 : f32 to vector<16x16xf32>
    %11 = arith.mulf %9, %10 : vector<16x16xf32>
    %c0_7 = arith.constant 0 : index
    %c0_8 = arith.constant 0 : index
    %12 = vector.load %arg8[%c0_7, %c0_8] : memref<16x1xf32, #tpu.memory_space<vmem>>, vector<16x1xf32>
    %cst_9 = arith.constant dense<0xFF800000> : vector<16xf32>
    %13 = vector.multi_reduction <maximumf>, %11, %cst_9 [1] : vector<16x16xf32> to vector<16xf32>
    %14 = vector.shape_cast %13 : vector<16xf32> to vector<16x1xf32>
    %15 = arith.maximumf %12, %14 : vector<16x1xf32>
    %16 = arith.subf %12, %15 : vector<16x1xf32>
    %17 = math.exp %16 : vector<16x1xf32>
    %18 = vector.broadcast %15 : vector<16x1xf32> to vector<16x16xf32>
    %19 = arith.subf %11, %18 : vector<16x16xf32>
    %20 = math.exp %19 : vector<16x16xf32>
    %c0_10 = arith.constant 0 : index
    %c0_11 = arith.constant 0 : index
    %21 = vector.load %arg9[%c0_10, %c0_11] : memref<16x1xf32, #tpu.memory_space<vmem>>, vector<16x1xf32>
    %22 = arith.mulf %17, %21 : vector<16x1xf32>
    %cst_12 = arith.constant dense<0.000000e+00> : vector<16xf32>
    %23 = vector.multi_reduction <add>, %20, %cst_12 [1] : vector<16x16xf32> to vector<16xf32>
    %24 = vector.shape_cast %23 : vector<16xf32> to vector<16x1xf32>
    %25 = arith.addf %22, %24 : vector<16x1xf32>
    %c0_13 = arith.constant 0 : index
    %c0_14 = arith.constant 0 : index
    %26 = vector.load %arg9[%c0_13, %c0_14] : memref<16x1xf32, #tpu.memory_space<vmem>>, vector<16x1xf32>
    tpu.vector_store %arg9[%c0_13, %c0_14], %25 {strides = array<i32>} : memref<16x1xf32, #tpu.memory_space<vmem>>, vector<16x1xf32>,
    %c0_15 = arith.constant 0 : index
    %c0_16 = arith.constant 0 : index
    %27 = vector.load %arg10[%c0_15, %c0_16] : memref<16x128xf32, #tpu.memory_space<vmem>>, vector<16x128xf32>
    %28 = vector.broadcast %17 : vector<16x1xf32> to vector<16x128xf32>
    %29 = arith.mulf %28, %27 : vector<16x128xf32>
    %30 = arith.truncf %20 : vector<16x16xf32> to vector<16x16xbf16>
    %c0_17 = arith.constant 0 : index
    %c0_18 = arith.constant 0 : index
    %c0_19 = arith.constant 0 : index
    %31 = vector.load %arg6[%c0_17, %c0_18, %c0_19] : memref<1x16x128xf32, #tpu.memory_space<vmem>>, vector<1x16x128xf32>
    %32 = vector.shape_cast %31 : vector<1x16x128xf32> to vector<16x128xf32>
    %33 = arith.truncf %32 : vector<16x128xf32> to vector<16x128xbf16>
    %cst_20 = arith.constant dense<0.000000e+00> : vector<16x128xf32>
    %34 = tpu.matmul %30, %33, %cst_20 {dimension_numbers = #tpu.dot_dimension_numbers<[1], [0], [0], [1], [0, 0, 1, 1], [], []>} : vector<16x16xbf16>, vector<16x128xbf16>, vector<16x128xf32> -> vector<16x128xf32>
    %35 = arith.addf %29, %34 : vector<16x128xf32>
    %c0_21 = arith.constant 0 : index
    %c0_22 = arith.constant 0 : index
    %36 = vector.load %arg10[%c0_21, %c0_22] : memref<16x128xf32, #tpu.memory_space<vmem>>, vector<16x128xf32>
    tpu.vector_store %arg10[%c0_21, %c0_22], %35 {strides = array<i32>} : memref<16x128xf32, #tpu.memory_space<vmem>>, vector<16x128xf32>,
    %c0_23 = arith.constant 0 : index
    %c0_24 = arith.constant 0 : index
    %37 = vector.load %arg8[%c0_23, %c0_24] : memref<16x1xf32, #tpu.memory_space<vmem>>, vector<16x1xf32>
    tpu.vector_store %arg8[%c0_23, %c0_24], %15 {strides = array<i32>} : memref<16x1xf32, #tpu.memory_space<vmem>>, vector<16x1xf32>,
    %c0_i32_25 = arith.constant 0 : i32
    %38 = arith.cmpi eq, %arg3, %c0_i32_25 : i32
    %39 = arith.extui %38 : i1 to i32
    %c0_i32_26 = arith.constant 0 : i32
    %40 = arith.cmpi ne, %39, %c0_i32_26 : i32
    scf.if %40 {
      %c0_27 = arith.constant 0 : index
      %c0_28 = arith.constant 0 : index
      %41 = vector.load %arg9[%c0_27, %c0_28] : memref<16x1xf32, #tpu.memory_space<vmem>>, vector<16x1xf32>
      %42 = tpu.reciprocal %41 {approx = true} : vector<16x1xf32> -> vector<16x1xf32>
      %c0_29 = arith.constant 0 : index
      %c0_30 = arith.constant 0 : index
      %43 = vector.load %arg10[%c0_29, %c0_30] : memref<16x128xf32, #tpu.memory_space<vmem>>, vector<16x128xf32>
      %44 = vector.broadcast %42 : vector<16x1xf32> to vector<16x128xf32>
      %45 = arith.mulf %43, %44 : vector<16x128xf32>
      %c0_31 = arith.constant 0 : index
      %c0_32 = arith.constant 0 : index
      %c0_33 = arith.constant 0 : index
      %46 = vector.load %arg7[%c0_31, %c0_32, %c0_33] : memref<1x16x128xf32, #tpu.memory_space<vmem>>, vector<1x16x128xf32>
      %47 = vector.shape_cast %46 : vector<1x16x128xf32> to vector<16x128xf32>
      %48 = vector.shape_cast %45 : vector<16x128xf32> to vector<1x16x128xf32>
      tpu.vector_store %arg7[%c0_31, %c0_32, %c0_33], %48 {strides = array<i32>} : memref<1x16x128xf32, #tpu.memory_space<vmem>>, vector<1x16x128xf32>,
    } else {
    }
    return
  }
  func.func @transform_0(%arg0: i32, %arg1: i32, %arg2: i32, %arg3: i32) -> (i32, i32, i32) {
    %c0_i32 = arith.constant 0 : i32
    %0 = arith.addi %c0_i32, %arg1 : i32
    %c0_i32_0 = arith.constant 0 : i32
    return %arg0, %arg2, %0 : i32, i32, i32
  }
  func.func @transform_1(%arg0: i32, %arg1: i32, %arg2: i32, %arg3: i32) -> (i32, i32, i32) {
    %c0_i32 = arith.constant 0 : i32
    %0 = arith.addi %c0_i32, %arg1 : i32
    %c0_i32_0 = arith.constant 0 : i32
    return %arg0, %arg3, %0 : i32, i32, i32
  }
  func.func @transform_2(%arg0: i32, %arg1: i32, %arg2: i32, %arg3: i32) -> (i32, i32, i32) {
    %c2_i32 = arith.constant 2 : i32
    %0 = arith.addi %c2_i32, %arg1 : i32
    %c0_i32 = arith.constant 0 : i32
    return %arg0, %arg3, %0 : i32, i32, i32
  }
  func.func @transform_3(%arg0: i32, %arg1: i32, %arg2: i32, %arg3: i32) -> (i32, i32, i32) {
    %c0_i32 = arith.constant 0 : i32
    return %arg0, %arg2, %arg1 : i32, i32, i32
  }
}

module attributes {stable_mosaic.version = 11 : i64} {
  func.func @_matmul_kernel(%arg0: i32, %arg1: i32, %arg2: i32, %arg3: memref<32x256xf32, #tpu.memory_space<vmem>>, %arg4: memref<256x512xbf16, #tpu.memory_space<vmem>>, %arg5: memref<1x512xf32, #tpu.memory_space<vmem>>, %arg6: memref<32x512xf32, #tpu.memory_space<vmem>>, %arg7: memref<32x512xf32, #tpu.memory_space<vmem>>) attributes {dimension_semantics = [#tpu.dimension_semantics<parallel>, #tpu.dimension_semantics<parallel>, #tpu.dimension_semantics<arbitrary>], iteration_bounds = array<i64: 1, 4, 1>, scalar_prefetch = 0 : i64, scratch_operands = 1 : i64, tpu.core_type = #tpu.core_type<tc>, window_params = [{transform_indices = @transform_0, window_bounds = array<i64: 32, 256>}, {transform_indices = @transform_1, window_bounds = array<i64: 256, 512>}, {transform_indices = @transform_2, window_bounds = array<i64: 1, 512>}, {transform_indices = @transform_3, window_bounds = array<i64: 32, 512>}]} {
    %c0_i32 = arith.constant 0 : i32
    %0 = arith.cmpi eq, %arg2, %c0_i32 : i32
    %1 = arith.extui %0 : i1 to i32
    %c0_i32_0 = arith.constant 0 : i32
    %2 = arith.cmpi ne, %1, %c0_i32_0 : i32
    scf.if %2 {
      %cst_10 = arith.constant 0.000000e+00 : f32
      %13 = vector.broadcast %cst_10 : f32 to vector<32x512xf32>
      %c0_11 = arith.constant 0 : index
      %c0_12 = arith.constant 0 : index
      %14 = vector.load %arg7[%c0_11, %c0_12] : memref<32x512xf32, #tpu.memory_space<vmem>>, vector<32x512xf32>
      tpu.vector_store %arg7[%c0_11, %c0_12], %13 {strides = array<i32>} : memref<32x512xf32, #tpu.memory_space<vmem>>, vector<32x512xf32>,
    } else {
    }
    %c0 = arith.constant 0 : index
    %c0_1 = arith.constant 0 : index
    %3 = vector.load %arg3[%c0, %c0_1] : memref<32x256xf32, #tpu.memory_space<vmem>>, vector<32x256xf32>
    %4 = arith.truncf %3 : vector<32x256xf32> to vector<32x256xbf16>
    %c0_2 = arith.constant 0 : index
    %c0_3 = arith.constant 0 : index
    %5 = vector.load %arg4[%c0_2, %c0_3] : memref<256x512xbf16, #tpu.memory_space<vmem>>, vector<256x512xbf16>
    %c0_4 = arith.constant 0 : index
    %c0_5 = arith.constant 0 : index
    %6 = vector.load %arg7[%c0_4, %c0_5] : memref<32x512xf32, #tpu.memory_space<vmem>>, vector<32x512xf32>
    %cst = arith.constant dense<0.000000e+00> : vector<32x512xf32>
    %7 = tpu.matmul %4, %5, %cst {dimension_numbers = #tpu.dot_dimension_numbers<[1], [0], [0], [1], [0, 0, 1, 1], [], []>} : vector<32x256xbf16>, vector<256x512xbf16>, vector<32x512xf32> -> vector<32x512xf32>
    %8 = arith.addf %6, %7 : vector<32x512xf32>
    %c0_6 = arith.constant 0 : index
    %c0_7 = arith.constant 0 : index
    %9 = vector.load %arg7[%c0_6, %c0_7] : memref<32x512xf32, #tpu.memory_space<vmem>>, vector<32x512xf32>
    tpu.vector_store %arg7[%c0_6, %c0_7], %8 {strides = array<i32>} : memref<32x512xf32, #tpu.memory_space<vmem>>, vector<32x512xf32>,
    %c0_i32_8 = arith.constant 0 : i32
    %10 = arith.cmpi eq, %arg2, %c0_i32_8 : i32
    %11 = arith.extui %10 : i1 to i32
    %c0_i32_9 = arith.constant 0 : i32
    %12 = arith.cmpi ne, %11, %c0_i32_9 : i32
    scf.if %12 {
      %c0_10 = arith.constant 0 : index
      %c0_11 = arith.constant 0 : index
      %13 = vector.load %arg7[%c0_10, %c0_11] : memref<32x512xf32, #tpu.memory_space<vmem>>, vector<32x512xf32>
      %c0_12 = arith.constant 0 : index
      %c0_13 = arith.constant 0 : index
      %14 = vector.load %arg5[%c0_12, %c0_13] : memref<1x512xf32, #tpu.memory_space<vmem>>, vector<1x512xf32>
      %15 = vector.broadcast %14 : vector<1x512xf32> to vector<32x512xf32>
      %16 = arith.addf %13, %15 : vector<32x512xf32>
      %cst_14 = arith.constant 0.000000e+00 : f32
      %17 = vector.broadcast %cst_14 : f32 to vector<32x512xf32>
      %18 = arith.maximumf %16, %17 : vector<32x512xf32>
      %c0_15 = arith.constant 0 : index
      %c0_16 = arith.constant 0 : index
      %19 = vector.load %arg6[%c0_15, %c0_16] : memref<32x512xf32, #tpu.memory_space<vmem>>, vector<32x512xf32>
      tpu.vector_store %arg6[%c0_15, %c0_16], %18 {strides = array<i32>} : memref<32x512xf32, #tpu.memory_space<vmem>>, vector<32x512xf32>,
    } else {
    }
    return
  }
  func.func @transform_0(%arg0: i32, %arg1: i32, %arg2: i32) -> (i32, i32) {
    %c0_i32 = arith.constant 0 : i32
    return %arg0, %arg2 : i32, i32
  }
  func.func @transform_1(%arg0: i32, %arg1: i32, %arg2: i32) -> (i32, i32) {
    %c0_i32 = arith.constant 0 : i32
    return %arg2, %arg1 : i32, i32
  }
  func.func @transform_2(%arg0: i32, %arg1: i32, %arg2: i32) -> (i32, i32) {
    %c0_i32 = arith.constant 0 : i32
    %c0_i32_0 = arith.constant 0 : i32
    return %c0_i32, %arg1 : i32, i32
  }
  func.func @transform_3(%arg0: i32, %arg1: i32, %arg2: i32) -> (i32, i32) {
    %c0_i32 = arith.constant 0 : i32
    return %arg0, %arg1 : i32, i32
  }
}

module attributes {stable_mosaic.version = 11 : i64} {
  func.func @_ln_kernel(%arg0: i32, %arg1: memref<32x256xf32, #tpu.memory_space<vmem>>, %arg2: memref<1x256xf32, #tpu.memory_space<vmem>>, %arg3: memref<1x256xf32, #tpu.memory_space<vmem>>, %arg4: memref<32x256xf32, #tpu.memory_space<vmem>>) attributes {dimension_semantics = [#tpu.dimension_semantics<parallel>], iteration_bounds = array<i64: 1>, scalar_prefetch = 0 : i64, scratch_operands = 0 : i64, tpu.core_type = #tpu.core_type<tc>, window_params = [{transform_indices = @transform_0, window_bounds = array<i64: 32, 256>}, {pipeline_mode = #tpu.pipeline_mode<synchronous>, transform_indices = @transform_1, window_bounds = array<i64: 1, 256>}, {pipeline_mode = #tpu.pipeline_mode<synchronous>, transform_indices = @transform_2, window_bounds = array<i64: 1, 256>}, {transform_indices = @transform_3, window_bounds = array<i64: 32, 256>}]} {
    %c0 = arith.constant 0 : index
    %c0_0 = arith.constant 0 : index
    %0 = vector.load %arg1[%c0, %c0_0] : memref<32x256xf32, #tpu.memory_space<vmem>>, vector<32x256xf32>
    %c0_1 = arith.constant 0 : index
    %c0_2 = arith.constant 0 : index
    %1 = vector.load %arg2[%c0_1, %c0_2] : memref<1x256xf32, #tpu.memory_space<vmem>>, vector<1x256xf32>
    %c0_3 = arith.constant 0 : index
    %c0_4 = arith.constant 0 : index
    %2 = vector.load %arg3[%c0_3, %c0_4] : memref<1x256xf32, #tpu.memory_space<vmem>>, vector<1x256xf32>
    %cst = arith.constant dense<0.000000e+00> : vector<32xf32>
    %3 = vector.multi_reduction <add>, %0, %cst [1] : vector<32x256xf32> to vector<32xf32>
    %4 = vector.shape_cast %3 : vector<32xf32> to vector<32x1xf32>
    %cst_5 = arith.constant 2.560000e+02 : f32
    %5 = vector.broadcast %cst_5 : f32 to vector<32x1xf32>
    %6 = arith.divf %4, %5 : vector<32x1xf32>
    %7 = vector.broadcast %6 : vector<32x1xf32> to vector<32x256xf32>
    %8 = arith.subf %0, %7 : vector<32x256xf32>
    %9 = arith.mulf %8, %8 : vector<32x256xf32>
    %cst_6 = arith.constant dense<0.000000e+00> : vector<32xf32>
    %10 = vector.multi_reduction <add>, %9, %cst_6 [1] : vector<32x256xf32> to vector<32xf32>
    %11 = vector.shape_cast %10 : vector<32xf32> to vector<32x1xf32>
    %cst_7 = arith.constant 2.560000e+02 : f32
    %12 = vector.broadcast %cst_7 : f32 to vector<32x1xf32>
    %13 = arith.divf %11, %12 : vector<32x1xf32>
    %14 = vector.broadcast %6 : vector<32x1xf32> to vector<32x256xf32>
    %15 = arith.subf %0, %14 : vector<32x256xf32>
    %cst_8 = arith.constant 9.99999974E-6 : f32
    %16 = vector.broadcast %cst_8 : f32 to vector<32x1xf32>
    %17 = arith.addf %13, %16 : vector<32x1xf32>
    %18 = math.rsqrt %17 : vector<32x1xf32>
    %19 = vector.broadcast %18 : vector<32x1xf32> to vector<32x256xf32>
    %20 = arith.mulf %15, %19 : vector<32x256xf32>
    %21 = vector.broadcast %1 : vector<1x256xf32> to vector<32x256xf32>
    %22 = arith.mulf %20, %21 : vector<32x256xf32>
    %23 = vector.broadcast %2 : vector<1x256xf32> to vector<32x256xf32>
    %24 = arith.addf %22, %23 : vector<32x256xf32>
    %c0_9 = arith.constant 0 : index
    %c0_10 = arith.constant 0 : index
    %25 = vector.load %arg4[%c0_9, %c0_10] : memref<32x256xf32, #tpu.memory_space<vmem>>, vector<32x256xf32>
    tpu.vector_store %arg4[%c0_9, %c0_10], %24 {strides = array<i32>} : memref<32x256xf32, #tpu.memory_space<vmem>>, vector<32x256xf32>,
    return
  }
  func.func @transform_0(%arg0: i32) -> (i32, i32) {
    %c0_i32 = arith.constant 0 : i32
    %c0_i32_0 = arith.constant 0 : i32
    return %arg0, %c0_i32 : i32, i32
  }
  func.func @transform_1(%arg0: i32) -> (i32, i32) {
    %c0_i32 = arith.constant 0 : i32
    %c0_i32_0 = arith.constant 0 : i32
    %c0_i32_1 = arith.constant 0 : i32
    return %c0_i32, %c0_i32_0 : i32, i32
  }
  func.func @transform_2(%arg0: i32) -> (i32, i32) {
    %c0_i32 = arith.constant 0 : i32
    %c0_i32_0 = arith.constant 0 : i32
    %c0_i32_1 = arith.constant 0 : i32
    return %c0_i32, %c0_i32_0 : i32, i32
  }
  func.func @transform_3(%arg0: i32) -> (i32, i32) {
    %c0_i32 = arith.constant 0 : i32
    %c0_i32_0 = arith.constant 0 : i32
    return %arg0, %c0_i32 : i32, i32
  }
}

module attributes {stable_mosaic.version = 11 : i64} {
  func.func @_matmul_kernel(%arg0: i32, %arg1: i32, %arg2: i32, %arg3: memref<32x512xf32, #tpu.memory_space<vmem>>, %arg4: memref<512x256xbf16, #tpu.memory_space<vmem>>, %arg5: memref<1x256xf32, #tpu.memory_space<vmem>>, %arg6: memref<32x256xf32, #tpu.memory_space<vmem>>, %arg7: memref<32x256xf32, #tpu.memory_space<vmem>>) attributes {dimension_semantics = [#tpu.dimension_semantics<parallel>, #tpu.dimension_semantics<parallel>, #tpu.dimension_semantics<arbitrary>], iteration_bounds = array<i64: 1, 1, 4>, scalar_prefetch = 0 : i64, scratch_operands = 1 : i64, tpu.core_type = #tpu.core_type<tc>, window_params = [{transform_indices = @transform_0, window_bounds = array<i64: 32, 512>}, {transform_indices = @transform_1, window_bounds = array<i64: 512, 256>}, {transform_indices = @transform_2, window_bounds = array<i64: 1, 256>}, {transform_indices = @transform_3, window_bounds = array<i64: 32, 256>}]} {
    %c0_i32 = arith.constant 0 : i32
    %0 = arith.cmpi eq, %arg2, %c0_i32 : i32
    %1 = arith.extui %0 : i1 to i32
    %c0_i32_0 = arith.constant 0 : i32
    %2 = arith.cmpi ne, %1, %c0_i32_0 : i32
    scf.if %2 {
      %cst_9 = arith.constant 0.000000e+00 : f32
      %13 = vector.broadcast %cst_9 : f32 to vector<32x256xf32>
      %c0_10 = arith.constant 0 : index
      %c0_11 = arith.constant 0 : index
      %14 = vector.load %arg7[%c0_10, %c0_11] : memref<32x256xf32, #tpu.memory_space<vmem>>, vector<32x256xf32>
      tpu.vector_store %arg7[%c0_10, %c0_11], %13 {strides = array<i32>} : memref<32x256xf32, #tpu.memory_space<vmem>>, vector<32x256xf32>,
    } else {
    }
    %c0 = arith.constant 0 : index
    %c0_1 = arith.constant 0 : index
    %3 = vector.load %arg3[%c0, %c0_1] : memref<32x512xf32, #tpu.memory_space<vmem>>, vector<32x512xf32>
    %4 = arith.truncf %3 : vector<32x512xf32> to vector<32x512xbf16>
    %c0_2 = arith.constant 0 : index
    %c0_3 = arith.constant 0 : index
    %5 = vector.load %arg4[%c0_2, %c0_3] : memref<512x256xbf16, #tpu.memory_space<vmem>>, vector<512x256xbf16>
    %c0_4 = arith.constant 0 : index
    %c0_5 = arith.constant 0 : index
    %6 = vector.load %arg7[%c0_4, %c0_5] : memref<32x256xf32, #tpu.memory_space<vmem>>, vector<32x256xf32>
    %cst = arith.constant dense<0.000000e+00> : vector<32x256xf32>
    %7 = tpu.matmul %4, %5, %cst {dimension_numbers = #tpu.dot_dimension_numbers<[1], [0], [0], [1], [0, 0, 1, 1], [], []>} : vector<32x512xbf16>, vector<512x256xbf16>, vector<32x256xf32> -> vector<32x256xf32>
    %8 = arith.addf %6, %7 : vector<32x256xf32>
    %c0_6 = arith.constant 0 : index
    %c0_7 = arith.constant 0 : index
    %9 = vector.load %arg7[%c0_6, %c0_7] : memref<32x256xf32, #tpu.memory_space<vmem>>, vector<32x256xf32>
    tpu.vector_store %arg7[%c0_6, %c0_7], %8 {strides = array<i32>} : memref<32x256xf32, #tpu.memory_space<vmem>>, vector<32x256xf32>,
    %c3_i32 = arith.constant 3 : i32
    %10 = arith.cmpi eq, %arg2, %c3_i32 : i32
    %11 = arith.extui %10 : i1 to i32
    %c0_i32_8 = arith.constant 0 : i32
    %12 = arith.cmpi ne, %11, %c0_i32_8 : i32
    scf.if %12 {
      %c0_9 = arith.constant 0 : index
      %c0_10 = arith.constant 0 : index
      %13 = vector.load %arg7[%c0_9, %c0_10] : memref<32x256xf32, #tpu.memory_space<vmem>>, vector<32x256xf32>
      %c0_11 = arith.constant 0 : index
      %c0_12 = arith.constant 0 : index
      %14 = vector.load %arg5[%c0_11, %c0_12] : memref<1x256xf32, #tpu.memory_space<vmem>>, vector<1x256xf32>
      %15 = vector.broadcast %14 : vector<1x256xf32> to vector<32x256xf32>
      %16 = arith.addf %13, %15 : vector<32x256xf32>
      %c0_13 = arith.constant 0 : index
      %c0_14 = arith.constant 0 : index
      %17 = vector.load %arg6[%c0_13, %c0_14] : memref<32x256xf32, #tpu.memory_space<vmem>>, vector<32x256xf32>
      tpu.vector_store %arg6[%c0_13, %c0_14], %16 {strides = array<i32>} : memref<32x256xf32, #tpu.memory_space<vmem>>, vector<32x256xf32>,
    } else {
    }
    return
  }
  func.func @transform_0(%arg0: i32, %arg1: i32, %arg2: i32) -> (i32, i32) {
    %c0_i32 = arith.constant 0 : i32
    return %arg0, %arg2 : i32, i32
  }
  func.func @transform_1(%arg0: i32, %arg1: i32, %arg2: i32) -> (i32, i32) {
    %c0_i32 = arith.constant 0 : i32
    return %arg2, %arg1 : i32, i32
  }
  func.func @transform_2(%arg0: i32, %arg1: i32, %arg2: i32) -> (i32, i32) {
    %c0_i32 = arith.constant 0 : i32
    %c0_i32_0 = arith.constant 0 : i32
    return %c0_i32, %arg1 : i32, i32
  }
  func.func @transform_3(%arg0: i32, %arg1: i32, %arg2: i32) -> (i32, i32) {
    %c0_i32 = arith.constant 0 : i32
    return %arg0, %arg1 : i32, i32
  }
}

</mosaic_0001>

<bundles_post_ra>
// kernel: transformer_forward.29
= control target key start
LH: loop header
LB: loop body
LE: loop exit
PB: predicated region body
PF: predicated region fallthrough
CT: control target
= control target key end

     0   :  { %v109_v61 = vlaneseq  ;;  %s289_s0 = inlined_call_operand.vmem [shape: f32[32,256], index: 0, kind: input, shape index: {}]   ;;  %s290_s1 = inlined_call_operand.vmem [shape: f32[32,256], index: 1, kind: input, shape index: {}]   ;;  %s291_s2 = inlined_call_operand.vmem [shape: f32[1,256], index: 2, kind: input, shape index: {}]   ;;  %s292_s3 = inlined_call_operand.vmem [shape: f32[1,256], index: 3, kind: input, shape index: {}]   ;;  %s293_s4 = inlined_call_operand.vmem [shape: f32[32,256], index: 4, kind: output, shape index: {}]  }
   0x1   :  { %v17_v0 = vld [vmem:[%s289_s0] sm:$0xff]  ;;  %v18_v1 = vld [vmem:[%s289_s0 + $0x8] sm:$0xff]  ;;  %v19_v10 = vld [vmem:[%s289_s0 + $0x10] sm:$0xff] }
   0x2   :  { %v25_v2 = vld [vmem:[%s290_s1] sm:$0xff]  ;;  %v26_v3 = vld [vmem:[%s290_s1 + $0x8] sm:$0xff]  ;;  %v20_v13 = vld [vmem:[%s289_s0 + $0x18] sm:$0xff] }
   0x3   :  { %v33_v4 = vadd.f32 %v25_v2, %v17_v0  ;;  %v21_v5 = vld [vmem:[%s289_s0 + $0x20] sm:$0xff]  ;;  %v22_v6 = vld [vmem:[%s289_s0 + $0x28] sm:$0xff]  ;;  %v34_v7 = vadd.f32 %v26_v3, %v18_v1  ;;  %v27_v14 = vld [vmem:[%s290_s1 + $0x10] sm:$0xff]  ;;  %v110_v3 = vshrl.u32 %v109_v61, 7 }
   0x4   :  { %v29_v8 = vld [vmem:[%s290_s1 + $0x20] sm:$0xff]  ;;  %v30_v9 = vld [vmem:[%s290_s1 + $0x28] sm:$0xff]  ;;  %v28_v15 = vld [vmem:[%s290_s1 + $0x18] sm:$0xff]  ;;  %v35_v17 = vadd.f32 %v27_v14, %v19_v10 }
   0x5   :  { %v37_v11 = vadd.f32 %v29_v8, %v21_v5  ;;  %v38_v12 = vadd.f32 %v30_v9, %v22_v6  ;;  %v43_v16 = vadd.f32 %v34_v7, %v33_v4  ;;  %v36_v18 = vadd.f32 %v28_v15, %v20_v13  ;;  %v23_v19 = vld [vmem:[%s289_s0 + $0x30] sm:$0xff]  ;;  %v24_v20 = vld [vmem:[%s289_s0 + $0x38] sm:$0xff]  ;;  %v41_v8 = vld [vmem:[%s291_s2] sm:$0x3] }
   0x6   :  { %v31_v21 = vld [vmem:[%s290_s1 + $0x30] sm:$0xff]  ;;  %v32_v23 = vld [vmem:[%s290_s1 + $0x38] sm:$0xff]  ;;  %v111_v6 = vsub.s32 0, %v110_v3  ;;  %v42_v9 = vld [vmem:[%s292_s3] sm:$0x3] }
   0x7   :  { %v49_v22 = vadd.f32 %v38_v12, %v37_v11  ;;  %v39_v24 = vadd.f32 %v31_v21, %v23_v19  ;;  %44 = vadd.xlane.f32.xlu0 %v43_v16  ;;  %v46_v25 = vadd.f32 %v36_v18, %v35_v17  ;;  %v40_v26 = vadd.f32 %v32_v23, %v24_v20 }
   0x8   :  { %v112_v10 = vrot.slane %v41_v8, %v111_v6  ;;  %v131_v13 = vrot.slane %v42_v9, %v111_v6 }
   0x9   :  { %50 = vadd.xlane.f32.xlu1 %v49_v22  ;;  %v52_v27 = vadd.f32 %v40_v26, %v39_v24 }
   0xb   :  { %47 = vadd.xlane.f32.xlu0 %v46_v25 }
   0xd   :  { %53 = vadd.xlane.f32.xlu1 %v52_v27 }
  0x90   :  { %v45_v28 = vpop.xlane.xlu0 %44 }
  0x91   :  { %v56_v29 = vmul.f32 0.00390625, %v45_v28 }
  0x92   :  { %v51_v30 = vpop.xlane.xlu1 %50 }
  0x93   :  { %v58_v31 = vmul.f32 0.00390625, %v51_v30  ;;  %v60_v32 = vsub.f32 %v33_v4, %v56_v29  ;;  %v61_v33 = vsub.f32 %v34_v7, %v56_v29  ;;  %v115_v7 = vsub.s32 1, %v110_v3 }
  0x94   :  { %v48_v36 = vpop.xlane.xlu0 %47 }
  0x95   :  { %v239_v34 = vsub.f32 %v37_v11, %v58_v31  ;;  %v241_v35 = vsub.f32 %v38_v12, %v58_v31  ;;  %v57_v37 = vmul.f32 0.00390625, %v48_v36  ;;  %v68_v39 = vmul.f32 %v60_v32, %v60_v32 }
  0x96   :  { %v54_v38 = vpop.xlane.xlu1 %53  ;;  %v69_v40 = vmul.f32 %v61_v33, %v61_v33  ;;  %v116_v11 = vrot.slane %v41_v8, %v115_v7  ;;  %v135_v14 = vrot.slane %v42_v9, %v115_v7 }
  0x97   :  { %v59_v41 = vmul.f32 0.00390625, %v54_v38  ;;  %v72_v42 = vmul.f32 %v239_v34, %v239_v34  ;;  %v73_v43 = vmul.f32 %v241_v35, %v241_v35  ;;  %v62_v44 = vsub.f32 %v35_v17, %v57_v37 }
  0x98   :  { %v63_v45 = vsub.f32 %v36_v18, %v57_v37  ;;  %v76_v46 = vadd.f32 %v69_v40, %v68_v39 }
  0x99   :  { %v247_v47 = vsub.f32 %v39_v24, %v59_v41  ;;  %v249_v48 = vsub.f32 %v40_v26, %v59_v41  ;;  %v82_v49 = vadd.f32 %v73_v43, %v72_v42  ;;  %v70_v50 = vmul.f32 %v62_v44, %v62_v44 }
  0x9a   :  { %77 = vadd.xlane.f32.xlu0 %v76_v46  ;;  %v71_v51 = vmul.f32 %v63_v45, %v63_v45 }
  0x9b   :  { %v74_v52 = vmul.f32 %v247_v47, %v247_v47  ;;  %v75_v53 = vmul.f32 %v249_v48, %v249_v48 }
  0x9c   :  { %v79_v54 = vadd.f32 %v71_v51, %v70_v50 }
  0x9d   :  { %v85_v55 = vadd.f32 %v75_v53, %v74_v52 }
  0x9e   :  { %83 = vadd.xlane.f32.xlu0 %v82_v49  ;;  %80 = vadd.xlane.f32.xlu1 %v79_v54 }
  0xa2   :  { %86 = vadd.xlane.f32.xlu1 %v85_v55 }
 0x123   :  { %v78_v56 = vpop.xlane.xlu0 %77 }
 0x124   :  { %v88_v57 = vmul.f32 0.00390625, %v78_v56 }
 0x126   :  { %v92_v58 = vadd.f32 1e-05, %v88_v57 }
 0x127   :  { %v81_v59 = vpop.xlane.xlu1 %80  ;;  %v84_v60 = vpop.xlane.xlu0 %83 }
 0x128   :  { %158 = vrsqrt.f32 %v92_v58  ;;  %v89_v62 = vmul.f32 0.00390625, %v81_v59  ;;  %v90_v63 = vmul.f32 0.00390625, %v84_v60 }
 0x12a   :  { %v93_v0 = vadd.f32 1e-05, %v89_v62  ;;  %v94_v1 = vadd.f32 1e-05, %v90_v63 }
 0x12b   :  { %v87_v2 = vpop.xlane.xlu1 %86 }
 0x12c   :  { %160 = vrsqrt.f32 %v93_v0  ;;  %v91_v4 = vmul.f32 0.00390625, %v87_v2 }
 0x12d   :  { %162 = vrsqrt.f32 %v94_v1 }
 0x12e   :  { %v95_v5 = vadd.f32 1e-05, %v91_v4 }
 0x130   :  { %164 = vrsqrt.f32 %v95_v5 }
 0x135   :  { %v159_v12 = vpop.eup %158 }
 0x136   :  { %v100_v15 = vmul.f32 %v159_v12, %v60_v32  ;;  %v101_v16 = vmul.f32 %v159_v12, %v61_v33 }
 0x138   :  { %v119_v17 = vmul.f32 %v112_v10, %v100_v15  ;;  %v120_v18 = vmul.f32 %v116_v11, %v101_v16 }
 0x139   :  { %v161_v19 = vpop.eup %160 }
 0x13a   :  { %v163_v20 = vpop.eup %162  ;;  %v138_v21 = vadd.f32 %v131_v13, %v119_v17  ;;  %v139_v22 = vadd.f32 %v135_v14, %v120_v18  ;;  %v102_v23 = vmul.f32 %v161_v19, %v62_v44  ;;  %v103_v24 = vmul.f32 %v161_v19, %v63_v45 }
 0x13b   :  { %v104_v25 = vmul.f32 %v163_v20, %v239_v34  ;;  %v105_v26 = vmul.f32 %v163_v20, %v241_v35 }
 0x13c   :  { %146 = vst [vmem:[%s293_s4] sm:$0xff] %v138_v21  ;;  %147 = vst [vmem:[%s293_s4 + $0x8] sm:$0xff] %v139_v22  ;;  %v121_v27 = vmul.f32 %v112_v10, %v102_v23  ;;  %v122_v28 = vmul.f32 %v116_v11, %v103_v24 }
 0x13d   :  { %v165_v29 = vpop.eup %164  ;;  %v123_v30 = vmul.f32 %v112_v10, %v104_v25  ;;  %v124_v31 = vmul.f32 %v116_v11, %v105_v26 }
 0x13e   :  { %v140_v32 = vadd.f32 %v131_v13, %v121_v27  ;;  %v141_v33 = vadd.f32 %v135_v14, %v122_v28  ;;  %v106_v36 = vmul.f32 %v165_v29, %v247_v47  ;;  %v107_v34 = vmul.f32 %v165_v29, %v249_v48 }
 0x13f   :  { %v142_v35 = vadd.f32 %v131_v13, %v123_v30  ;;  %v143_v37 = vadd.f32 %v135_v14, %v124_v31 }
 0x140   :  { %148 = vst [vmem:[%s293_s4 + $0x10] sm:$0xff] %v140_v32  ;;  %149 = vst [vmem:[%s293_s4 + $0x18] sm:$0xff] %v141_v33  ;;  %v125_v38 = vmul.f32 %v112_v10, %v106_v36  ;;  %v126_v39 = vmul.f32 %v116_v11, %v107_v34 }
 0x141   :  { %150 = vst [vmem:[%s293_s4 + $0x20] sm:$0xff] %v142_v35  ;;  %151 = vst [vmem:[%s293_s4 + $0x28] sm:$0xff] %v143_v37 }
 0x142   :  { %v144_v40 = vadd.f32 %v131_v13, %v125_v38  ;;  %v145_v41 = vadd.f32 %v135_v14, %v126_v39 }
 0x144   :  { %152 = vst [vmem:[%s293_s4 + $0x30] sm:$0xff] %v144_v40  ;;  %153 = vst [vmem:[%s293_s4 + $0x38] sm:$0xff] %v145_v41 }

// kernel: transformer_forward.27
= control target key start
LH: loop header
LB: loop body
LE: loop exit
PB: predicated region body
PF: predicated region fallthrough
CT: control target
= control target key end

     0   :  { %s1237_s0 = inlined_call_operand.vmem [shape: f32[2,16,768], index: 0, kind: input, shape index: {}, may-alias: {0,1,2}]   ;;  %s1238_s1 = inlined_call_operand.vmem [shape: f32[2,16,768], index: 1, kind: input, shape index: {}, may-alias: {0,1,2}]   ;;  %s1239_s2 = inlined_call_operand.vmem [shape: f32[2,16,768], index: 2, kind: input, shape index: {}, may-alias: {0,1,2}]   ;;  %s1240_s3 = inlined_call_operand.vmem [shape: f32[2,16,256], index: 3, kind: output, shape index: {}]  }
   0x1   :  { %1243 = sst [smem:[#allocation12_spill]] %s1240_s3 }
   0x2   :  { %s1030_s12 = smov 0   ;;  %s1032_s13 = smov 0  }
   0x3   :  { %s1034_s14 = smov 0   ;;  %s1036_s15 = smov 0  }
   0x4   :  { %s1038_s16 = smov 0   ;;  %s1040_s17 = smov 0  }
   0x5   :  { %s1042_s18 = smov 0   ;;  %s1044_s19 = smov 0  }
   0x6   :  { %s1046_s20 = smov 0   ;;  %s1048_s21 = smov 0  }
   0x7   :  { %s1050_s22 = smov 0  }
   0x8 LB: > { %s35_s24 = sadd.s32 1, %s996_s20  ;;  %s39_s25 = sadd.s32 1, %s1000_s21  ;;  %s1004_s22 = sphi %s1050_s22, %s13_s22   ;;  %s1000_s21 = sphi %s1048_s21, %s1265_s21   ;;  %s996_s20 = sphi %s1046_s20, %s1264_s20   ;;  %s992_s19 = sphi %s1044_s19, %s1263_s19   ;;  %s988_s18 = sphi %s1042_s18, %s1262_s18   ;;  %s984_s17 = sphi %s1040_s17, %s1261_s17   ;;  %s980_s16 = sphi %s1038_s16, %s1260_s16   ;;  %s976_s15 = sphi %s1036_s15, %s1259_s15   ;;  %s972_s14 = sphi %s1034_s14, %s1258_s14   ;;  %s968_s13 = sphi %s1032_s13, %s1257_s13   ;;  %s964_s12 = sphi %s1030_s12, %s1256_s12  }
   0x9   : > { %p37_p0 = scmp.ge.s32.totalorder %s35_s24, 2  ;;  %s50_s26 = sadd.s32 1, %s984_s17 }
   0xa   : > { %p57_p1 = scmp.ne.s32.totalorder %s984_s17, %s980_s16  ;;  %p58_p2 = scmp.eq.s32.totalorder %s1004_s22, 0 }
   0xb   : > { %s1267_s24 = smov (%p37_p0, %s35_s24), 0  ;;  %s1269_s25 = smov (!%p37_p0, %s39_s25), %s1000_s21 }
   0xc   : > { %1244 = sst [smem:[#allocation9_spill]] %s1267_s24  ;;  %s46_s27 = ssub.s32 %s996_s20, %s1267_s24 }
   0xd   : > { %p41_p3 = scmp.ge.s32.totalorder %s1269_s25, 2  ;;  %s73_s28 = sadd.s32 2, %s996_s20 }
   0xe   : > { %p1103_p4 = por %p58_p2, %p57_p1  ;;  %s74_s30 = sadd.s32 2, %s1267_s24 }
   0xf   : > { %s1271_s25 = smov (%p41_p3, %s1269_s25), 0  ;;  %s78_s4 = ssub.s32 %s73_s28, %s74_s30 }
  0x10   : > { %1246 = sst [smem:[#allocation10_spill]] %s1271_s25  ;;  %s82_s5 = sadd.s32 1, %s976_s15 }
  0x11   : > { %s43_s6 = ssub.s32 %s1000_s21, %s1271_s25  ;;  %p89_p5 = scmp.ne.s32.totalorder %s976_s15, %s972_s14 }
  0x12   : > { %s47_s7 = sor.u32 %s46_s27, %s43_s6  ;;  %s79_s8 = sor.u32 %s78_s4, %s43_s6 }
  0x13   : > { %p48_p6 = scmp.eq.s32.totalorder %s47_s7, 0  ;;  %p80_p7 = scmp.eq.s32.totalorder %s79_s8, 0 }
  0x14   : > { %p1117_p8 = por %p89_p5, %p58_p2  ;;  %s105_s10 = sadd.s32 4, %s996_s20 }
  0x15   : > { %s1123_s11 = scalar_select %p48_p6, %s984_s17, %s50_s26  }
  0x16   : > { %s1126_s28 = scalar_select %p80_p7, %s976_s15, %s82_s5  }
  0x17   : > { %1248 = sst [smem:[#allocation11_spill]] %s1123_s11  ;;  %s106_s30 = sadd.s32 4, %s1267_s24 }
  0x18   : > { %s114_s23 = sadd.s32 1, %s968_s13  ;;  %s110_s25 = ssub.s32 %s105_s10, %s106_s30 }
  0x19   : > { %p121_p9 = scmp.ne.s32.totalorder %s968_s13, %s964_s12  ;;  %s111_s27 = sor.u32 %s110_s25, %s43_s6 }
  0x1a   : > { %s1249_s3 = sadd.s32 4294967295, %s1004_s22   ;;  %p112_p11 = scmp.eq.s32.totalorder %s111_s27, 0 }
  0x1b   : > { %p155_p10 = scmp.eq.s32.totalorder %s1249_s3, 3  ;;  %p1136_p12 = por %p121_p9, %p58_p2 }
  0x1c   : > { %s1148_s26 = scalar_select %p112_p11, %s968_s13, %s114_s23  }
  0x1d   : > { %p1143_p13 = por %p155_p10, %p57_p1  ;;  %p773_p0 = scmp.ge.s32.totalorder %s1004_s22, 4 }
  0x1f   : > { %177 = sbr.rel (%p773_p0) target bundleno = 60 (0x3c), region = 16 }
  0x24   : > { %180 = sbr.rel (!%p1103_p4) target bundleno = 44 (0x2c), region = 20  ;;  %s182_s3 = sand.u32 (%p1103_p4), 1, %s984_s17  }
  0x25   : > { %s811_s25 = smul.u32 (%p1103_p4), 12, %s1000_s21  ;;  %s774_s5 = sshll.u32 (%p1103_p4), %s182_s3, 4 }
  0x26   : > { %s184_s23 = scalar_lea.vmem (%p1103_p4), [#allocation5], %s774_s5 }
  0x27   : > { %s189_s6 = sadd.s32 (%p1103_p4), %s996_s20, %s811_s25 }
  0x28   : > { %s775_s8 = sshll.u32 (%p1103_p4), %s189_s6, 3 }
  0x29   : > { %s191_s27 = scalar_lea.vmem %s1237_s0, %s775_s8 }
  0x2a   : > { %v222_v0 = vld [vmem:[%s191_s27] sm:$0xff]  ;;  %v224_v1 = vld [vmem:[%s191_s27 + $0x30] sm:$0xff] }
  0x2b   : > { %223 = vst [vmem:[%s184_s23] sm:$0xff] %v222_v0  ;;  %225 = vst [vmem:[%s184_s23 + $0x8] sm:$0xff] %v224_v1 }
  0x2c PF: > { %231 = sbr.rel (!%p1117_p8) target bundleno = 52 (0x34), region = 58  ;;  %s233_s29 = sand.u32 (%p1117_p8), 1, %s976_s15  }
  0x2d   : > { %s666_s3 = smul.u32 (%p1117_p8), 12, %s1000_s21  ;;  %s776_s25 = sshll.u32 (%p1117_p8), %s233_s29, 4 }
  0x2e   : > { %s235_s5 = scalar_lea.vmem (%p1117_p8), [#allocation6], %s776_s25 }
  0x2f   : > { %s667_s6 = sadd.s32 (%p1117_p8), %s996_s20, %s666_s3 }
  0x30   : > { %s777_s24 = sshll.u32 (%p1117_p8), %s667_s6, 3 }
  0x31   : > { %s669_s8 = scalar_lea.vmem %s1238_s1, %s777_s24 }
  0x32   : > { %v778_v2 = vld [vmem:[%s669_s8 + $0x10] sm:$0xff]  ;;  %v779_v3 = vld [vmem:[%s669_s8 + $0x40] sm:$0xff] }
  0x33   : > { %275 = vst [vmem:[%s235_s5] sm:$0xff] %v778_v2  ;;  %277 = vst [vmem:[%s235_s5 + $0x8] sm:$0xff] %v779_v3 }
  0x34 PF: > { %283 = sbr.rel (!%p1136_p12) target bundleno = 60 (0x3c), region = 96  ;;  %s285_s9 = sand.u32 (%p1136_p12), 1, %s968_s13  }
  0x35   : > { %s675_s30 = smul.u32 (%p1136_p12), 12, %s1000_s21  ;;  %s780_s27 = sshll.u32 (%p1136_p12), %s285_s9, 4 }
  0x36   : > { %s287_s25 = scalar_lea.vmem (%p1136_p12), [#allocation7], %s780_s27 }
  0x37   : > { %s676_s23 = sadd.s32 (%p1136_p12), %s996_s20, %s675_s30 }
  0x38   : > { %s781_s29 = sshll.u32 (%p1136_p12), %s676_s23, 3 }
  0x39   : > { %s678_s24 = scalar_lea.vmem %s1239_s2, %s781_s29 }
  0x3a   : > { %v782_v4 = vld [vmem:[%s678_s24 + $0x20] sm:$0xff]  ;;  %v783_v5 = vld [vmem:[%s678_s24 + $0x50] sm:$0xff] }
  0x3b   : > { %327 = vst [vmem:[%s287_s25] sm:$0xff] %v782_v4  ;;  %329 = vst [vmem:[%s287_s25 + $0x8] sm:$0xff] %v783_v5 }
  0x3c PF: > { %p784_p1 = scmp.ge.s32.totalorder %s1004_s22, 1  ;;  %p334_p2 = scmp.lt.s32.totalorder %s1004_s22, 5 }
  0x3e   : > { %p335_p3 = pnand %p784_p1, %p334_p2 }
  0x3f   : > { %s348_s4 = sand.u32 (!%p335_p3), 1, %s972_s14   ;;  %s341_s6 = sand.u32 (!%p335_p3), 1, %s980_s16  }
  0x40   : > { %338 = sbr.rel (%p335_p3) target bundleno = 859 (0x35b), region = 134  ;;  %s786_s10 = sshll.u32 (!%p335_p3), %s348_s4, 4 }
  0x41   : > { %s1179_s8 = sshll.u32 (!%p335_p3), %s341_s6, 4  ;;  %s350_s5 = scalar_lea.vmem (!%p335_p3), [#allocation6], %s786_s10 }
  0x42   : > { %s343_s9 = scalar_lea.vmem (!%p335_p3), [#allocation5], %s1179_s8  ;;  %s355_s14 = sand.u32 (!%p335_p3), 1, %s964_s12  }
  0x43   : > { %s787_s16 = sshll.u32 (!%p335_p3), %s355_s14, 4  ;;  %s384_s12 = scalar_lea.vmem (!%p335_p3), [#allocation8], %s1179_s8 }
  0x44   : > { %s357_s30 = scalar_lea.vmem (!%p335_p3), [#allocation7], %s787_s16 }
  0x45   : > { %v1006_v6 = vmov 0.0   ;;  %vm1007_vm0 = vmmov 0   ;;  %v406_v7 = vld [vmem:[%s350_s5] sm:$0xff]  ;;  %v407_v8 = vld [vmem:[%s350_s5 + $0x8] sm:$0xff]  ;;  %vm396_vm1 = vcmask 7168   ;;  %v1008_v13 = vmov -inf  }
  0x46   : > { %799 = vmatprep.subr.bf16.mxu0 %v1006_v6  ;;  %801 = vmatprep.mubr.msk.bf16.mxu0 %vm1007_vm0, %v1006_v6  ;;  %v408_v9 = vpack.c.bf16 %v407_v8, %v406_v7  ;;  %v403_v10 = vld [vmem:[%s343_s9] sm:$0xff]  ;;  %v404_v11 = vld [vmem:[%s343_s9 + $0x8] sm:$0xff]  ;;  %397 = vst.msk [vmem:[#allocation2] sm:$0xff] %vm396_vm1, %v1008_v13  ;;  %398 = vst.msk [vmem:[#allocation2 + $0x8] sm:$0xff] %vm396_vm1, %v1008_v13  ;;  %vm454_vm2 = vcmask 130048   ;;  %v1009_v22 = vmov 0  }
  0x47   : > { %805 = vmatprep.subr.bf16.mxu1 %v1006_v6  ;;  %807 = vmatprep.mubr.msk.bf16.mxu1 %vm1007_vm0, %v1006_v6  ;;  %v405_v12 = vpack.c.bf16 %v404_v11, %v403_v10  ;;  %399 = vst.msk [vmem:[#allocation3] sm:$0xff] %vm396_vm1, %v1006_v6  ;;  %400 = vst.msk [vmem:[#allocation3 + $0x8] sm:$0xff] %vm396_vm1, %v1006_v6  ;;  %v515_v31 = vld [vmem:[%s357_s30] sm:$0xff]  ;;  %v516_v32 = vld [vmem:[%s357_s30 + $0x8] sm:$0xff]  ;;  %s791_s27 = sshll.u32 (%p1143_p13), %s992_s19, 2  ;;  %s1252_s24 = sld [smem:[#allocation12_spill]] (%p1143_p13) }
  0x48   : > { %800 = vmatpush3.bf16.xpose.msra.mxu0 %v408_v9  ;;  %904 = vset.pattern.permute.xlu1 %v1009_v22  ;;  %v517_v33 = vpack.c.bf16 %v516_v32, %v515_v31  ;;  %s602_s23 = sadd.s32 (%p1143_p13), %s988_s18, %s791_s27 }
  0x49   : > { %905 = vset.pattern.permute.xlu0 %v1009_v22  ;;  %s792_s29 = sshll.u32 (%p1143_p13), %s602_s23, 3 }
  0x4a   : > { %806 = vmatpush3.bf16.msra.mxu1 %v517_v33 }
  0x4d   : > { %v452_v23 = vld [vmem:[#allocation2] sm:$0xff]  ;;  %v453_v26 = vld [vmem:[#allocation2 + $0x8] sm:$0xff]  ;;  %s604_s25 = scalar_lea.vmem (%p1143_p13), %s1252_s24, %s792_s29 }
  0x4e   : > { %v485_v49 = vld [vmem:[#allocation3] sm:$0xff]  ;;  %v486_v52 = vld [vmem:[#allocation3 + $0x8] sm:$0xff] }
  0x4f   : > { %802 = vmatmul.mubr.bf16.vlgmr.msra.gmra.mxu0 %v405_v12 }
 0x10f   : > { %v443_v14 = vpop.f32.mrf.mxu0 }
 0x110   : > { %v450_v15 = vmul.f32 0.088388346, %v443_v14 }
 0x111   : > { %v803_v16 = vpop.f32.mrf.mxu0 }
 0x112   : > { %v455_v17 = vsel %vm454_vm2, %v450_v15, -inf }
 0x113   : > { %456 = vmax.xlane.f32.xlu0 %v455_v17  ;;  %v446_v18 = vpop.f32.mrf.mxu0 }
 0x114   : > { %v451_v19 = vmul.f32 0.088388346, %v446_v18 }
 0x115   : > { %v804_v20 = vpop.f32.mrf.mxu0 }
 0x116   : > { %v458_v21 = vsel %vm454_vm2, %v451_v19, -inf }
 0x117   : > { %459 = vmax.xlane.f32.xlu0 %v458_v21 }
 0x19c   : > { %v457_v24 = vpop.xlane.xlu0 %456 }
 0x19d   : > { %v461_v25 = vmax.f32 %v452_v23, %v457_v24 }
 0x19f   : > { %v463_v27 = vsub.f32 %v452_v23, %v461_v25  ;;  %566 = vst.msk [vmem:[#allocation2] sm:$0xff] %vm396_vm1, %v461_v25  ;;  %471 = vperm.xlu1 %904, %v461_v25  }
 0x1a0   : > { %v460_v28 = vpop.xlane.xlu0 %459 }
 0x1a1   : > { %v462_v29 = vmax.f32 %v453_v26, %v460_v28  ;;  %v465_v46 = vmul.f32 1.442695, %v463_v27 }
 0x1a3   : > { %v464_v30 = vsub.f32 %v453_v26, %v462_v29  ;;  %567 = vst.msk [vmem:[#allocation2 + $0x8] sm:$0xff] %vm396_vm1, %v462_v29  ;;  %476 = vperm.xlu1 %904, %v462_v29  }
 0x1a5   : > { %v467_v43 = vmul.f32 1.442695, %v464_v30 }
 0x21a   : > { %v472_v34 = vpop.permute.xlu1 %471 }
 0x21b   : > { %v479_v35 = vsub.f32 %v450_v15, %v472_v34 }
 0x21d   : > { %v481_v36 = vmul.f32 1.442695, %v479_v35 }
 0x21e   : > { %v477_v37 = vpop.permute.xlu1 %476 }
 0x21f   : > { %906 = vpow2.f32 %v481_v36  ;;  %v480_v38 = vsub.f32 %v451_v19, %v477_v37 }
 0x221   : > { %v483_v39 = vmul.f32 1.442695, %v480_v38 }
 0x223   : > { %908 = vpow2.f32 %v483_v39 }
 0x224   : > { %910 = vpow2.f32 %v467_v43 }
 0x225   : > { %912 = vpow2.f32 %v465_v46 }
 0x22c   : > { %v907_v40 = vpop.eup %906 }
 0x22d   : > { %v489_v41 = vsel %vm454_vm2, %v907_v40, 0.0 }
 0x22e   : > { %490 = vadd.xlane.f32.xlu0 %v489_v41 }
 0x230   : > { %v909_v42 = vpop.eup %908 }
 0x231   : > { %v492_v44 = vsel %vm454_vm2, %v909_v42, 0.0  ;;  %v514_v45 = vpack.c.bf16 %v909_v42, %v907_v40  ;;  %v911_v47 = vpop.eup %910 }
 0x232   : > { %493 = vadd.xlane.f32.xlu1 %v492_v44  ;;  %v913_v48 = vpop.eup %912  ;;  %v488_v54 = vmul.f32 %v911_v47, %v486_v52 }
 0x233   : > { %808 = vmatmul.mubr.msk.bf16.vlgmr.msra.gmra.mxu1 %vm454_vm2, %v514_v45  ;;  %v487_v50 = vmul.f32 %v913_v48, %v485_v49 }
 0x243   : > { %509 = vperm.xlu1 %904, %v911_v47  }
 0x244   : > { %504 = vperm.xlu0 %905, %v913_v48  }
 0x2b7   : > { %v491_v51 = vpop.xlane.xlu0 %490 }
 0x2b8   : > { %v495_v53 = vadd.f32 %v491_v51, %v487_v50 }
 0x2ba   : > { %498 = vst.msk [vmem:[#allocation3] sm:$0xff] %vm396_vm1, %v495_v53 }
 0x2bb   : > { %v494_v55 = vpop.xlane.xlu1 %493 }
 0x2bc   : > { %v496_v56 = vadd.f32 %v494_v55, %v488_v54 }
 0x2be   : > { %499 = vst.msk [vmem:[#allocation3 + $0x8] sm:$0xff] %vm396_vm1, %v496_v56 }
 0x2bf   : > { %v505_v1 = vpop.permute.xlu0 %504  ;;  %v510_v3 = vpop.permute.xlu1 %509 }
 0x2c0   : > { %v512_v2 = vmul.f32 0.0, %v505_v1  ;;  %v513_v6 = vmul.f32 0.0, %v510_v3 }
 0x2c1   : > { %v571_v57 = vld [vmem:[#allocation3] sm:$0xff] }
 0x2c2   : > { %914 = vrcp.f32 %v571_v57 }
 0x2c5   : > { %v572_v58 = vld [vmem:[#allocation3 + $0x8] sm:$0xff] }
 0x2c6   : > { %916 = vrcp.f32 %v572_v58 }
 0x2cf   : > { %v915_v59 = vpop.eup %914 }
 0x2d0   : > { %579 = vperm.xlu0 %905, %v915_v59  }
 0x2d3   : > { %v917_v60 = vpop.eup %916 }
 0x2d4   : > { %584 = vperm.xlu0 %905, %v917_v60  }
 0x2f3   : > { %v555_v61 = vpop.f32.mrf.mxu1 }
 0x2f4   : > { %v562_v4 = vadd.f32 %v555_v61, %v512_v2 }
 0x2f5   : > { %v809_v62 = vpop.f32.mrf.mxu1 }
 0x2f7   : > { %v558_v63 = vpop.f32.mrf.mxu1 }
 0x2f8   : > { %v563_v8 = vadd.f32 %v558_v63, %v513_v6 }
 0x2f9   : > { %v810_v0 = vpop.f32.mrf.mxu1 }
 0x34b   : > { %v580_v5 = vpop.permute.xlu0 %579 }
 0x34c   : > { %v587_v7 = vmul.f32 %v580_v5, %v562_v4 }
 0x34e   : > { %589 = vst [vmem:[%s384_s12] sm:$0xff] %v587_v7  ;;  %597 = sbr.rel (!%p1143_p13) target bundleno = 859 (0x35b), region = 158 }
 0x34f   : > { %v585_v9 = vpop.permute.xlu0 %584 }
 0x350   : > { %v588_v10 = vmul.f32 %v585_v9, %v563_v8 }
 0x352   : > { %590 = vst [vmem:[%s384_s12 + $0x8] sm:$0xff] %v588_v10 }
 0x355   : > { %v635_v11 = vld [vmem:[%s384_s12] sm:$0xff] }
 0x356   : > { %636 = vst [vmem:[%s604_s25] sm:$0xff] %v635_v11 }
 0x359   : > { %v637_v12 = vld [vmem:[%s384_s12 + $0x8] sm:$0xff] }
 0x35a   : > { %638 = vst [vmem:[%s604_s25 + $0x10] sm:$0xff] %v637_v12 }
 0x35b PF: > { %s13_s22 = sadd.s32 1, %s1004_s22   ;;  %s1253_s18 = sld [smem:[#allocation11_spill]] }
 0x35c   : > { %p10_p4 = scmp.ge.s32.totalorder %s13_s22, 6   ;;  %s1254_s7 = sld [smem:[#allocation9_spill]] }
 0x35d   : > { %s1255_s4 = sld [smem:[#allocation10_spill]]  ;;  %s1256_s12 = smov %s968_s13 }
 0x35e   : > { %s1257_s13 = smov %s1148_s26  ;;  %s1258_s14 = smov %s976_s15 }
 0x35f   : > { %s1259_s15 = smov %s1126_s28  ;;  %s1260_s16 = smov %s984_s17 }
 0x360   : > { %s1263_s19 = smov %s1000_s21  ;;  %12 = sbr.rel (!%p10_p4) target bundleno = 8 (0x8), region = 243 }
 0x361   : > { %s1261_s17 = smov %s1253_s18  ;;  %s1262_s18 = smov %s996_s20 }
 0x362   : > { %s1264_s20 = smov %s1254_s7 }
 0x363   : > { %s1265_s21 = smov %s1255_s4 }

// kernel: transformer_forward.28
= control target key start
LH: loop header
LB: loop body
LE: loop exit
PB: predicated region body
PF: predicated region fallthrough
CT: control target
= control target key end

     0   :  { %8 = vsyncpa [#allocation4], 0  ;;  %s502_s12 = smov [#allocation3]   ;;  %s579_s0 = inlined_call_operand.vmem [shape: f32[32,256], index: 0, kind: input, shape index: {}]   ;;  %s580_s1 = inlined_call_operand.hbm [shape: bf16[256,256], index: 1, kind: input, shape index: {}]   ;;  %s581_s2 = inlined_call_operand.vmem [shape: f32[1,256], index: 2, kind: input, shape index: {}]   ;;  %s582_s3 = inlined_call_operand.vmem [shape: f32[32,256], index: 3, kind: output, shape index: {}]  }
   0x1   :  { %s16_s13 = sshll.u32 %s502_s12, 4  ;;  %s17_s13 = int_to_ptr.vmem [resolvable:$true] %s16_s13 }
   0x2   :  { %s488_s14 = scalar_lea.vmem %s17_s13, 4096  ;;  %p493_p1 = scmp.lt.s32.totalorder %s17_s13, %s17_s13 }
   0x3   :  { %p489_p0 = scmp.ne.s32.totalorder %s17_s13, %s488_s14  ;;  %p494_p2 = scmp.lt.s32.totalorder %s488_s14, %s488_s14 }
   0x5   :  { %p495_p3 = por %p494_p2, %p493_p1 }
   0x7   :  { %p496_p4 = pnand %p495_p3, %p489_p0 }
   0x9   :  { %499 = shalt.err (!%p496_p4)
}
   0xa   :  { %s503_s15 = smov 128   ;;  %s504_s16 = smov 8  }
   0xb   :  { %22 = dma.hbm_to_vmem [thread:$0]  %s580_s1, 4096, %s17_s13, [#allocation4], %s503_s15, %s503_s15, %s504_s16  }
   0xc   :  { %500 = dma.done.wait [#allocation4], 4096  }
   0xd   :  { %501 = vsyncadd [#allocation4], 4294963200  ;;  %v432_v0 = vld [vmem:[#allocation3 + $0x74] ss:$8 sps:$4 sm:$0xff]   ;;  %v434_v1 = vld [vmem:[#allocation3 + $0x70] ss:$8 sps:$4 sm:$0xff]   ;;  %v334_v44 = vlaneseq }
   0xe   :  { %252 = vmatprep.subr.bf16.mxu0 %v432_v0  ;;  %397 = vmatprep.subr.bf16.mxu1 %v432_v0  ;;  %v435_v2 = vld [vmem:[#allocation3 + $0x64] ss:$8 sps:$4 sm:$0xff]   ;;  %v437_v3 = vld [vmem:[#allocation3 + $0x60] ss:$8 sps:$4 sm:$0xff]   ;;  %v438_v4 = vld [vmem:[#allocation3 + $0x54] ss:$8 sps:$4 sm:$0xff]  }
   0xf   :  { %253 = vmatpush1.bf16.msra.mxu0 %v434_v1  ;;  %413 = vmatpush1.bf16.msra.mxu1 %v434_v1  ;;  %v440_v5 = vld [vmem:[#allocation3 + $0x50] ss:$8 sps:$4 sm:$0xff]   ;;  %v441_v6 = vld [vmem:[#allocation3 + $0x44] ss:$8 sps:$4 sm:$0xff]   ;;  %v443_v7 = vld [vmem:[#allocation3 + $0x40] ss:$8 sps:$4 sm:$0xff]  }
  0x10   :  { %254 = vmatprep.subr.bf16.mxu0 %v435_v2  ;;  %398 = vmatprep.subr.bf16.mxu1 %v435_v2  ;;  %v444_v8 = vld [vmem:[#allocation3 + $0x34] ss:$8 sps:$4 sm:$0xff]   ;;  %v446_v9 = vld [vmem:[#allocation3 + $0x30] ss:$8 sps:$4 sm:$0xff]   ;;  %v447_v10 = vld [vmem:[#allocation3 + $0x24] ss:$8 sps:$4 sm:$0xff]  }
  0x11   :  { %v449_v11 = vld [vmem:[#allocation3 + $0x20] ss:$8 sps:$4 sm:$0xff]   ;;  %v450_v12 = vld [vmem:[#allocation3 + $0x14] ss:$8 sps:$4 sm:$0xff]   ;;  %v452_v18 = vld [vmem:[#allocation3 + $0x10] ss:$8 sps:$4 sm:$0xff]  }
  0x12   :  { %v41_v13 = vld [vmem:[%s579_s0 + $0x8] sm:$0xff]  ;;  %v43_v14 = vld [vmem:[%s579_s0 + $0x18] sm:$0xff]  ;;  %v40_v38 = vld [vmem:[%s579_s0] sm:$0xff]  ;;  %v335_v45 = vshrl.u32 %v334_v44, 7 }
  0x13   :  { %255 = vmatpush1.bf16.msra.mxu0 %v437_v3  ;;  %414 = vmatpush1.bf16.msra.mxu1 %v437_v3  ;;  %v49_v15 = vpack.c.bf16 %v43_v14, %v41_v13  ;;  %v45_v16 = vld [vmem:[%s579_s0 + $0x28] sm:$0xff]  ;;  %v47_v17 = vld [vmem:[%s579_s0 + $0x38] sm:$0xff]  ;;  %v42_v39 = vld [vmem:[%s579_s0 + $0x10] sm:$0xff] }
  0x14   :  { %256 = vmatprep.subr.bf16.mxu0 %v438_v4  ;;  %399 = vmatprep.subr.bf16.mxu1 %v438_v4  ;;  %v51_v19 = vpack.c.bf16 %v47_v17, %v45_v16  ;;  %v453_v20 = vld [vmem:[#allocation3 + $0x4] ss:$8 sps:$4 sm:$0xff]   ;;  %v455_v21 = vld [vmem:[#allocation3] ss:$8 sps:$4 sm:$0xff]   ;;  %v456_v22 = vld [vmem:[#allocation3 + $0xf4] ss:$8 sps:$4 sm:$0xff]   ;;  %v48_v42 = vpack.c.bf16 %v42_v39, %v40_v38 }
  0x15   :  { %284 = vmatprep.mubr.bf16.mxu0 %v49_v15  ;;  %v458_v23 = vld [vmem:[#allocation3 + $0xf0] ss:$8 sps:$4 sm:$0xff]   ;;  %v459_v24 = vld [vmem:[#allocation3 + $0xe4] ss:$8 sps:$4 sm:$0xff]   ;;  %v461_v25 = vld [vmem:[#allocation3 + $0xe0] ss:$8 sps:$4 sm:$0xff]  }
  0x16   :  { %294 = vmatprep.mubr.bf16.mxu1 %v51_v19  ;;  %v462_v26 = vld [vmem:[#allocation3 + $0xd4] ss:$8 sps:$4 sm:$0xff]   ;;  %v464_v27 = vld [vmem:[#allocation3 + $0xd0] ss:$8 sps:$4 sm:$0xff]   ;;  %v465_v28 = vld [vmem:[#allocation3 + $0xc4] ss:$8 sps:$4 sm:$0xff]  }
  0x17   :  { %257 = vmatpush1.bf16.msra.mxu0 %v440_v5  ;;  %415 = vmatpush1.bf16.msra.mxu1 %v440_v5  ;;  %v467_v29 = vld [vmem:[#allocation3 + $0xc0] ss:$8 sps:$4 sm:$0xff]   ;;  %v468_v30 = vld [vmem:[#allocation3 + $0xb4] ss:$8 sps:$4 sm:$0xff]   ;;  %v470_v31 = vld [vmem:[#allocation3 + $0xb0] ss:$8 sps:$4 sm:$0xff]  }
  0x18   :  { %258 = vmatprep.subr.bf16.mxu0 %v441_v6  ;;  %400 = vmatprep.subr.bf16.mxu1 %v441_v6  ;;  %v471_v32 = vld [vmem:[#allocation3 + $0xa4] ss:$8 sps:$4 sm:$0xff]   ;;  %v473_v33 = vld [vmem:[#allocation3 + $0xa0] ss:$8 sps:$4 sm:$0xff]   ;;  %v474_v34 = vld [vmem:[#allocation3 + $0x94] ss:$8 sps:$4 sm:$0xff]  }
  0x19   :  { %v476_v35 = vld [vmem:[#allocation3 + $0x90] ss:$8 sps:$4 sm:$0xff]   ;;  %v477_v36 = vld [vmem:[#allocation3 + $0x84] ss:$8 sps:$4 sm:$0xff]   ;;  %v479_v37 = vld [vmem:[#allocation3 + $0x80] ss:$8 sps:$4 sm:$0xff]  }
  0x1a   :  { %v44_v40 = vld [vmem:[%s579_s0 + $0x20] sm:$0xff]  ;;  %v46_v41 = vld [vmem:[%s579_s0 + $0x30] sm:$0xff]  ;;  %v336_v46 = vsub.s32 0, %v335_v45  ;;  %v340_v48 = vsub.s32 1, %v335_v45 }
  0x1b   :  { %259 = vmatpush1.bf16.msra.mxu0 %v443_v7  ;;  %416 = vmatpush1.bf16.msra.mxu1 %v443_v7  ;;  %v50_v43 = vpack.c.bf16 %v46_v41, %v44_v40  ;;  %v332_v47 = vld [vmem:[%s581_s2] sm:$0x3] }
  0x1c   :  { %260 = vmatprep.subr.bf16.mxu0 %v444_v8  ;;  %401 = vmatprep.subr.bf16.mxu1 %v444_v8  ;;  %v337_v49 = vrot.slane %v332_v47, %v336_v46  ;;  %v341_v50 = vrot.slane %v332_v47, %v340_v48 }
  0x1f   :  { %261 = vmatpush1.bf16.msra.mxu0 %v446_v9  ;;  %417 = vmatpush1.bf16.msra.mxu1 %v446_v9 }
  0x20   :  { %262 = vmatprep.subr.bf16.mxu0 %v447_v10  ;;  %402 = vmatprep.subr.bf16.mxu1 %v447_v10 }
  0x23   :  { %263 = vmatpush1.bf16.msra.mxu0 %v449_v11  ;;  %418 = vmatpush1.bf16.msra.mxu1 %v449_v11 }
  0x24   :  { %264 = vmatprep.subr.bf16.mxu0 %v450_v12  ;;  %403 = vmatprep.subr.bf16.mxu1 %v450_v12 }
  0x27   :  { %265 = vmatpush1.bf16.msra.mxu0 %v452_v18  ;;  %419 = vmatpush1.bf16.msra.mxu1 %v452_v18 }
  0x28   :  { %266 = vmatprep.subr.bf16.mxu0 %v453_v20  ;;  %404 = vmatprep.subr.bf16.mxu1 %v453_v20 }
  0x2b   :  { %267 = vmatpush1.bf16.msra.mxu0 %v455_v21  ;;  %420 = vmatpush1.bf16.msra.mxu1 %v455_v21 }
  0x2c   :  { %268 = vmatprep.subr.bf16.mxu0 %v456_v22  ;;  %405 = vmatprep.subr.bf16.mxu1 %v456_v22 }
  0x2f   :  { %269 = vmatpush2.bf16.msra.mxu0 %v458_v23  ;;  %421 = vmatpush2.bf16.msra.mxu1 %v458_v23 }
  0x30   :  { %270 = vmatprep.subr.bf16.mxu0 %v459_v24  ;;  %406 = vmatprep.subr.bf16.mxu1 %v459_v24 }
  0x33   :  { %271 = vmatpush2.bf16.msra.mxu0 %v461_v25  ;;  %422 = vmatpush2.bf16.msra.mxu1 %v461_v25 }
  0x34   :  { %272 = vmatprep.subr.bf16.mxu0 %v462_v26  ;;  %407 = vmatprep.subr.bf16.mxu1 %v462_v26 }
  0x37   :  { %273 = vmatpush2.bf16.msra.mxu0 %v464_v27  ;;  %423 = vmatpush2.bf16.msra.mxu1 %v464_v27 }
  0x38   :  { %274 = vmatprep.subr.bf16.mxu0 %v465_v28  ;;  %408 = vmatprep.subr.bf16.mxu1 %v465_v28 }
  0x3b   :  { %275 = vmatpush2.bf16.msra.mxu0 %v467_v29  ;;  %424 = vmatpush2.bf16.msra.mxu1 %v467_v29 }
  0x3c   :  { %276 = vmatprep.subr.bf16.mxu0 %v468_v30  ;;  %409 = vmatprep.subr.bf16.mxu1 %v468_v30 }
  0x3f   :  { %277 = vmatpush2.bf16.msra.mxu0 %v470_v31  ;;  %425 = vmatpush2.bf16.msra.mxu1 %v470_v31 }
  0x40   :  { %278 = vmatprep.subr.bf16.mxu0 %v471_v32  ;;  %410 = vmatprep.subr.bf16.mxu1 %v471_v32 }
  0x43   :  { %279 = vmatpush2.bf16.msra.mxu0 %v473_v33  ;;  %426 = vmatpush2.bf16.msra.mxu1 %v473_v33 }
  0x44   :  { %280 = vmatprep.subr.bf16.mxu0 %v474_v34  ;;  %411 = vmatprep.subr.bf16.mxu1 %v474_v34 }
  0x47   :  { %281 = vmatpush2.bf16.msra.mxu0 %v476_v35  ;;  %427 = vmatpush2.bf16.msra.mxu1 %v476_v35 }
  0x48   :  { %282 = vmatprep.subr.bf16.mxu0 %v477_v36  ;;  %412 = vmatprep.subr.bf16.mxu1 %v477_v36 }
  0x4b   :  { %283 = vmatpush2.bf16.msra.mxu0 %v479_v37  ;;  %428 = vmatpush2.bf16.msra.mxu1 %v479_v37 }
  0x4e   :  { %285 = vmatmul.mubr.bf16.vlgmr.msra.gmra.mxu0 %v48_v42  ;;  %295 = vmatmul.mubr.bf16.vlgmr.msra.gmra.mxu1 %v50_v43 }
 0x10e   :  { %v286_v51 = vpop.f32.mrf.mxu0  ;;  %v296_v52 = vpop.f32.mrf.mxu1 }
 0x10f   :  { %v344_v53 = vadd.f32 %v337_v49, %v286_v51  ;;  %v348_v54 = vadd.f32 %v337_v49, %v296_v52 }
 0x110   :  { %v288_v55 = vpop.f32.mrf.mxu0  ;;  %v298_v56 = vpop.f32.mrf.mxu1 }
 0x111   :  { %352 = vst [vmem:[%s582_s3] sm:$0xff] %v344_v53  ;;  %356 = vst [vmem:[%s582_s3 + $0x20] sm:$0xff] %v348_v54  ;;  %v345_v57 = vadd.f32 %v341_v50, %v288_v55  ;;  %v349_v58 = vadd.f32 %v341_v50, %v298_v56 }
 0x112   :  { %v290_v59 = vpop.f32.mrf.mxu0  ;;  %v300_v60 = vpop.f32.mrf.mxu1 }
 0x113   :  { %353 = vst [vmem:[%s582_s3 + $0x8] sm:$0xff] %v345_v57  ;;  %357 = vst [vmem:[%s582_s3 + $0x28] sm:$0xff] %v349_v58  ;;  %v346_v61 = vadd.f32 %v337_v49, %v290_v59  ;;  %v350_v62 = vadd.f32 %v337_v49, %v300_v60 }
 0x114   :  { %v292_v63 = vpop.f32.mrf.mxu0  ;;  %v302_v0 = vpop.f32.mrf.mxu1 }
 0x115   :  { %354 = vst [vmem:[%s582_s3 + $0x10] sm:$0xff] %v346_v61  ;;  %358 = vst [vmem:[%s582_s3 + $0x30] sm:$0xff] %v350_v62  ;;  %v347_v1 = vadd.f32 %v341_v50, %v292_v63  ;;  %v351_v2 = vadd.f32 %v341_v50, %v302_v0 }
 0x117   :  { %355 = vst [vmem:[%s582_s3 + $0x18] sm:$0xff] %v347_v1  ;;  %359 = vst [vmem:[%s582_s3 + $0x38] sm:$0xff] %v351_v2 }
 0x118   :  { %364 = vsyncpa [#allocation4], 1 }

// kernel: transformer_forward.26
= control target key start
LH: loop header
LB: loop body
LE: loop exit
PB: predicated region body
PF: predicated region fallthrough
CT: control target
= control target key end

     0   :  { %s1433_s12 = smov 0   ;;  %s1435_s13 = smov 0   ;;  %s1745_s0 = inlined_call_operand.vmem [shape: f32[32,256], index: 0, kind: input, shape index: {}]   ;;  %s1746_s1 = inlined_call_operand.vmem [shape: bf16[256,768], index: 1, kind: input, shape index: {}]   ;;  %s1747_s2 = inlined_call_operand.vmem [shape: f32[1,768], index: 2, kind: input, shape index: {}]   ;;  %s1748_s3 = inlined_call_operand.vmem [shape: f32[32,768], index: 3, kind: output, shape index: {}]  }
   0x1   :  { %s1437_s14 = smov 0   ;;  %s1439_s15 = smov 0  }
   0x2   :  { %s1441_s16 = smov 0  }
   0x3 LB: > { %s28_s17 = sadd.s32 1, %s1407_s15  ;;  %s1114_s18 = sadd.s32 4294967295, %s1411_s16   ;;  %s1411_s16 = sphi %s1441_s16, %s13_s16   ;;  %s1407_s15 = sphi %s1439_s15, %s1753_s15   ;;  %s1403_s14 = sphi %s1437_s14, %s1752_s14   ;;  %s1399_s13 = sphi %s1435_s13, %s1751_s13   ;;  %s1395_s12 = sphi %s1433_s12, %s1750_s12  }
   0x4   : > { %p30_p0 = scmp.ge.s32.totalorder %s28_s17, 2  ;;  %p76_p1 = scmp.ne.s32.totalorder %s1399_s13, %s1395_s12 }
   0x5   : > { %p77_p2 = scmp.eq.s32.totalorder %s1411_s16, 0  ;;  %p134_p4 = scmp.eq.s32.totalorder %s1114_s18, 1 }
   0x6   : > { %s1755_s17 = smov (%p30_p0, %s28_s17), 0  ;;  %s69_s20 = sadd.s32 1, %s1399_s13 }
   0x7   : > { %p78_p3 = por %p77_p2, %p76_p1  ;;  %s65_s19 = ssub.s32 %s1407_s15, %s1755_s17 }
   0x8   : > { %p67_p5 = scmp.eq.s32.totalorder %s65_s19, 0  ;;  %p1468_p6 = por %p134_p4, %p76_p1 }
   0x9   : > { %p1118_p7 = scmp.ge.s32.totalorder %s1411_s16, 2 }
   0xa   : > { %s1473_s22 = scalar_select %p67_p5, %s1399_s13, %s69_s20  }
   0xb   : > { %171 = sbr.rel (%p1118_p7) target bundleno = 58 (0x3a), region = 20 }
  0x10   : > { %174 = sbr.rel (!%p78_p3) target bundleno = 58 (0x3a), region = 24  ;;  %s176_s23 = sand.u32 (%p78_p3), 1, %s1399_s13  }
  0x11   : > { %s1236_s24 = smul.u32 (%p78_p3), 12, %s1407_s15 }
  0x12   : > { %s1266_s25 = smul.u32 (%p78_p3), 384, %s176_s23 }
  0x13   : > { %s1481_s28 = scalar_lea.vmem (%p78_p3), %s1746_s1, %s1236_s24 }
  0x14   : > { %v199_v0 = vld [vmem:[%s1481_s28] sm:$0xff] (%p78_p3)  ;;  %v201_v1 = vld [vmem:[%s1481_s28 + $0x18] sm:$0xff] (%p78_p3)  ;;  %v203_v2 = vld [vmem:[%s1481_s28 + $0x30] sm:$0xff] (%p78_p3)  ;;  %s1486_s29 = scalar_lea.vmem (%p78_p3), [#allocation3], %s1266_s25 }
  0x15   : > { %200 = vst [vmem:[%s1486_s29] sm:$0xff] %v199_v0  ;;  %202 = vst [vmem:[%s1486_s29 + $0xc] sm:$0xff] %v201_v1  ;;  %v205_v3 = vld [vmem:[%s1481_s28 + $0x48] sm:$0xff]  ;;  %v207_v4 = vld [vmem:[%s1481_s28 + $0x60] sm:$0xff] }
  0x16   : > { %204 = vst [vmem:[%s1486_s29 + $0x18] sm:$0xff] %v203_v2  ;;  %v209_v5 = vld [vmem:[%s1481_s28 + $0x78] sm:$0xff]  ;;  %206 = vst [vmem:[%s1486_s29 + $0x24] sm:$0xff] %v205_v3  ;;  %v211_v6 = vld [vmem:[%s1481_s28 + $0x90] sm:$0xff] }
  0x17   : > { %208 = vst [vmem:[%s1486_s29 + $0x30] sm:$0xff] %v207_v4  ;;  %210 = vst [vmem:[%s1486_s29 + $0x3c] sm:$0xff] %v209_v5  ;;  %v213_v7 = vld [vmem:[%s1481_s28 + $0xa8] sm:$0xff]  ;;  %v215_v8 = vld [vmem:[%s1481_s28 + $0xc0] sm:$0xff] }
  0x18   : > { %212 = vst [vmem:[%s1486_s29 + $0x48] sm:$0xff] %v211_v6  ;;  %214 = vst [vmem:[%s1486_s29 + $0x54] sm:$0xff] %v213_v7  ;;  %v217_v9 = vld [vmem:[%s1481_s28 + $0xd8] sm:$0xff]  ;;  %v219_v10 = vld [vmem:[%s1481_s28 + $0xf0] sm:$0xff] }
  0x19   : > { %216 = vst [vmem:[%s1486_s29 + $0x60] sm:$0xff] %v215_v8  ;;  %v221_v11 = vld [vmem:[%s1481_s28 + $0x108] sm:$0xff]  ;;  %218 = vst [vmem:[%s1486_s29 + $0x6c] sm:$0xff] %v217_v9  ;;  %v223_v12 = vld [vmem:[%s1481_s28 + $0x120] sm:$0xff] }
  0x1a   : > { %220 = vst [vmem:[%s1486_s29 + $0x78] sm:$0xff] %v219_v10  ;;  %222 = vst [vmem:[%s1486_s29 + $0x84] sm:$0xff] %v221_v11  ;;  %v225_v13 = vld [vmem:[%s1481_s28 + $0x138] sm:$0xff]  ;;  %v227_v14 = vld [vmem:[%s1481_s28 + $0x150] sm:$0xff] }
  0x1b   : > { %224 = vst [vmem:[%s1486_s29 + $0x90] sm:$0xff] %v223_v12  ;;  %226 = vst [vmem:[%s1486_s29 + $0x9c] sm:$0xff] %v225_v13  ;;  %v229_v15 = vld [vmem:[%s1481_s28 + $0x168] sm:$0xff]  ;;  %v231_v16 = vld [vmem:[%s1481_s28 + $0x180] sm:$0xff] }
  0x1c   : > { %228 = vst [vmem:[%s1486_s29 + $0xa8] sm:$0xff] %v227_v14  ;;  %v233_v17 = vld [vmem:[%s1481_s28 + $0x198] sm:$0xff]  ;;  %230 = vst [vmem:[%s1486_s29 + $0xb4] sm:$0xff] %v229_v15  ;;  %v235_v18 = vld [vmem:[%s1481_s28 + $0x1b0] sm:$0xff] }
  0x1d   : > { %232 = vst [vmem:[%s1486_s29 + $0xc0] sm:$0xff] %v231_v16  ;;  %234 = vst [vmem:[%s1486_s29 + $0xcc] sm:$0xff] %v233_v17  ;;  %v237_v19 = vld [vmem:[%s1481_s28 + $0x1c8] sm:$0xff]  ;;  %v239_v20 = vld [vmem:[%s1481_s28 + $0x1e0] sm:$0xff] }
  0x1e   : > { %236 = vst [vmem:[%s1486_s29 + $0xd8] sm:$0xff] %v235_v18  ;;  %238 = vst [vmem:[%s1486_s29 + $0xe4] sm:$0xff] %v237_v19  ;;  %v241_v21 = vld [vmem:[%s1481_s28 + $0x1f8] sm:$0xff]  ;;  %v243_v22 = vld [vmem:[%s1481_s28 + $0x210] sm:$0xff] }
  0x1f   : > { %240 = vst [vmem:[%s1486_s29 + $0xf0] sm:$0xff] %v239_v20  ;;  %v245_v23 = vld [vmem:[%s1481_s28 + $0x228] sm:$0xff]  ;;  %242 = vst [vmem:[%s1486_s29 + $0xfc] sm:$0xff] %v241_v21  ;;  %v247_v24 = vld [vmem:[%s1481_s28 + $0x240] sm:$0xff] }
  0x20   : > { %244 = vst [vmem:[%s1486_s29 + $0x108] sm:$0xff] %v243_v22  ;;  %246 = vst [vmem:[%s1486_s29 + $0x114] sm:$0xff] %v245_v23  ;;  %v249_v25 = vld [vmem:[%s1481_s28 + $0x258] sm:$0xff]  ;;  %v251_v26 = vld [vmem:[%s1481_s28 + $0x270] sm:$0xff] }
  0x21   : > { %248 = vst [vmem:[%s1486_s29 + $0x120] sm:$0xff] %v247_v24  ;;  %250 = vst [vmem:[%s1486_s29 + $0x12c] sm:$0xff] %v249_v25  ;;  %v253_v27 = vld [vmem:[%s1481_s28 + $0x288] sm:$0xff]  ;;  %v255_v28 = vld [vmem:[%s1481_s28 + $0x2a0] sm:$0xff] }
  0x22   : > { %252 = vst [vmem:[%s1486_s29 + $0x138] sm:$0xff] %v251_v26  ;;  %v257_v29 = vld [vmem:[%s1481_s28 + $0x2b8] sm:$0xff]  ;;  %254 = vst [vmem:[%s1486_s29 + $0x144] sm:$0xff] %v253_v27  ;;  %v259_v30 = vld [vmem:[%s1481_s28 + $0x2d0] sm:$0xff] }
  0x23   : > { %256 = vst [vmem:[%s1486_s29 + $0x150] sm:$0xff] %v255_v28  ;;  %258 = vst [vmem:[%s1486_s29 + $0x15c] sm:$0xff] %v257_v29  ;;  %v261_v31 = vld [vmem:[%s1481_s28 + $0x2e8] sm:$0xff]  ;;  %v1122_v33 = vld [vmem:[%s1481_s28 + $0x20] sm:$0xf] }
  0x24   : > { %v1120_v32 = vld [vmem:[%s1481_s28 + $0x8] sm:$0xf]  ;;  %260 = vst [vmem:[%s1486_s29 + $0x168] sm:$0xff] %v259_v30  ;;  %262 = vst [vmem:[%s1486_s29 + $0x174] sm:$0xff] %v261_v31  ;;  %v1124_v34 = vld [vmem:[%s1481_s28 + $0x38] sm:$0xf] }
  0x25   : > { %1121 = vst [vmem:[%s1486_s29 + $0x8] sm:$0xf] %v1120_v32  ;;  %v1126_v35 = vld [vmem:[%s1481_s28 + $0x50] sm:$0xf]  ;;  %1123 = vst [vmem:[%s1486_s29 + $0x14] sm:$0xf] %v1122_v33 }
  0x26   : > { %1125 = vst [vmem:[%s1486_s29 + $0x20] sm:$0xf] %v1124_v34  ;;  %1127 = vst [vmem:[%s1486_s29 + $0x2c] sm:$0xf] %v1126_v35  ;;  %v1128_v36 = vld [vmem:[%s1481_s28 + $0x68] sm:$0xf] }
  0x27   : > { %v1130_v37 = vld [vmem:[%s1481_s28 + $0x80] sm:$0xf]  ;;  %v1132_v38 = vld [vmem:[%s1481_s28 + $0x98] sm:$0xf]  ;;  %1129 = vst [vmem:[%s1486_s29 + $0x38] sm:$0xf] %v1128_v36 }
  0x28   : > { %1131 = vst [vmem:[%s1486_s29 + $0x44] sm:$0xf] %v1130_v37  ;;  %1133 = vst [vmem:[%s1486_s29 + $0x50] sm:$0xf] %v1132_v38  ;;  %v1134_v39 = vld [vmem:[%s1481_s28 + $0xb0] sm:$0xf] }
  0x29   : > { %v1136_v40 = vld [vmem:[%s1481_s28 + $0xc8] sm:$0xf]  ;;  %v1138_v41 = vld [vmem:[%s1481_s28 + $0xe0] sm:$0xf]  ;;  %1135 = vst [vmem:[%s1486_s29 + $0x5c] sm:$0xf] %v1134_v39 }
  0x2a   : > { %1137 = vst [vmem:[%s1486_s29 + $0x68] sm:$0xf] %v1136_v40  ;;  %1139 = vst [vmem:[%s1486_s29 + $0x74] sm:$0xf] %v1138_v41  ;;  %v1140_v42 = vld [vmem:[%s1481_s28 + $0xf8] sm:$0xf] }
  0x2b   : > { %v1142_v43 = vld [vmem:[%s1481_s28 + $0x110] sm:$0xf]  ;;  %v1144_v44 = vld [vmem:[%s1481_s28 + $0x128] sm:$0xf]  ;;  %1141 = vst [vmem:[%s1486_s29 + $0x80] sm:$0xf] %v1140_v42 }
  0x2c   : > { %1143 = vst [vmem:[%s1486_s29 + $0x8c] sm:$0xf] %v1142_v43  ;;  %1145 = vst [vmem:[%s1486_s29 + $0x98] sm:$0xf] %v1144_v44  ;;  %v1146_v45 = vld [vmem:[%s1481_s28 + $0x140] sm:$0xf] }
  0x2d   : > { %v1148_v46 = vld [vmem:[%s1481_s28 + $0x158] sm:$0xf]  ;;  %v1150_v47 = vld [vmem:[%s1481_s28 + $0x170] sm:$0xf]  ;;  %1147 = vst [vmem:[%s1486_s29 + $0xa4] sm:$0xf] %v1146_v45 }
  0x2e   : > { %1149 = vst [vmem:[%s1486_s29 + $0xb0] sm:$0xf] %v1148_v46  ;;  %1151 = vst [vmem:[%s1486_s29 + $0xbc] sm:$0xf] %v1150_v47  ;;  %v1152_v48 = vld [vmem:[%s1481_s28 + $0x188] sm:$0xf] }
  0x2f   : > { %v1154_v49 = vld [vmem:[%s1481_s28 + $0x1a0] sm:$0xf]  ;;  %v1156_v50 = vld [vmem:[%s1481_s28 + $0x1b8] sm:$0xf]  ;;  %1153 = vst [vmem:[%s1486_s29 + $0xc8] sm:$0xf] %v1152_v48 }
  0x30   : > { %1155 = vst [vmem:[%s1486_s29 + $0xd4] sm:$0xf] %v1154_v49  ;;  %1157 = vst [vmem:[%s1486_s29 + $0xe0] sm:$0xf] %v1156_v50  ;;  %v1158_v51 = vld [vmem:[%s1481_s28 + $0x1d0] sm:$0xf] }
  0x31   : > { %v1160_v52 = vld [vmem:[%s1481_s28 + $0x1e8] sm:$0xf]  ;;  %v1162_v53 = vld [vmem:[%s1481_s28 + $0x200] sm:$0xf]  ;;  %1159 = vst [vmem:[%s1486_s29 + $0xec] sm:$0xf] %v1158_v51 }
  0x32   : > { %1161 = vst [vmem:[%s1486_s29 + $0xf8] sm:$0xf] %v1160_v52  ;;  %1163 = vst [vmem:[%s1486_s29 + $0x104] sm:$0xf] %v1162_v53  ;;  %v1164_v54 = vld [vmem:[%s1481_s28 + $0x218] sm:$0xf] }
  0x33   : > { %v1166_v55 = vld [vmem:[%s1481_s28 + $0x230] sm:$0xf]  ;;  %v1168_v56 = vld [vmem:[%s1481_s28 + $0x248] sm:$0xf]  ;;  %1165 = vst [vmem:[%s1486_s29 + $0x110] sm:$0xf] %v1164_v54 }
  0x34   : > { %1167 = vst [vmem:[%s1486_s29 + $0x11c] sm:$0xf] %v1166_v55  ;;  %1169 = vst [vmem:[%s1486_s29 + $0x128] sm:$0xf] %v1168_v56  ;;  %v1170_v57 = vld [vmem:[%s1481_s28 + $0x260] sm:$0xf] }
  0x35   : > { %v1172_v58 = vld [vmem:[%s1481_s28 + $0x278] sm:$0xf]  ;;  %v1174_v59 = vld [vmem:[%s1481_s28 + $0x290] sm:$0xf]  ;;  %1171 = vst [vmem:[%s1486_s29 + $0x134] sm:$0xf] %v1170_v57 }
  0x36   : > { %1173 = vst [vmem:[%s1486_s29 + $0x140] sm:$0xf] %v1172_v58  ;;  %1175 = vst [vmem:[%s1486_s29 + $0x14c] sm:$0xf] %v1174_v59  ;;  %v1176_v60 = vld [vmem:[%s1481_s28 + $0x2a8] sm:$0xf] }
  0x37   : > { %v1178_v61 = vld [vmem:[%s1481_s28 + $0x2c0] sm:$0xf]  ;;  %v1180_v62 = vld [vmem:[%s1481_s28 + $0x2d8] sm:$0xf]  ;;  %1177 = vst [vmem:[%s1486_s29 + $0x158] sm:$0xf] %v1176_v60 }
  0x38   : > { %1179 = vst [vmem:[%s1486_s29 + $0x164] sm:$0xf] %v1178_v61  ;;  %1181 = vst [vmem:[%s1486_s29 + $0x170] sm:$0xf] %v1180_v62  ;;  %v1182_v63 = vld [vmem:[%s1481_s28 + $0x2f0] sm:$0xf] }
  0x39   : > { %1183 = vst [vmem:[%s1486_s29 + $0x17c] sm:$0xf] %v1182_v63 }
  0x3a PF: > { %p1184_p8 = scmp.ge.s32.totalorder %s1411_s16, 1  ;;  %p347_p9 = scmp.lt.s32.totalorder %s1411_s16, 3 }
  0x3c   : > { %p348_p10 = pnand %p1184_p8, %p347_p9 }
  0x3d   : > { %s354_s30 = sand.u32 (!%p348_p10), 1, %s1395_s12   ;;  %s404_s4 = smul.u32 (!%p348_p10), 3, %s1403_s14 }
  0x3e   : > { %351 = sbr.rel (%p348_p10) target bundleno = 352 (0x160), region = 54 }
  0x3f   : > { %s1267_s8 = smul.u32 (!%p348_p10), 384, %s354_s30  ;;  %p405_p11 = scmp.lt.s32.totalorder (!%p348_p10), %s404_s4, 5 }
  0x41   : > { %s1624_s9 = scalar_lea.vmem (!%p348_p10), [#allocation3], %s1267_s8  ;;  %s1268_s8 = smul.u32 (!%p348_p10), 96, %s354_s30 }
  0x43   : > { %v429_v0 = vld [vmem:[%s1745_s0 + $0x8] sm:$0xff]  ;;  %v431_v1 = vld [vmem:[%s1745_s0 + $0x18] sm:$0xff]  ;;  %v1312_v5 = vld [vmem:[%s1624_s9 + $0x94] ss:$12 sps:$4 sm:$0xff]   ;;  %v915_v60 = vlaneseq  ;;  %s1757_s4 = smov (!%p405_p11, %s404_s4), 5  ;;  %s1237_s12 = smul.u32 (%p1468_p6), 24, %s1403_s14 }
  0x44   : > { %v437_v2 = vpack.c.bf16 %v431_v1, %v429_v0  ;;  %v1309_v3 = vld [vmem:[%s1624_s9 + $0xac] ss:$12 sps:$4 sm:$0xff]   ;;  %v1311_v4 = vld [vmem:[%s1624_s9 + $0xa8] ss:$12 sps:$4 sm:$0xff]   ;;  %v1314_v6 = vld [vmem:[%s1624_s9 + $0x90] ss:$12 sps:$4 sm:$0xff]   ;;  %s407_s7 = scalar_lea.vmem %s1747_s2, %s1757_s4 }
  0x45   : > { %772 = vmatprep.subr.bf16.mxu0 %v1309_v3  ;;  %v1315_v7 = vld [vmem:[%s1624_s9 + $0x7c] ss:$12 sps:$4 sm:$0xff]   ;;  %v1317_v8 = vld [vmem:[%s1624_s9 + $0x78] ss:$12 sps:$4 sm:$0xff]   ;;  %v1320_v11 = vld [vmem:[%s1624_s9 + $0x60] ss:$12 sps:$4 sm:$0xff]   ;;  %s966_s10 = scalar_lea.vmem (%p1468_p6), %s1748_s3, %s1237_s12 }
  0x46   : > { %857 = vmatprep.mubr.bf16.mxu1 %v437_v2  ;;  %804 = vmatprep.mubr.bf16.mxu0 %v437_v2  ;;  %v1318_v9 = vld [vmem:[%s1624_s9 + $0x64] ss:$12 sps:$4 sm:$0xff]   ;;  %v1321_v13 = vld [vmem:[%s1624_s9 + $0x4c] ss:$12 sps:$4 sm:$0xff]   ;;  %v1323_v16 = vld [vmem:[%s1624_s9 + $0x48] ss:$12 sps:$4 sm:$0xff]  }
  0x47   : > { %773 = vmatpush1.bf16.msra.mxu0 %v1311_v4  ;;  %v1329_v10 = vld [vmem:[%s1624_s9 + $0x170] ss:$12 sps:$4 sm:$0xff]   ;;  %v1334_v14 = vld [vmem:[%s1624_s9 + $0x158] ss:$12 sps:$4 sm:$0xff]   ;;  %v1324_v17 = vld [vmem:[%s1624_s9 + $0x34] ss:$12 sps:$4 sm:$0xff]  }
  0x48   : > { %774 = vmatprep.subr.bf16.mxu0 %v1312_v5  ;;  %1238 = vmatprep.subr.bf16.mxu1 %v1329_v10  ;;  %v1331_v12 = vld [vmem:[%s1624_s9 + $0xb0] ss:$12 sps:$4 sm:$0xff]   ;;  %v1336_v15 = vld [vmem:[%s1624_s9 + $0x98] ss:$12 sps:$4 sm:$0xff]   ;;  %v1339_v18 = vld [vmem:[%s1624_s9 + $0x140] ss:$12 sps:$4 sm:$0xff]  }
  0x49   : > { %1239 = vmatpush3.bf16.msra.mxu1 %v1331_v12  ;;  %v1341_v19 = vld [vmem:[%s1624_s9 + $0x80] ss:$12 sps:$4 sm:$0xff]   ;;  %v1326_v20 = vld [vmem:[%s1624_s9 + $0x30] ss:$12 sps:$4 sm:$0xff]   ;;  %v1344_v21 = vld [vmem:[%s1624_s9 + $0x128] ss:$12 sps:$4 sm:$0xff]  }
  0x4a   : > { %1240 = vmatprep.subr.bf16.mxu1 %v1334_v14  ;;  %v1327_v22 = vld [vmem:[%s1624_s9 + $0x1c] ss:$12 sps:$4 sm:$0xff]   ;;  %v1330_v24 = vld [vmem:[%s1624_s9 + $0x18] ss:$12 sps:$4 sm:$0xff]   ;;  %v1335_v29 = vld [vmem:[%s1624_s9] ss:$12 sps:$4 sm:$0xff]  }
  0x4b   : > { %775 = vmatpush1.bf16.msra.mxu0 %v1314_v6  ;;  %v1346_v23 = vld [vmem:[%s1624_s9 + $0x68] ss:$12 sps:$4 sm:$0xff]   ;;  %v1349_v25 = vld [vmem:[%s1624_s9 + $0x110] ss:$12 sps:$4 sm:$0xff]   ;;  %v1354_v28 = vld [vmem:[%s1624_s9 + $0xf8] ss:$12 sps:$4 sm:$0xff]  }
  0x4c   : > { %776 = vmatprep.subr.bf16.mxu0 %v1315_v7  ;;  %v1332_v26 = vld [vmem:[%s1624_s9 + $0x4] ss:$12 sps:$4 sm:$0xff]   ;;  %v1337_v30 = vld [vmem:[%s1624_s9 + $0x16c] ss:$12 sps:$4 sm:$0xff]   ;;  %v1340_v33 = vld [vmem:[%s1624_s9 + $0x168] ss:$12 sps:$4 sm:$0xff]  }
  0x4d   : > { %1241 = vmatpush3.bf16.msra.mxu1 %v1336_v15  ;;  %v1351_v27 = vld [vmem:[%s1624_s9 + $0x50] ss:$12 sps:$4 sm:$0xff]   ;;  %v1356_v31 = vld [vmem:[%s1624_s9 + $0x38] ss:$12 sps:$4 sm:$0xff]   ;;  %v1359_v32 = vld [vmem:[%s1624_s9 + $0xe0] ss:$12 sps:$4 sm:$0xff]  }
  0x4e   : > { %1242 = vmatprep.subr.bf16.mxu1 %v1339_v18  ;;  %v1342_v34 = vld [vmem:[%s1624_s9 + $0x154] ss:$12 sps:$4 sm:$0xff]   ;;  %v1345_v37 = vld [vmem:[%s1624_s9 + $0x150] ss:$12 sps:$4 sm:$0xff]   ;;  %v433_v42 = vld [vmem:[%s1745_s0 + $0x28] sm:$0xff]  ;;  %v916_v61 = vshrl.u32 %v915_v60, 7 }
  0x4f   : > { %777 = vmatpush1.bf16.msra.mxu0 %v1317_v8  ;;  %v1361_v35 = vld [vmem:[%s1624_s9 + $0x20] ss:$12 sps:$4 sm:$0xff]   ;;  %v1364_v36 = vld [vmem:[%s1624_s9 + $0xc8] ss:$12 sps:$4 sm:$0xff]   ;;  %v435_v43 = vld [vmem:[%s1745_s0 + $0x38] sm:$0xff] }
  0x50   : > { %778 = vmatprep.subr.bf16.mxu0 %v1318_v9  ;;  %v1347_v38 = vld [vmem:[%s1624_s9 + $0x13c] ss:$12 sps:$4 sm:$0xff]   ;;  %v428_v40 = vld [vmem:[%s1745_s0] sm:$0xff]  ;;  %v430_v41 = vld [vmem:[%s1745_s0 + $0x10] sm:$0xff]  ;;  %v439_v47 = vpack.c.bf16 %v435_v43, %v433_v42  ;;  %v925_v62 = vsub.s32 2, %v916_v61  ;;  %v917_v15 = vsub.s32 0, %v916_v61 }
  0x51   : > { %1243 = vmatpush3.bf16.msra.mxu1 %v1341_v19  ;;  %v1366_v39 = vld [vmem:[%s1624_s9 + $0x8] ss:$12 sps:$4 sm:$0xff]   ;;  %v1350_v44 = vld [vmem:[%s1624_s9 + $0x138] ss:$12 sps:$4 sm:$0xff]   ;;  %v436_v46 = vpack.c.bf16 %v430_v41, %v428_v40  ;;  %v1355_v48 = vld [vmem:[%s1624_s9 + $0x120] ss:$12 sps:$4 sm:$0xff]  }
  0x52   : > { %1244 = vmatprep.subr.bf16.mxu1 %v1344_v21  ;;  %v1352_v45 = vld [vmem:[%s1624_s9 + $0x124] ss:$12 sps:$4 sm:$0xff]   ;;  %v1357_v49 = vld [vmem:[%s1624_s9 + $0x10c] ss:$12 sps:$4 sm:$0xff]   ;;  %v1360_v52 = vld [vmem:[%s1624_s9 + $0x108] ss:$12 sps:$4 sm:$0xff]  }
  0x53   : > { %779 = vmatpush1.bf16.msra.mxu0 %v1320_v11  ;;  %v432_v50 = vld [vmem:[%s1745_s0 + $0x20] sm:$0xff]  ;;  %v434_v51 = vld [vmem:[%s1745_s0 + $0x30] sm:$0xff]  ;;  %v1367_v56 = vld [vmem:[%s1624_s9 + $0xdc] ss:$12 sps:$4 sm:$0xff]  }
  0x54   : > { %780 = vmatprep.subr.bf16.mxu0 %v1321_v13  ;;  %v1362_v53 = vld [vmem:[%s1624_s9 + $0xf4] ss:$12 sps:$4 sm:$0xff]   ;;  %v438_v54 = vpack.c.bf16 %v434_v51, %v432_v50  ;;  %v1365_v55 = vld [vmem:[%s1624_s9 + $0xf0] ss:$12 sps:$4 sm:$0xff]   ;;  %v1369_v57 = vld [vmem:[%s1624_s9 + $0xd8] ss:$12 sps:$4 sm:$0xff]  }
  0x55   : > { %1245 = vmatpush3.bf16.msra.mxu1 %v1346_v23  ;;  %v1370_v58 = vld [vmem:[%s1624_s9 + $0xc4] ss:$12 sps:$4 sm:$0xff]   ;;  %v1372_v59 = vld [vmem:[%s1624_s9 + $0xc0] ss:$12 sps:$4 sm:$0xff]   ;;  %s1698_s9 = scalar_lea.vmem [#allocation4], %s1268_s8 }
  0x56   : > { %1246 = vmatprep.subr.bf16.mxu1 %v1349_v25  ;;  %v913_v63 = vld [vmem:[%s407_s7] sm:$0x7] }
  0x57   : > { %781 = vmatpush1.bf16.msra.mxu0 %v1323_v16  ;;  %v926_v1 = vrot.slane %v913_v63, %v925_v62  ;;  %v918_v19 = vrot.slane %v913_v63, %v917_v15 }
  0x58   : > { %782 = vmatprep.subr.bf16.mxu0 %v1324_v17  ;;  %v921_v17 = vsub.s32 1, %v916_v61 }
  0x59   : > { %1247 = vmatpush3.bf16.msra.mxu1 %v1351_v27 }
  0x5a   : > { %1248 = vmatprep.subr.bf16.mxu1 %v1354_v28 }
  0x5b   : > { %783 = vmatpush1.bf16.msra.mxu0 %v1326_v20  ;;  %v922_v20 = vrot.slane %v913_v63, %v921_v17 }
  0x5c   : > { %784 = vmatprep.subr.bf16.mxu0 %v1327_v22 }
  0x5d   : > { %1249 = vmatpush3.bf16.msra.mxu1 %v1356_v31 }
  0x5e   : > { %1250 = vmatprep.subr.bf16.mxu1 %v1359_v32 }
  0x5f   : > { %785 = vmatpush1.bf16.msra.mxu0 %v1330_v24 }
  0x60   : > { %786 = vmatprep.subr.bf16.mxu0 %v1332_v26 }
  0x61   : > { %1251 = vmatpush3.bf16.msra.mxu1 %v1361_v35 }
  0x62   : > { %1252 = vmatprep.subr.bf16.mxu1 %v1364_v36 }
  0x63   : > { %787 = vmatpush1.bf16.msra.mxu0 %v1335_v29 }
  0x64   : > { %788 = vmatprep.subr.bf16.mxu0 %v1337_v30 }
  0x65   : > { %1253 = vmatpush3.bf16.msra.mxu1 %v1366_v39 }
  0x67   : > { %789 = vmatpush2.bf16.msra.mxu0 %v1340_v33 }
  0x68   : > { %790 = vmatprep.subr.bf16.mxu0 %v1342_v34  ;;  %858 = vmatmul.mubr.bf16.vlgmr.msra.gmra.mxu1 %v436_v46 }
  0x69   : > { %865 = vmatprep.mubr.bf16.mxu1 %v439_v47 }
  0x6b   : > { %791 = vmatpush2.bf16.msra.mxu0 %v1345_v37 }
  0x6c   : > { %792 = vmatprep.subr.bf16.mxu0 %v1347_v38 }
  0x6f   : > { %793 = vmatpush2.bf16.msra.mxu0 %v1350_v44 }
  0x70   : > { %794 = vmatprep.subr.bf16.mxu0 %v1352_v45  ;;  %866 = vmatmul.mubr.bf16.gmra.mxu1 %v438_v54 }
  0x73   : > { %795 = vmatpush2.bf16.msra.mxu0 %v1355_v48 }
  0x74   : > { %796 = vmatprep.subr.bf16.mxu0 %v1357_v49 }
  0x77   : > { %797 = vmatpush2.bf16.msra.mxu0 %v1360_v52 }
  0x78   : > { %798 = vmatprep.subr.bf16.mxu0 %v1362_v53 }
  0x7b   : > { %799 = vmatpush2.bf16.msra.mxu0 %v1365_v55 }
  0x7c   : > { %800 = vmatprep.subr.bf16.mxu0 %v1367_v56 }
  0x7f   : > { %801 = vmatpush2.bf16.msra.mxu0 %v1369_v57 }
  0x80   : > { %802 = vmatprep.subr.bf16.mxu0 %v1370_v58 }
  0x83   : > { %803 = vmatpush2.bf16.msra.mxu0 %v1372_v59 }
  0x86   : > { %805 = vmatmul.mubr.bf16.vlgmr.msra.gmra.mxu0 %v436_v46 }
  0x87   : > { %814 = vmatprep.mubr.bf16.mxu0 %v439_v47 }
  0x8e   : > { %815 = vmatmul.mubr.bf16.gmra.mxu0 %v438_v54 }
 0x128   : > { %v1254_v0 = vpop.f32.mrf.mxu1 }
 0x12a   : > { %v1255_v2 = vpop.f32.mrf.mxu1 }
 0x12b   : > { %v1256_v3 = vadd.f32 %v1255_v2, %v1254_v0 }
 0x12c   : > { %v1257_v4 = vpop.f32.mrf.mxu1 }
 0x12d   : > { %v932_v5 = vadd.f32 %v1256_v3, %v926_v1 }
 0x12e   : > { %v1258_v6 = vpop.f32.mrf.mxu1 }
 0x12f   : > { %944 = vst [vmem:[%s1698_s9 + $0x10] sm:$0xff] %v932_v5  ;;  %v1259_v7 = vadd.f32 %v1258_v6, %v1257_v4 }
 0x130   : > { %v1260_v8 = vpop.f32.mrf.mxu1 }
 0x131   : > { %v935_v9 = vadd.f32 %v1259_v7, %v926_v1 }
 0x132   : > { %v1261_v10 = vpop.f32.mrf.mxu1 }
 0x133   : > { %947 = vst [vmem:[%s1698_s9 + $0x28] sm:$0xff] %v935_v9  ;;  %v1262_v11 = vadd.f32 %v1261_v10, %v1260_v8 }
 0x134   : > { %v1263_v12 = vpop.f32.mrf.mxu1 }
 0x135   : > { %v938_v13 = vadd.f32 %v1262_v11, %v926_v1 }
 0x136   : > { %v1264_v14 = vpop.f32.mrf.mxu1  ;;  %v983_v39 = vld [vmem:[%s1698_s9 + $0x10] sm:$0xff] (%p1468_p6) }
 0x137   : > { %950 = vst [vmem:[%s1698_s9 + $0x40] sm:$0xff] %v938_v13  ;;  %v1265_v16 = vadd.f32 %v1264_v14, %v1263_v12  ;;  %984 = vst [vmem:[%s966_s10 + $0x10] sm:$0xff] (%p1468_p6), %v983_v39 }
 0x139   : > { %v941_v18 = vadd.f32 %v1265_v16, %v926_v1 }
 0x13a   : > { %v989_v42 = vld [vmem:[%s1698_s9 + $0x28] sm:$0xff] (%p1468_p6) }
 0x13b   : > { %953 = vst [vmem:[%s1698_s9 + $0x58] sm:$0xff] %v941_v18  ;;  %990 = vst [vmem:[%s966_s10 + $0x40] sm:$0xff] (%p1468_p6), %v989_v42 }
 0x13e   : > { %v995_v45 = vld [vmem:[%s1698_s9 + $0x40] sm:$0xff] (%p1468_p6) }
 0x13f   : > { %996 = vst [vmem:[%s966_s10 + $0x70] sm:$0xff] (%p1468_p6), %v995_v45 }
 0x142   : > { %v1001_v48 = vld [vmem:[%s1698_s9 + $0x58] sm:$0xff] (%p1468_p6) }
 0x143   : > { %1002 = vst [vmem:[%s966_s10 + $0xa0] sm:$0xff] (%p1468_p6), %v1001_v48 }
 0x146   : > { %v806_v21 = vpop.f32.mrf.mxu0 }
 0x147   : > { %v930_v22 = vadd.f32 %v918_v19, %v806_v21 }
 0x148   : > { %v808_v23 = vpop.f32.mrf.mxu0 }
 0x149   : > { %942 = vst [vmem:[%s1698_s9] sm:$0xff] %v930_v22  ;;  %v931_v24 = vadd.f32 %v922_v20, %v808_v23 }
 0x14a   : > { %v810_v25 = vpop.f32.mrf.mxu0 }
 0x14b   : > { %943 = vst [vmem:[%s1698_s9 + $0x8] sm:$0xff] %v931_v24  ;;  %v933_v26 = vadd.f32 %v918_v19, %v810_v25 }
 0x14c   : > { %v812_v27 = vpop.f32.mrf.mxu0 }
 0x14d   : > { %945 = vst [vmem:[%s1698_s9 + $0x18] sm:$0xff] %v933_v26  ;;  %v934_v28 = vadd.f32 %v922_v20, %v812_v27 }
 0x14e   : > { %v816_v29 = vpop.f32.mrf.mxu0 }
 0x14f   : > { %946 = vst [vmem:[%s1698_s9 + $0x20] sm:$0xff] %v934_v28  ;;  %v936_v30 = vadd.f32 %v918_v19, %v816_v29 }
 0x150   : > { %v818_v31 = vpop.f32.mrf.mxu0  ;;  %v979_v37 = vld [vmem:[%s1698_s9] sm:$0xff] (%p1468_p6) }
 0x151   : > { %948 = vst [vmem:[%s1698_s9 + $0x30] sm:$0xff] %v936_v30  ;;  %v937_v32 = vadd.f32 %v922_v20, %v818_v31  ;;  %980 = vst [vmem:[%s966_s10] sm:$0xff] (%p1468_p6), %v979_v37 }
 0x152   : > { %v820_v33 = vpop.f32.mrf.mxu0  ;;  %v981_v38 = vld [vmem:[%s1698_s9 + $0x8] sm:$0xff] (%p1468_p6) }
 0x153   : > { %949 = vst [vmem:[%s1698_s9 + $0x38] sm:$0xff] %v937_v32  ;;  %v939_v34 = vadd.f32 %v918_v19, %v820_v33  ;;  %960 = sbr.rel (!%p1468_p6) target bundleno = 352 (0x160), region = 70  ;;  %982 = vst [vmem:[%s966_s10 + $0x8] sm:$0xff] (%p1468_p6), %v981_v38 }
 0x154   : > { %v822_v35 = vpop.f32.mrf.mxu0  ;;  %v985_v40 = vld [vmem:[%s1698_s9 + $0x18] sm:$0xff] (%p1468_p6) }
 0x155   : > { %951 = vst [vmem:[%s1698_s9 + $0x48] sm:$0xff] %v939_v34  ;;  %v940_v36 = vadd.f32 %v922_v20, %v822_v35  ;;  %986 = vst [vmem:[%s966_s10 + $0x30] sm:$0xff] (%p1468_p6), %v985_v40 }
 0x156   : > { %v987_v41 = vld [vmem:[%s1698_s9 + $0x20] sm:$0xff] (%p1468_p6) }
 0x157   : > { %952 = vst [vmem:[%s1698_s9 + $0x50] sm:$0xff] %v940_v36  ;;  %988 = vst [vmem:[%s966_s10 + $0x38] sm:$0xff] (%p1468_p6), %v987_v41 }
 0x158   : > { %v991_v43 = vld [vmem:[%s1698_s9 + $0x30] sm:$0xff] }
 0x159   : > { %992 = vst [vmem:[%s966_s10 + $0x60] sm:$0xff] %v991_v43 }
 0x15a   : > { %v993_v44 = vld [vmem:[%s1698_s9 + $0x38] sm:$0xff] }
 0x15b   : > { %994 = vst [vmem:[%s966_s10 + $0x68] sm:$0xff] %v993_v44 }
 0x15c   : > { %v997_v46 = vld [vmem:[%s1698_s9 + $0x48] sm:$0xff] }
 0x15d   : > { %998 = vst [vmem:[%s966_s10 + $0x90] sm:$0xff] %v997_v46 }
 0x15e   : > { %v999_v47 = vld [vmem:[%s1698_s9 + $0x50] sm:$0xff] }
 0x15f   : > { %1000 = vst [vmem:[%s966_s10 + $0x98] sm:$0xff] %v999_v47 }
 0x160 PF: > { %s13_s16 = sadd.s32 1, %s1411_s16   ;;  %s1750_s12 = smov %s1399_s13 }
 0x161   : > { %p10_p12 = scmp.ge.s32.totalorder %s13_s16, 4   ;;  %s1751_s13 = smov %s1473_s22 }
 0x162   : > { %s1752_s14 = smov %s1407_s15  ;;  %s1753_s15 = smov %s1755_s17 }
 0x163   :  { %12 = sbr.rel (!%p10_p12) target bundleno = 3 (0x3), region = 136 }

// kernel: transformer_forward.32
= control target key start
LH: loop header
LB: loop body
LE: loop exit
PB: predicated region body
PF: predicated region fallthrough
CT: control target
= control target key end

     0   :  { %s993_s12 = smov 0   ;;  %s995_s13 = smov 0   ;;  %s1168_s0 = inlined_call_operand.vmem [shape: f32[2,16,256], index: 0, kind: input, shape index: {}]   ;;  %s1169_s1 = inlined_call_operand.vmem [shape: f32[2,16,512], index: 1, kind: input, shape index: {}, may-alias: {1,2}]   ;;  %s1170_s2 = inlined_call_operand.vmem [shape: f32[2,16,512], index: 2, kind: input, shape index: {}, may-alias: {1,2}]   ;;  %s1171_s3 = inlined_call_operand.vmem [shape: f32[2,16,256], index: 3, kind: output, shape index: {}]  }
   0x1   :  { %s997_s14 = smov 0   ;;  %s999_s15 = smov 0  }
   0x2   :  { %s1001_s16 = smov 0   ;;  %s1003_s17 = smov 0  }
   0x3   :  { %s1005_s18 = smov 0   ;;  %s1007_s19 = smov 0  }
   0x4   :  { %s1009_s20 = smov 0  }
   0x5 LB: > { %s765_s21 = sadd.s32 4294967295, %s967_s20   ;;  %s35_s22 = sadd.s32 1, %s959_s18  ;;  %s967_s20 = sphi %s1009_s20, %s13_s20   ;;  %s963_s19 = sphi %s1007_s19, %s1185_s19   ;;  %s959_s18 = sphi %s1005_s18, %s1184_s18   ;;  %s955_s17 = sphi %s1003_s17, %s1183_s17   ;;  %s951_s16 = sphi %s1001_s16, %s1182_s16   ;;  %s947_s15 = sphi %s999_s15, %s1181_s15   ;;  %s943_s14 = sphi %s997_s14, %s1180_s14   ;;  %s939_s13 = sphi %s995_s13, %s1179_s13   ;;  %s935_s12 = sphi %s993_s12, %s1178_s12  }
   0x6   : > { %p37_p0 = scmp.ge.s32.totalorder %s35_s22, 2  ;;  %s39_s23 = sadd.s32 1, %s963_s19 }
   0x7   : > { %s50_s24 = sadd.s32 1, %s947_s15  ;;  %p57_p1 = scmp.ne.s32.totalorder %s947_s15, %s943_s14 }
   0x8   : > { %s1187_s22 = smov (%p37_p0, %s35_s22), 0  ;;  %s1189_s23 = smov (!%p37_p0, %s39_s23), %s963_s19 }
   0x9   : > { %s46_s25 = ssub.s32 %s959_s18, %s1187_s22  ;;  %p58_p2 = scmp.eq.s32.totalorder %s967_s20, 0 }
   0xa   : > { %p41_p3 = scmp.ge.s32.totalorder %s1189_s23, 2  ;;  %s103_s26 = sadd.s32 2, %s959_s18 }
   0xb   : > { %p1056_p4 = por %p58_p2, %p57_p1  ;;  %s104_s28 = sadd.s32 2, %s1187_s22 }
   0xc   : > { %s1191_s23 = smov (%p41_p3, %s1189_s23), 0  ;;  %s108_s29 = ssub.s32 %s103_s26, %s104_s28 }
   0xd   : > { %1174 = sst [smem:[#allocation9_spill]] %s1191_s23  ;;  %s112_s30 = sadd.s32 1, %s939_s13 }
   0xe   : > { %s43_s4 = ssub.s32 %s963_s19, %s1191_s23  ;;  %p119_p5 = scmp.ne.s32.totalorder %s939_s13, %s935_s12 }
   0xf   : > { %s47_s5 = sor.u32 %s46_s25, %s43_s4  ;;  %s109_s6 = sor.u32 %s108_s29, %s43_s4 }
  0x10   : > { %p48_p6 = scmp.eq.s32.totalorder %s47_s5, 0  ;;  %p110_p7 = scmp.eq.s32.totalorder %s109_s6, 0 }
  0x11   : > { %p1070_p8 = por %p119_p5, %p58_p2  ;;  %p153_p9 = scmp.eq.s32.totalorder %s765_s21, 3 }
  0x12   : > { %s1075_s8 = scalar_select %p48_p6, %s947_s15, %s50_s24  }
  0x13   : > { %s1078_s9 = scalar_select %p110_p7, %s939_s13, %s112_s30  }
  0x14   : > { %p1083_p10 = por %p153_p9, %p57_p1  ;;  %p768_p11 = scmp.ge.s32.totalorder %s967_s20, 4 }
  0x16   : > { %175 = sbr.rel (%p768_p11) target bundleno = 50 (0x32), region = 16 }
  0x1b   : > { %178 = sbr.rel (!%p1056_p4) target bundleno = 34 (0x22), region = 20  ;;  %s180_s11 = sand.u32 (%p1056_p4), 1, %s947_s15  }
  0x1c   : > { %s770_s21 = sshll.u32 (%p1056_p4), %s963_s19, 2  ;;  %s769_s24 = sshll.u32 (%p1056_p4), %s180_s11, 4 }
  0x1d   : > { %s187_s25 = sadd.s32 (%p1056_p4), %s959_s18, %s770_s21  ;;  %s182_s4 = scalar_lea.vmem (%p1056_p4), [#allocation5], %s769_s24 }
  0x1e   : > { %s771_s26 = sshll.u32 (%p1056_p4), %s187_s25, 3 }
  0x1f   : > { %s189_s30 = scalar_lea.vmem (%p1056_p4), %s1168_s0, %s771_s26 }
  0x20   : > { %v220_v0 = vld [vmem:[%s189_s30] sm:$0xff]  ;;  %v222_v1 = vld [vmem:[%s189_s30 + $0x10] sm:$0xff] }
  0x21   : > { %221 = vst [vmem:[%s182_s4] sm:$0xff] %v220_v0  ;;  %223 = vst [vmem:[%s182_s4 + $0x8] sm:$0xff] %v222_v1 }
  0x22 PF: > { %229 = sbr.rel (!%p1056_p4) target bundleno = 42 (0x2a), region = 58  ;;  %s231_s5 = sand.u32 (%p1056_p4), 1, %s947_s15  }
  0x23   : > { %s773_s6 = sshll.u32 (%p1056_p4), %s963_s19, 3  ;;  %s772_s11 = sshll.u32 (%p1056_p4), %s231_s5, 4 }
  0x24   : > { %s238_s21 = sadd.s32 (%p1056_p4), %s959_s18, %s773_s6  ;;  %s233_s24 = scalar_lea.vmem (%p1056_p4), [#allocation6], %s772_s11 }
  0x25   : > { %s774_s25 = sshll.u32 (%p1056_p4), %s238_s21, 3 }
  0x26   : > { %s240_s26 = scalar_lea.vmem (%p1056_p4), %s1169_s1, %s774_s25 }
  0x27   : > { %v271_v2 = vld [vmem:[%s240_s26] sm:$0xff] }
  0x28   : > { %v273_v3 = vld [vmem:[%s240_s26 + $0x20] sm:$0xff]  ;;  %272 = vst [vmem:[%s233_s24] sm:$0xff] %v271_v2 }
  0x29   : > { %274 = vst [vmem:[%s233_s24 + $0x8] sm:$0xff] %v273_v3 }
  0x2a PF: > { %280 = sbr.rel (!%p1070_p8) target bundleno = 50 (0x32), region = 96  ;;  %s282_s27 = sand.u32 (%p1070_p8), 1, %s939_s13  }
  0x2b   : > { %s776_s29 = sshll.u32 (%p1070_p8), %s963_s19, 3  ;;  %s775_s30 = sshll.u32 (%p1070_p8), %s282_s27, 4 }
  0x2c   : > { %s671_s4 = sadd.s32 (%p1070_p8), %s959_s18, %s776_s29  ;;  %s284_s11 = scalar_lea.vmem (%p1070_p8), [#allocation7], %s775_s30 }
  0x2d   : > { %s777_s5 = sshll.u32 (%p1070_p8), %s671_s4, 3 }
  0x2e   : > { %s673_s21 = scalar_lea.vmem (%p1070_p8), %s1170_s2, %s777_s5 }
  0x2f   : > { %v778_v4 = vld [vmem:[%s673_s21 + $0x10] sm:$0xff] }
  0x30   : > { %v779_v5 = vld [vmem:[%s673_s21 + $0x30] sm:$0xff]  ;;  %324 = vst [vmem:[%s284_s11] sm:$0xff] %v778_v4 }
  0x31   : > { %326 = vst [vmem:[%s284_s11 + $0x8] sm:$0xff] %v779_v5 }
  0x32 PF: > { %p780_p12 = scmp.ge.s32.totalorder %s967_s20, 1  ;;  %p331_p13 = scmp.lt.s32.totalorder %s967_s20, 5 }
  0x34   : > { %p332_p0 = pnand %p780_p12, %p331_p13 }
  0x35   : > { %s338_s7 = sand.u32 (!%p332_p0), 1, %s943_s14   ;;  %s352_s14 = sand.u32 (!%p332_p0), 1, %s935_s12  }
  0x36   : > { %335 = sbr.rel (%p332_p0) target bundleno = 849 (0x351), region = 134  ;;  %s1115_s25 = sshll.u32 (!%p332_p0), %s338_s7, 4 }
  0x37   : > { %s347_s28 = scalar_lea.vmem (!%p332_p0), [#allocation6], %s1115_s25  ;;  %s340_s26 = scalar_lea.vmem (!%p332_p0), [#allocation5], %s1115_s25 }
  0x38   : > { %s783_s24 = sshll.u32 (!%p332_p0), %s352_s14, 4  ;;  %s381_s12 = scalar_lea.vmem (!%p332_p0), [#allocation8], %s1115_s25 }
  0x39   : > { %s354_s27 = scalar_lea.vmem (!%p332_p0), [#allocation7], %s783_s24 }
  0x3b   : > { %v969_v6 = vmov 0.0   ;;  %vm970_vm0 = vmmov 0   ;;  %v402_v7 = vld [vmem:[%s347_s28] sm:$0xff]  ;;  %v403_v8 = vld [vmem:[%s347_s28 + $0x8] sm:$0xff]  ;;  %vm392_vm1 = vcmask 7168   ;;  %v971_v13 = vmov -inf  }
  0x3c   : > { %795 = vmatprep.subr.bf16.mxu0 %v969_v6  ;;  %797 = vmatprep.mubr.msk.bf16.mxu0 %vm970_vm0, %v969_v6  ;;  %v404_v9 = vpack.c.bf16 %v403_v8, %v402_v7  ;;  %v399_v10 = vld [vmem:[%s340_s26] sm:$0xff]  ;;  %v400_v11 = vld [vmem:[%s340_s26 + $0x8] sm:$0xff]  ;;  %393 = vst.msk [vmem:[#allocation2] sm:$0xff] %vm392_vm1, %v971_v13  ;;  %394 = vst.msk [vmem:[#allocation2 + $0x8] sm:$0xff] %vm392_vm1, %v971_v13  ;;  %vm450_vm2 = vcmask 130048   ;;  %v972_v22 = vmov 0  }
  0x3d   : > { %801 = vmatprep.subr.bf16.mxu1 %v969_v6  ;;  %803 = vmatprep.mubr.msk.bf16.mxu1 %vm970_vm0, %v969_v6  ;;  %v401_v12 = vpack.c.bf16 %v400_v11, %v399_v10  ;;  %395 = vst.msk [vmem:[#allocation3] sm:$0xff] %vm392_vm1, %v969_v6  ;;  %396 = vst.msk [vmem:[#allocation3 + $0x8] sm:$0xff] %vm392_vm1, %v969_v6  ;;  %v511_v31 = vld [vmem:[%s354_s27] sm:$0xff]  ;;  %v512_v32 = vld [vmem:[%s354_s27 + $0x8] sm:$0xff]  ;;  %s787_s29 = sshll.u32 (%p1083_p10), %s955_s17, 2 }
  0x3e   : > { %796 = vmatpush3.bf16.xpose.msra.mxu0 %v404_v9  ;;  %883 = vset.pattern.permute.xlu1 %v972_v22  ;;  %v513_v33 = vpack.c.bf16 %v512_v32, %v511_v31  ;;  %s598_s30 = sadd.s32 (%p1083_p10), %s951_s16, %s787_s29 }
  0x3f   : > { %884 = vset.pattern.permute.xlu0 %v972_v22  ;;  %s788_s4 = sshll.u32 (%p1083_p10), %s598_s30, 3 }
  0x40   : > { %802 = vmatpush3.bf16.msra.mxu1 %v513_v33  ;;  %s600_s23 = scalar_lea.vmem (%p1083_p10), %s1171_s3, %s788_s4 }
  0x43   : > { %v448_v23 = vld [vmem:[#allocation2] sm:$0xff]  ;;  %v449_v26 = vld [vmem:[#allocation2 + $0x8] sm:$0xff] }
  0x44   : > { %v481_v49 = vld [vmem:[#allocation3] sm:$0xff]  ;;  %v482_v52 = vld [vmem:[#allocation3 + $0x8] sm:$0xff] }
  0x45   : > { %798 = vmatmul.mubr.bf16.vlgmr.msra.gmra.mxu0 %v401_v12 }
 0x105   : > { %v439_v14 = vpop.f32.mrf.mxu0 }
 0x106   : > { %v446_v15 = vmul.f32 0.088388346, %v439_v14 }
 0x107   : > { %v799_v16 = vpop.f32.mrf.mxu0 }
 0x108   : > { %v451_v17 = vsel %vm450_vm2, %v446_v15, -inf }
 0x109   : > { %452 = vmax.xlane.f32.xlu0 %v451_v17  ;;  %v442_v18 = vpop.f32.mrf.mxu0 }
 0x10a   : > { %v447_v19 = vmul.f32 0.088388346, %v442_v18 }
 0x10b   : > { %v800_v20 = vpop.f32.mrf.mxu0 }
 0x10c   : > { %v454_v21 = vsel %vm450_vm2, %v447_v19, -inf }
 0x10d   : > { %455 = vmax.xlane.f32.xlu0 %v454_v21 }
 0x192   : > { %v453_v24 = vpop.xlane.xlu0 %452 }
 0x193   : > { %v457_v25 = vmax.f32 %v448_v23, %v453_v24 }
 0x195   : > { %v459_v27 = vsub.f32 %v448_v23, %v457_v25  ;;  %562 = vst.msk [vmem:[#allocation2] sm:$0xff] %vm392_vm1, %v457_v25  ;;  %467 = vperm.xlu1 %883, %v457_v25  }
 0x196   : > { %v456_v28 = vpop.xlane.xlu0 %455 }
 0x197   : > { %v458_v29 = vmax.f32 %v449_v26, %v456_v28  ;;  %v461_v46 = vmul.f32 1.442695, %v459_v27 }
 0x199   : > { %v460_v30 = vsub.f32 %v449_v26, %v458_v29  ;;  %563 = vst.msk [vmem:[#allocation2 + $0x8] sm:$0xff] %vm392_vm1, %v458_v29  ;;  %472 = vperm.xlu1 %883, %v458_v29  }
 0x19b   : > { %v463_v43 = vmul.f32 1.442695, %v460_v30 }
 0x210   : > { %v468_v34 = vpop.permute.xlu1 %467 }
 0x211   : > { %v475_v35 = vsub.f32 %v446_v15, %v468_v34 }
 0x213   : > { %v477_v36 = vmul.f32 1.442695, %v475_v35 }
 0x214   : > { %v473_v37 = vpop.permute.xlu1 %472 }
 0x215   : > { %885 = vpow2.f32 %v477_v36  ;;  %v476_v38 = vsub.f32 %v447_v19, %v473_v37 }
 0x217   : > { %v479_v39 = vmul.f32 1.442695, %v476_v38 }
 0x219   : > { %887 = vpow2.f32 %v479_v39 }
 0x21a   : > { %889 = vpow2.f32 %v463_v43 }
 0x21b   : > { %891 = vpow2.f32 %v461_v46 }
 0x222   : > { %v886_v40 = vpop.eup %885 }
 0x223   : > { %v485_v41 = vsel %vm450_vm2, %v886_v40, 0.0 }
 0x224   : > { %486 = vadd.xlane.f32.xlu0 %v485_v41 }
 0x226   : > { %v888_v42 = vpop.eup %887 }
 0x227   : > { %v488_v44 = vsel %vm450_vm2, %v888_v42, 0.0  ;;  %v510_v45 = vpack.c.bf16 %v888_v42, %v886_v40  ;;  %v890_v47 = vpop.eup %889 }
 0x228   : > { %489 = vadd.xlane.f32.xlu1 %v488_v44  ;;  %v892_v48 = vpop.eup %891  ;;  %v484_v54 = vmul.f32 %v890_v47, %v482_v52 }
 0x229   : > { %804 = vmatmul.mubr.msk.bf16.vlgmr.msra.gmra.mxu1 %vm450_vm2, %v510_v45  ;;  %v483_v50 = vmul.f32 %v892_v48, %v481_v49 }
 0x239   : > { %505 = vperm.xlu1 %883, %v890_v47  }
 0x23a   : > { %500 = vperm.xlu0 %884, %v892_v48  }
 0x2ad   : > { %v487_v51 = vpop.xlane.xlu0 %486 }
 0x2ae   : > { %v491_v53 = vadd.f32 %v487_v51, %v483_v50 }
 0x2b0   : > { %494 = vst.msk [vmem:[#allocation3] sm:$0xff] %vm392_vm1, %v491_v53 }
 0x2b1   : > { %v490_v55 = vpop.xlane.xlu1 %489 }
 0x2b2   : > { %v492_v56 = vadd.f32 %v490_v55, %v484_v54 }
 0x2b4   : > { %495 = vst.msk [vmem:[#allocation3 + $0x8] sm:$0xff] %vm392_vm1, %v492_v56 }
 0x2b5   : > { %v501_v1 = vpop.permute.xlu0 %500  ;;  %v506_v3 = vpop.permute.xlu1 %505 }
 0x2b6   : > { %v508_v2 = vmul.f32 0.0, %v501_v1  ;;  %v509_v6 = vmul.f32 0.0, %v506_v3 }
 0x2b7   : > { %v567_v57 = vld [vmem:[#allocation3] sm:$0xff] }
 0x2b8   : > { %893 = vrcp.f32 %v567_v57 }
 0x2bb   : > { %v568_v58 = vld [vmem:[#allocation3 + $0x8] sm:$0xff] }
 0x2bc   : > { %895 = vrcp.f32 %v568_v58 }
 0x2c5   : > { %v894_v59 = vpop.eup %893 }
 0x2c6   : > { %575 = vperm.xlu0 %884, %v894_v59  }
 0x2c9   : > { %v896_v60 = vpop.eup %895 }
 0x2ca   : > { %580 = vperm.xlu0 %884, %v896_v60  }
 0x2e9   : > { %v551_v61 = vpop.f32.mrf.mxu1 }
 0x2ea   : > { %v558_v4 = vadd.f32 %v551_v61, %v508_v2 }
 0x2eb   : > { %v805_v62 = vpop.f32.mrf.mxu1 }
 0x2ed   : > { %v554_v63 = vpop.f32.mrf.mxu1 }
 0x2ee   : > { %v559_v8 = vadd.f32 %v554_v63, %v509_v6 }
 0x2ef   : > { %v806_v0 = vpop.f32.mrf.mxu1 }
 0x341   : > { %v576_v5 = vpop.permute.xlu0 %575 }
 0x342   : > { %v583_v7 = vmul.f32 %v576_v5, %v558_v4 }
 0x344   : > { %585 = vst [vmem:[%s381_s12] sm:$0xff] %v583_v7  ;;  %593 = sbr.rel (!%p1083_p10) target bundleno = 849 (0x351), region = 158 }
 0x345   : > { %v581_v9 = vpop.permute.xlu0 %580 }
 0x346   : > { %v584_v10 = vmul.f32 %v581_v9, %v559_v8 }
 0x348   : > { %586 = vst [vmem:[%s381_s12 + $0x8] sm:$0xff] %v584_v10 }
 0x34b   : > { %v631_v11 = vld [vmem:[%s381_s12] sm:$0xff] }
 0x34c   : > { %632 = vst [vmem:[%s600_s23] sm:$0xff] %v631_v11 }
 0x34f   : > { %v633_v12 = vld [vmem:[%s381_s12 + $0x8] sm:$0xff] }
 0x350   : > { %634 = vst [vmem:[%s600_s23 + $0x10] sm:$0xff] %v633_v12 }
 0x351 PF: > { %s13_s20 = sadd.s32 1, %s967_s20   ;;  %s1177_s10 = sld [smem:[#allocation9_spill]] }
 0x352   : > { %p10_p1 = scmp.ge.s32.totalorder %s13_s20, 6   ;;  %s1178_s12 = smov %s939_s13 }
 0x353   : > { %s1179_s13 = smov %s1078_s9  ;;  %s1180_s14 = smov %s947_s15 }
 0x354   : > { %s1181_s15 = smov %s1075_s8  ;;  %s1182_s16 = smov %s959_s18 }
 0x355   : > { %s1183_s17 = smov %s963_s19  ;;  %s1184_s18 = smov %s1187_s22 }
 0x356   :  { %12 = sbr.rel (!%p10_p1) target bundleno = 5 (0x5), region = 243 }
 0x357   : > { %s1185_s19 = smov %s1177_s10 }

// kernel: transformer_forward.33
= control target key start
LH: loop header
LB: loop body
LE: loop exit
PB: predicated region body
PF: predicated region fallthrough
CT: control target
= control target key end

     0   :  { %v320_v44 = vlaneseq  ;;  %s629_s1 = inlined_call_operand.vmem [shape: bf16[256,256], index: 1, kind: input, shape index: {}]   ;;  %s630_s0 = inlined_call_operand.vmem [shape: f32[32,256], index: 0, kind: input, shape index: {}]   ;;  %s631_s2 = inlined_call_operand.vmem [shape: f32[1,256], index: 2, kind: input, shape index: {}]   ;;  %s632_s3 = inlined_call_operand.vmem [shape: f32[32,256], index: 3, kind: output, shape index: {}]  }
   0x1   :  { %v414_v0 = vld [vmem:[%s629_s1 + $0x74] ss:$8 sps:$4 sm:$0xff]   ;;  %v416_v1 = vld [vmem:[%s629_s1 + $0x70] ss:$8 sps:$4 sm:$0xff]   ;;  %v417_v2 = vld [vmem:[%s629_s1 + $0x64] ss:$8 sps:$4 sm:$0xff]  }
   0x2   :  { %238 = vmatprep.subr.bf16.mxu0 %v414_v0  ;;  %382 = vmatprep.subr.bf16.mxu1 %v414_v0  ;;  %v419_v3 = vld [vmem:[%s629_s1 + $0x60] ss:$8 sps:$4 sm:$0xff]   ;;  %v420_v4 = vld [vmem:[%s629_s1 + $0x54] ss:$8 sps:$4 sm:$0xff]   ;;  %v422_v5 = vld [vmem:[%s629_s1 + $0x50] ss:$8 sps:$4 sm:$0xff]  }
   0x3   :  { %239 = vmatpush1.bf16.msra.mxu0 %v416_v1  ;;  %398 = vmatpush1.bf16.msra.mxu1 %v416_v1  ;;  %v423_v6 = vld [vmem:[%s629_s1 + $0x44] ss:$8 sps:$4 sm:$0xff]   ;;  %v425_v7 = vld [vmem:[%s629_s1 + $0x40] ss:$8 sps:$4 sm:$0xff]   ;;  %v426_v8 = vld [vmem:[%s629_s1 + $0x34] ss:$8 sps:$4 sm:$0xff]  }
   0x4   :  { %240 = vmatprep.subr.bf16.mxu0 %v417_v2  ;;  %383 = vmatprep.subr.bf16.mxu1 %v417_v2  ;;  %v428_v9 = vld [vmem:[%s629_s1 + $0x30] ss:$8 sps:$4 sm:$0xff]   ;;  %v429_v10 = vld [vmem:[%s629_s1 + $0x24] ss:$8 sps:$4 sm:$0xff]   ;;  %v431_v11 = vld [vmem:[%s629_s1 + $0x20] ss:$8 sps:$4 sm:$0xff]  }
   0x5   :  { %v432_v12 = vld [vmem:[%s629_s1 + $0x14] ss:$8 sps:$4 sm:$0xff]   ;;  %v27_v13 = vld [vmem:[%s630_s0 + $0x8] sm:$0xff]  ;;  %v434_v18 = vld [vmem:[%s629_s1 + $0x10] ss:$8 sps:$4 sm:$0xff]   ;;  %v321_v45 = vshrl.u32 %v320_v44, 7 }
   0x6   :  { %v29_v14 = vld [vmem:[%s630_s0 + $0x18] sm:$0xff]  ;;  %v31_v16 = vld [vmem:[%s630_s0 + $0x28] sm:$0xff]  ;;  %v26_v38 = vld [vmem:[%s630_s0] sm:$0xff] }
   0x7   :  { %241 = vmatpush1.bf16.msra.mxu0 %v419_v3  ;;  %399 = vmatpush1.bf16.msra.mxu1 %v419_v3  ;;  %v35_v15 = vpack.c.bf16 %v29_v14, %v27_v13  ;;  %v33_v17 = vld [vmem:[%s630_s0 + $0x38] sm:$0xff]  ;;  %v435_v20 = vld [vmem:[%s629_s1 + $0x4] ss:$8 sps:$4 sm:$0xff]   ;;  %v437_v21 = vld [vmem:[%s629_s1] ss:$8 sps:$4 sm:$0xff]   ;;  %v322_v46 = vsub.s32 0, %v321_v45 }
   0x8   :  { %242 = vmatprep.subr.bf16.mxu0 %v420_v4  ;;  %384 = vmatprep.subr.bf16.mxu1 %v420_v4  ;;  %v37_v19 = vpack.c.bf16 %v33_v17, %v31_v16  ;;  %v438_v22 = vld [vmem:[%s629_s1 + $0xf4] ss:$8 sps:$4 sm:$0xff]   ;;  %v440_v23 = vld [vmem:[%s629_s1 + $0xf0] ss:$8 sps:$4 sm:$0xff]   ;;  %v441_v24 = vld [vmem:[%s629_s1 + $0xe4] ss:$8 sps:$4 sm:$0xff]  }
   0x9   :  { %270 = vmatprep.mubr.bf16.mxu0 %v35_v15  ;;  %v443_v25 = vld [vmem:[%s629_s1 + $0xe0] ss:$8 sps:$4 sm:$0xff]   ;;  %v444_v26 = vld [vmem:[%s629_s1 + $0xd4] ss:$8 sps:$4 sm:$0xff]   ;;  %v446_v27 = vld [vmem:[%s629_s1 + $0xd0] ss:$8 sps:$4 sm:$0xff]  }
   0xa   :  { %280 = vmatprep.mubr.bf16.mxu1 %v37_v19  ;;  %v447_v28 = vld [vmem:[%s629_s1 + $0xc4] ss:$8 sps:$4 sm:$0xff]   ;;  %v449_v29 = vld [vmem:[%s629_s1 + $0xc0] ss:$8 sps:$4 sm:$0xff]   ;;  %v450_v30 = vld [vmem:[%s629_s1 + $0xb4] ss:$8 sps:$4 sm:$0xff]  }
   0xb   :  { %243 = vmatpush1.bf16.msra.mxu0 %v422_v5  ;;  %400 = vmatpush1.bf16.msra.mxu1 %v422_v5  ;;  %v452_v31 = vld [vmem:[%s629_s1 + $0xb0] ss:$8 sps:$4 sm:$0xff]   ;;  %v453_v32 = vld [vmem:[%s629_s1 + $0xa4] ss:$8 sps:$4 sm:$0xff]   ;;  %v455_v33 = vld [vmem:[%s629_s1 + $0xa0] ss:$8 sps:$4 sm:$0xff]  }
   0xc   :  { %244 = vmatprep.subr.bf16.mxu0 %v423_v6  ;;  %385 = vmatprep.subr.bf16.mxu1 %v423_v6  ;;  %v456_v34 = vld [vmem:[%s629_s1 + $0x94] ss:$8 sps:$4 sm:$0xff]   ;;  %v458_v35 = vld [vmem:[%s629_s1 + $0x90] ss:$8 sps:$4 sm:$0xff]   ;;  %v459_v36 = vld [vmem:[%s629_s1 + $0x84] ss:$8 sps:$4 sm:$0xff]  }
   0xd   :  { %v461_v37 = vld [vmem:[%s629_s1 + $0x80] ss:$8 sps:$4 sm:$0xff]   ;;  %v28_v39 = vld [vmem:[%s630_s0 + $0x10] sm:$0xff]  ;;  %v326_v48 = vsub.s32 1, %v321_v45 }
   0xe   :  { %v30_v40 = vld [vmem:[%s630_s0 + $0x20] sm:$0xff]  ;;  %v32_v41 = vld [vmem:[%s630_s0 + $0x30] sm:$0xff]  ;;  %v34_v42 = vpack.c.bf16 %v28_v39, %v26_v38 }
   0xf   :  { %245 = vmatpush1.bf16.msra.mxu0 %v425_v7  ;;  %401 = vmatpush1.bf16.msra.mxu1 %v425_v7  ;;  %v36_v43 = vpack.c.bf16 %v32_v41, %v30_v40  ;;  %v318_v47 = vld [vmem:[%s631_s2] sm:$0x3] }
  0x10   :  { %246 = vmatprep.subr.bf16.mxu0 %v426_v8  ;;  %386 = vmatprep.subr.bf16.mxu1 %v426_v8  ;;  %v323_v49 = vrot.slane %v318_v47, %v322_v46  ;;  %v327_v50 = vrot.slane %v318_v47, %v326_v48 }
  0x13   :  { %247 = vmatpush1.bf16.msra.mxu0 %v428_v9  ;;  %402 = vmatpush1.bf16.msra.mxu1 %v428_v9 }
  0x14   :  { %248 = vmatprep.subr.bf16.mxu0 %v429_v10  ;;  %387 = vmatprep.subr.bf16.mxu1 %v429_v10 }
  0x17   :  { %249 = vmatpush1.bf16.msra.mxu0 %v431_v11  ;;  %403 = vmatpush1.bf16.msra.mxu1 %v431_v11 }
  0x18   :  { %250 = vmatprep.subr.bf16.mxu0 %v432_v12  ;;  %388 = vmatprep.subr.bf16.mxu1 %v432_v12 }
  0x1b   :  { %251 = vmatpush1.bf16.msra.mxu0 %v434_v18  ;;  %404 = vmatpush1.bf16.msra.mxu1 %v434_v18 }
  0x1c   :  { %252 = vmatprep.subr.bf16.mxu0 %v435_v20  ;;  %389 = vmatprep.subr.bf16.mxu1 %v435_v20 }
  0x1f   :  { %253 = vmatpush1.bf16.msra.mxu0 %v437_v21  ;;  %405 = vmatpush1.bf16.msra.mxu1 %v437_v21 }
  0x20   :  { %254 = vmatprep.subr.bf16.mxu0 %v438_v22  ;;  %390 = vmatprep.subr.bf16.mxu1 %v438_v22 }
  0x23   :  { %255 = vmatpush2.bf16.msra.mxu0 %v440_v23  ;;  %406 = vmatpush2.bf16.msra.mxu1 %v440_v23 }
  0x24   :  { %256 = vmatprep.subr.bf16.mxu0 %v441_v24  ;;  %391 = vmatprep.subr.bf16.mxu1 %v441_v24 }
  0x27   :  { %257 = vmatpush2.bf16.msra.mxu0 %v443_v25  ;;  %407 = vmatpush2.bf16.msra.mxu1 %v443_v25 }
  0x28   :  { %258 = vmatprep.subr.bf16.mxu0 %v444_v26  ;;  %392 = vmatprep.subr.bf16.mxu1 %v444_v26 }
  0x2b   :  { %259 = vmatpush2.bf16.msra.mxu0 %v446_v27  ;;  %408 = vmatpush2.bf16.msra.mxu1 %v446_v27 }
  0x2c   :  { %260 = vmatprep.subr.bf16.mxu0 %v447_v28  ;;  %393 = vmatprep.subr.bf16.mxu1 %v447_v28 }
  0x2f   :  { %261 = vmatpush2.bf16.msra.mxu0 %v449_v29  ;;  %409 = vmatpush2.bf16.msra.mxu1 %v449_v29 }
  0x30   :  { %262 = vmatprep.subr.bf16.mxu0 %v450_v30  ;;  %394 = vmatprep.subr.bf16.mxu1 %v450_v30 }
  0x33   :  { %263 = vmatpush2.bf16.msra.mxu0 %v452_v31  ;;  %410 = vmatpush2.bf16.msra.mxu1 %v452_v31 }
  0x34   :  { %264 = vmatprep.subr.bf16.mxu0 %v453_v32  ;;  %395 = vmatprep.subr.bf16.mxu1 %v453_v32 }
  0x37   :  { %265 = vmatpush2.bf16.msra.mxu0 %v455_v33  ;;  %411 = vmatpush2.bf16.msra.mxu1 %v455_v33 }
  0x38   :  { %266 = vmatprep.subr.bf16.mxu0 %v456_v34  ;;  %396 = vmatprep.subr.bf16.mxu1 %v456_v34 }
  0x3b   :  { %267 = vmatpush2.bf16.msra.mxu0 %v458_v35  ;;  %412 = vmatpush2.bf16.msra.mxu1 %v458_v35 }
  0x3c   :  { %268 = vmatprep.subr.bf16.mxu0 %v459_v36  ;;  %397 = vmatprep.subr.bf16.mxu1 %v459_v36 }
  0x3f   :  { %269 = vmatpush2.bf16.msra.mxu0 %v461_v37  ;;  %413 = vmatpush2.bf16.msra.mxu1 %v461_v37 }
  0x42   :  { %271 = vmatmul.mubr.bf16.vlgmr.msra.gmra.mxu0 %v34_v42  ;;  %281 = vmatmul.mubr.bf16.vlgmr.msra.gmra.mxu1 %v36_v43 }
 0x102   :  { %v272_v51 = vpop.f32.mrf.mxu0  ;;  %v282_v52 = vpop.f32.mrf.mxu1 }
 0x103   :  { %v330_v53 = vadd.f32 %v323_v49, %v272_v51  ;;  %v334_v54 = vadd.f32 %v323_v49, %v282_v52 }
 0x104   :  { %v274_v55 = vpop.f32.mrf.mxu0  ;;  %v284_v56 = vpop.f32.mrf.mxu1 }
 0x105   :  { %338 = vst [vmem:[%s632_s3] sm:$0xff] %v330_v53  ;;  %342 = vst [vmem:[%s632_s3 + $0x20] sm:$0xff] %v334_v54  ;;  %v331_v57 = vadd.f32 %v327_v50, %v274_v55  ;;  %v335_v58 = vadd.f32 %v327_v50, %v284_v56 }
 0x106   :  { %v276_v59 = vpop.f32.mrf.mxu0  ;;  %v286_v60 = vpop.f32.mrf.mxu1 }
 0x107   :  { %339 = vst [vmem:[%s632_s3 + $0x8] sm:$0xff] %v331_v57  ;;  %343 = vst [vmem:[%s632_s3 + $0x28] sm:$0xff] %v335_v58  ;;  %v332_v61 = vadd.f32 %v323_v49, %v276_v59  ;;  %v336_v62 = vadd.f32 %v323_v49, %v286_v60 }
 0x108   :  { %v278_v63 = vpop.f32.mrf.mxu0  ;;  %v288_v0 = vpop.f32.mrf.mxu1 }
 0x109   :  { %340 = vst [vmem:[%s632_s3 + $0x10] sm:$0xff] %v332_v61  ;;  %344 = vst [vmem:[%s632_s3 + $0x30] sm:$0xff] %v336_v62  ;;  %v333_v1 = vadd.f32 %v327_v50, %v278_v63  ;;  %v337_v2 = vadd.f32 %v327_v50, %v288_v0 }
 0x10b   :  { %341 = vst [vmem:[%s632_s3 + $0x18] sm:$0xff] %v333_v1  ;;  %345 = vst [vmem:[%s632_s3 + $0x38] sm:$0xff] %v337_v2 }

// kernel: transformer_forward.31
= control target key start
LH: loop header
LB: loop body
LE: loop exit
PB: predicated region body
PF: predicated region fallthrough
CT: control target
= control target key end

     0   :  { %s1108_s1 = inlined_call_operand.vmem [shape: bf16[256,512], index: 1, kind: input, shape index: {}]   ;;  %s1109_s0 = inlined_call_operand.vmem [shape: f32[32,256], index: 0, kind: input, shape index: {}]   ;;  %s1110_s2 = inlined_call_operand.vmem [shape: f32[1,512], index: 2, kind: input, shape index: {}]   ;;  %s1111_s3 = inlined_call_operand.vmem [shape: f32[32,512], index: 3, kind: output, shape index: {}]  }
   0x1   :  { %v725_v0 = vld [vmem:[%s1108_s1 + $0xe4] ss:$16 sps:$4 sm:$0xff]   ;;  %v727_v1 = vld [vmem:[%s1108_s1 + $0xec] ss:$16 sps:$4 sm:$0xff]   ;;  %v729_v2 = vld [vmem:[%s1108_s1 + $0xe0] ss:$16 sps:$4 sm:$0xff]  }
   0x2   :  { %446 = vmatprep.subr.bf16.mxu0 %v725_v0  ;;  %v730_v3 = vld [vmem:[%s1108_s1 + $0xe8] ss:$16 sps:$4 sm:$0xff]   ;;  %499 = vmatprep.subr.bf16.mxu1 %v727_v1  ;;  %v731_v4 = vld [vmem:[%s1108_s1 + $0xc4] ss:$16 sps:$4 sm:$0xff]   ;;  %v733_v5 = vld [vmem:[%s1108_s1 + $0xcc] ss:$16 sps:$4 sm:$0xff]  }
   0x3   :  { %447 = vmatpush1.bf16.msra.mxu0 %v729_v2  ;;  %500 = vmatpush1.bf16.msra.mxu1 %v730_v3  ;;  %v735_v6 = vld [vmem:[%s1108_s1 + $0xc0] ss:$16 sps:$4 sm:$0xff]   ;;  %v736_v7 = vld [vmem:[%s1108_s1 + $0xc8] ss:$16 sps:$4 sm:$0xff]   ;;  %v737_v8 = vld [vmem:[%s1108_s1 + $0xa4] ss:$16 sps:$4 sm:$0xff]  }
   0x4   :  { %448 = vmatprep.subr.bf16.mxu0 %v731_v4  ;;  %501 = vmatprep.subr.bf16.mxu1 %v733_v5  ;;  %v739_v9 = vld [vmem:[%s1108_s1 + $0xac] ss:$16 sps:$4 sm:$0xff]   ;;  %v741_v10 = vld [vmem:[%s1108_s1 + $0xa0] ss:$16 sps:$4 sm:$0xff]   ;;  %v742_v11 = vld [vmem:[%s1108_s1 + $0xa8] ss:$16 sps:$4 sm:$0xff]  }
   0x5   :  { %v743_v12 = vld [vmem:[%s1108_s1 + $0x84] ss:$16 sps:$4 sm:$0xff]   ;;  %v745_v13 = vld [vmem:[%s1108_s1 + $0x8c] ss:$16 sps:$4 sm:$0xff]   ;;  %v747_v14 = vld [vmem:[%s1108_s1 + $0x80] ss:$16 sps:$4 sm:$0xff]  }
   0x6   :  { %v748_v15 = vld [vmem:[%s1108_s1 + $0x88] ss:$16 sps:$4 sm:$0xff]   ;;  %v749_v16 = vld [vmem:[%s1108_s1 + $0x64] ss:$16 sps:$4 sm:$0xff]   ;;  %v751_v17 = vld [vmem:[%s1108_s1 + $0x6c] ss:$16 sps:$4 sm:$0xff]  }
   0x7   :  { %449 = vmatpush1.bf16.msra.mxu0 %v735_v6  ;;  %502 = vmatpush1.bf16.msra.mxu1 %v736_v7  ;;  %v753_v18 = vld [vmem:[%s1108_s1 + $0x60] ss:$16 sps:$4 sm:$0xff]   ;;  %v754_v19 = vld [vmem:[%s1108_s1 + $0x68] ss:$16 sps:$4 sm:$0xff]   ;;  %v755_v20 = vld [vmem:[%s1108_s1 + $0x44] ss:$16 sps:$4 sm:$0xff]  }
   0x8   :  { %450 = vmatprep.subr.bf16.mxu0 %v737_v8  ;;  %503 = vmatprep.subr.bf16.mxu1 %v739_v9  ;;  %v757_v21 = vld [vmem:[%s1108_s1 + $0x4c] ss:$16 sps:$4 sm:$0xff]   ;;  %v759_v22 = vld [vmem:[%s1108_s1 + $0x40] ss:$16 sps:$4 sm:$0xff]   ;;  %v760_v23 = vld [vmem:[%s1108_s1 + $0x48] ss:$16 sps:$4 sm:$0xff]  }
   0x9   :  { %v761_v24 = vld [vmem:[%s1108_s1 + $0x24] ss:$16 sps:$4 sm:$0xff]   ;;  %v763_v25 = vld [vmem:[%s1108_s1 + $0x2c] ss:$16 sps:$4 sm:$0xff]   ;;  %v765_v26 = vld [vmem:[%s1108_s1 + $0x20] ss:$16 sps:$4 sm:$0xff]  }
   0xa   :  { %v766_v27 = vld [vmem:[%s1108_s1 + $0x28] ss:$16 sps:$4 sm:$0xff]   ;;  %v767_v28 = vld [vmem:[%s1108_s1 + $0x4] ss:$16 sps:$4 sm:$0xff]   ;;  %v769_v29 = vld [vmem:[%s1108_s1 + $0xc] ss:$16 sps:$4 sm:$0xff]  }
   0xb   :  { %451 = vmatpush1.bf16.msra.mxu0 %v741_v10  ;;  %504 = vmatpush1.bf16.msra.mxu1 %v742_v11  ;;  %v771_v30 = vld [vmem:[%s1108_s1] ss:$16 sps:$4 sm:$0xff]   ;;  %v772_v31 = vld [vmem:[%s1108_s1 + $0x8] ss:$16 sps:$4 sm:$0xff]   ;;  %v773_v32 = vld [vmem:[%s1108_s1 + $0x1e4] ss:$16 sps:$4 sm:$0xff]  }
   0xc   :  { %452 = vmatprep.subr.bf16.mxu0 %v743_v12  ;;  %505 = vmatprep.subr.bf16.mxu1 %v745_v13  ;;  %v775_v33 = vld [vmem:[%s1108_s1 + $0x1ec] ss:$16 sps:$4 sm:$0xff]   ;;  %v777_v34 = vld [vmem:[%s1108_s1 + $0x1e0] ss:$16 sps:$4 sm:$0xff]   ;;  %v778_v35 = vld [vmem:[%s1108_s1 + $0x1e8] ss:$16 sps:$4 sm:$0xff]   ;;  %v605_v12 = vlaneseq }
   0xd   :  { %v779_v36 = vld [vmem:[%s1108_s1 + $0x1c4] ss:$16 sps:$4 sm:$0xff]   ;;  %v781_v37 = vld [vmem:[%s1108_s1 + $0x1cc] ss:$16 sps:$4 sm:$0xff]   ;;  %v783_v38 = vld [vmem:[%s1108_s1 + $0x1c0] ss:$16 sps:$4 sm:$0xff]  }
   0xe   :  { %v784_v39 = vld [vmem:[%s1108_s1 + $0x1c8] ss:$16 sps:$4 sm:$0xff]   ;;  %v785_v40 = vld [vmem:[%s1108_s1 + $0x1a4] ss:$16 sps:$4 sm:$0xff]   ;;  %v787_v41 = vld [vmem:[%s1108_s1 + $0x1ac] ss:$16 sps:$4 sm:$0xff]  }
   0xf   :  { %453 = vmatpush1.bf16.msra.mxu0 %v747_v14  ;;  %506 = vmatpush1.bf16.msra.mxu1 %v748_v15  ;;  %v789_v42 = vld [vmem:[%s1108_s1 + $0x1a0] ss:$16 sps:$4 sm:$0xff]   ;;  %v790_v43 = vld [vmem:[%s1108_s1 + $0x1a8] ss:$16 sps:$4 sm:$0xff]   ;;  %v791_v44 = vld [vmem:[%s1108_s1 + $0x184] ss:$16 sps:$4 sm:$0xff]  }
  0x10   :  { %454 = vmatprep.subr.bf16.mxu0 %v749_v16  ;;  %507 = vmatprep.subr.bf16.mxu1 %v751_v17  ;;  %v793_v45 = vld [vmem:[%s1108_s1 + $0x18c] ss:$16 sps:$4 sm:$0xff]   ;;  %v795_v48 = vld [vmem:[%s1108_s1 + $0x180] ss:$16 sps:$4 sm:$0xff]   ;;  %v796_v49 = vld [vmem:[%s1108_s1 + $0x188] ss:$16 sps:$4 sm:$0xff]  }
  0x11   :  { %v35_v46 = vld [vmem:[%s1109_s0 + $0x8] sm:$0xff]  ;;  %v37_v47 = vld [vmem:[%s1109_s0 + $0x18] sm:$0xff]  ;;  %v797_v51 = vld [vmem:[%s1108_s1 + $0x164] ss:$16 sps:$4 sm:$0xff]   ;;  %v606_v13 = vshrl.u32 %v605_v12, 7 }
  0x12   :  { %v43_v50 = vpack.c.bf16 %v37_v47, %v35_v46  ;;  %v799_v52 = vld [vmem:[%s1108_s1 + $0x16c] ss:$16 sps:$4 sm:$0xff]   ;;  %v801_v53 = vld [vmem:[%s1108_s1 + $0x160] ss:$16 sps:$4 sm:$0xff]   ;;  %v802_v54 = vld [vmem:[%s1108_s1 + $0x168] ss:$16 sps:$4 sm:$0xff]  }
  0x13   :  { %455 = vmatpush1.bf16.msra.mxu0 %v753_v18  ;;  %508 = vmatpush1.bf16.msra.mxu1 %v754_v19  ;;  %v803_v55 = vld [vmem:[%s1108_s1 + $0x144] ss:$16 sps:$4 sm:$0xff]   ;;  %v805_v56 = vld [vmem:[%s1108_s1 + $0x14c] ss:$16 sps:$4 sm:$0xff]   ;;  %v807_v57 = vld [vmem:[%s1108_s1 + $0x140] ss:$16 sps:$4 sm:$0xff]  }
  0x14   :  { %456 = vmatprep.subr.bf16.mxu0 %v755_v20  ;;  %509 = vmatprep.subr.bf16.mxu1 %v757_v21  ;;  %v808_v58 = vld [vmem:[%s1108_s1 + $0x148] ss:$16 sps:$4 sm:$0xff]   ;;  %v809_v59 = vld [vmem:[%s1108_s1 + $0x124] ss:$16 sps:$4 sm:$0xff]   ;;  %v811_v60 = vld [vmem:[%s1108_s1 + $0x12c] ss:$16 sps:$4 sm:$0xff]  }
  0x15   :  { %478 = vmatprep.mubr.bf16.mxu0 %v43_v50  ;;  %531 = vmatprep.mubr.bf16.mxu1 %v43_v50  ;;  %v813_v61 = vld [vmem:[%s1108_s1 + $0x120] ss:$16 sps:$4 sm:$0xff]   ;;  %v814_v62 = vld [vmem:[%s1108_s1 + $0x128] ss:$16 sps:$4 sm:$0xff]   ;;  %v815_v63 = vld [vmem:[%s1108_s1 + $0x104] ss:$16 sps:$4 sm:$0xff]  }
  0x16   :  { %v817_v0 = vld [vmem:[%s1108_s1 + $0x10c] ss:$16 sps:$4 sm:$0xff]   ;;  %v819_v1 = vld [vmem:[%s1108_s1 + $0x100] ss:$16 sps:$4 sm:$0xff]   ;;  %v820_v2 = vld [vmem:[%s1108_s1 + $0x108] ss:$16 sps:$4 sm:$0xff]  }
  0x17   :  { %457 = vmatpush1.bf16.msra.mxu0 %v759_v22  ;;  %510 = vmatpush1.bf16.msra.mxu1 %v760_v23  ;;  %v34_v3 = vld [vmem:[%s1109_s0] sm:$0xff]  ;;  %v36_v4 = vld [vmem:[%s1109_s0 + $0x10] sm:$0xff]  ;;  %v39_v5 = vld [vmem:[%s1109_s0 + $0x28] sm:$0xff]  ;;  %v607_v14 = vsub.s32 0, %v606_v13  ;;  %v615_v15 = vsub.s32 2, %v606_v13  ;;  %v611_v17 = vsub.s32 1, %v606_v13 }
  0x18   :  { %458 = vmatprep.subr.bf16.mxu0 %v761_v24  ;;  %511 = vmatprep.subr.bf16.mxu1 %v763_v25  ;;  %v41_v6 = vld [vmem:[%s1109_s0 + $0x38] sm:$0xff]  ;;  %v42_v7 = vpack.c.bf16 %v36_v4, %v34_v3  ;;  %v38_v9 = vld [vmem:[%s1109_s0 + $0x20] sm:$0xff]  ;;  %v40_v10 = vld [vmem:[%s1109_s0 + $0x30] sm:$0xff]  ;;  %v619_v18 = vsub.s32 3, %v606_v13 }
  0x19   :  { %v45_v8 = vpack.c.bf16 %v41_v6, %v39_v5  ;;  %v44_v11 = vpack.c.bf16 %v40_v10, %v38_v9  ;;  %v603_v16 = vld [vmem:[%s1110_s2] sm:$0xf] }
  0x1a   :  { %v608_v19 = vrot.slane %v603_v16, %v607_v14  ;;  %v616_v20 = vrot.slane %v603_v16, %v615_v15  ;;  %v612_v21 = vrot.slane %v603_v16, %v611_v17  ;;  %v620_v22 = vrot.slane %v603_v16, %v619_v18 }
  0x1b   :  { %459 = vmatpush1.bf16.msra.mxu0 %v765_v26  ;;  %512 = vmatpush1.bf16.msra.mxu1 %v766_v27 }
  0x1c   :  { %460 = vmatprep.subr.bf16.mxu0 %v767_v28  ;;  %513 = vmatprep.subr.bf16.mxu1 %v769_v29 }
  0x1f   :  { %461 = vmatpush1.bf16.msra.mxu0 %v771_v30  ;;  %514 = vmatpush1.bf16.msra.mxu1 %v772_v31 }
  0x20   :  { %462 = vmatprep.subr.bf16.mxu0 %v773_v32  ;;  %515 = vmatprep.subr.bf16.mxu1 %v775_v33 }
  0x23   :  { %463 = vmatpush2.bf16.msra.mxu0 %v777_v34  ;;  %516 = vmatpush2.bf16.msra.mxu1 %v778_v35 }
  0x24   :  { %464 = vmatprep.subr.bf16.mxu0 %v779_v36  ;;  %517 = vmatprep.subr.bf16.mxu1 %v781_v37 }
  0x27   :  { %465 = vmatpush2.bf16.msra.mxu0 %v783_v38  ;;  %518 = vmatpush2.bf16.msra.mxu1 %v784_v39 }
  0x28   :  { %466 = vmatprep.subr.bf16.mxu0 %v785_v40  ;;  %519 = vmatprep.subr.bf16.mxu1 %v787_v41 }
  0x2b   :  { %467 = vmatpush2.bf16.msra.mxu0 %v789_v42  ;;  %520 = vmatpush2.bf16.msra.mxu1 %v790_v43 }
  0x2c   :  { %468 = vmatprep.subr.bf16.mxu0 %v791_v44  ;;  %521 = vmatprep.subr.bf16.mxu1 %v793_v45 }
  0x2f   :  { %469 = vmatpush2.bf16.msra.mxu0 %v795_v48  ;;  %522 = vmatpush2.bf16.msra.mxu1 %v796_v49 }
  0x30   :  { %470 = vmatprep.subr.bf16.mxu0 %v797_v51  ;;  %523 = vmatprep.subr.bf16.mxu1 %v799_v52 }
  0x33   :  { %471 = vmatpush2.bf16.msra.mxu0 %v801_v53  ;;  %524 = vmatpush2.bf16.msra.mxu1 %v802_v54 }
  0x34   :  { %472 = vmatprep.subr.bf16.mxu0 %v803_v55  ;;  %525 = vmatprep.subr.bf16.mxu1 %v805_v56 }
  0x37   :  { %473 = vmatpush2.bf16.msra.mxu0 %v807_v57  ;;  %526 = vmatpush2.bf16.msra.mxu1 %v808_v58 }
  0x38   :  { %474 = vmatprep.subr.bf16.mxu0 %v809_v59  ;;  %527 = vmatprep.subr.bf16.mxu1 %v811_v60 }
  0x3b   :  { %475 = vmatpush2.bf16.msra.mxu0 %v813_v61  ;;  %528 = vmatpush2.bf16.msra.mxu1 %v814_v62 }
  0x3c   :  { %476 = vmatprep.subr.bf16.mxu0 %v815_v63  ;;  %529 = vmatprep.subr.bf16.mxu1 %v817_v0 }
  0x3f   :  { %477 = vmatpush2.bf16.msra.mxu0 %v819_v1  ;;  %530 = vmatpush2.bf16.msra.mxu1 %v820_v2 }
  0x42   :  { %479 = vmatmul.mubr.bf16.vlgmr.msra.gmra.mxu0 %v42_v7  ;;  %532 = vmatmul.mubr.bf16.vlgmr.msra.gmra.mxu1 %v42_v7 }
  0x43   :  { %488 = vmatprep.mubr.bf16.mxu0 %v45_v8  ;;  %541 = vmatprep.mubr.bf16.mxu1 %v45_v8 }
  0x4a   :  { %489 = vmatmul.mubr.bf16.gmra.mxu0 %v44_v11  ;;  %542 = vmatmul.mubr.bf16.gmra.mxu1 %v44_v11 }
 0x102   :  { %v480_v23 = vpop.f32.mrf.mxu0  ;;  %v533_v24 = vpop.f32.mrf.mxu1 }
 0x103   :  { %v625_v25 = vadd.f32 %v608_v19, %v480_v23  ;;  %v627_v26 = vadd.f32 %v616_v20, %v533_v24 }
 0x104   :  { %v482_v27 = vpop.f32.mrf.mxu0  ;;  %v535_v28 = vpop.f32.mrf.mxu1 }
 0x105   :  { %641 = vst [vmem:[%s1111_s3] sm:$0xff] %v625_v25  ;;  %643 = vst [vmem:[%s1111_s3 + $0x10] sm:$0xff] %v627_v26  ;;  %v626_v29 = vadd.f32 %v612_v21, %v482_v27  ;;  %v628_v30 = vadd.f32 %v620_v22, %v535_v28 }
 0x106   :  { %v484_v31 = vpop.f32.mrf.mxu0  ;;  %v537_v32 = vpop.f32.mrf.mxu1 }
 0x107   :  { %642 = vst [vmem:[%s1111_s3 + $0x8] sm:$0xff] %v626_v29  ;;  %644 = vst [vmem:[%s1111_s3 + $0x18] sm:$0xff] %v628_v30  ;;  %v629_v33 = vadd.f32 %v608_v19, %v484_v31  ;;  %v631_v34 = vadd.f32 %v616_v20, %v537_v32 }
 0x108   :  { %v486_v35 = vpop.f32.mrf.mxu0  ;;  %v539_v36 = vpop.f32.mrf.mxu1 }
 0x109   :  { %645 = vst [vmem:[%s1111_s3 + $0x20] sm:$0xff] %v629_v33  ;;  %647 = vst [vmem:[%s1111_s3 + $0x30] sm:$0xff] %v631_v34  ;;  %v630_v37 = vadd.f32 %v612_v21, %v486_v35  ;;  %v632_v38 = vadd.f32 %v620_v22, %v539_v36 }
 0x10a   :  { %v490_v39 = vpop.f32.mrf.mxu0  ;;  %v543_v40 = vpop.f32.mrf.mxu1 }
 0x10b   :  { %646 = vst [vmem:[%s1111_s3 + $0x28] sm:$0xff] %v630_v37  ;;  %648 = vst [vmem:[%s1111_s3 + $0x38] sm:$0xff] %v632_v38  ;;  %v633_v41 = vadd.f32 %v608_v19, %v490_v39  ;;  %v635_v42 = vadd.f32 %v616_v20, %v543_v40 }
 0x10c   :  { %v492_v43 = vpop.f32.mrf.mxu0  ;;  %v545_v44 = vpop.f32.mrf.mxu1 }
 0x10d   :  { %649 = vst [vmem:[%s1111_s3 + $0x40] sm:$0xff] %v633_v41  ;;  %651 = vst [vmem:[%s1111_s3 + $0x50] sm:$0xff] %v635_v42  ;;  %v634_v45 = vadd.f32 %v612_v21, %v492_v43  ;;  %v636_v46 = vadd.f32 %v620_v22, %v545_v44 }
 0x10e   :  { %v494_v47 = vpop.f32.mrf.mxu0  ;;  %v547_v48 = vpop.f32.mrf.mxu1 }
 0x10f   :  { %650 = vst [vmem:[%s1111_s3 + $0x48] sm:$0xff] %v634_v45  ;;  %652 = vst [vmem:[%s1111_s3 + $0x58] sm:$0xff] %v636_v46  ;;  %v637_v49 = vadd.f32 %v608_v19, %v494_v47  ;;  %v639_v50 = vadd.f32 %v616_v20, %v547_v48 }
 0x110   :  { %v496_v51 = vpop.f32.mrf.mxu0  ;;  %v549_v52 = vpop.f32.mrf.mxu1 }
 0x111   :  { %653 = vst [vmem:[%s1111_s3 + $0x60] sm:$0xff] %v637_v49  ;;  %655 = vst [vmem:[%s1111_s3 + $0x70] sm:$0xff] %v639_v50  ;;  %v638_v53 = vadd.f32 %v612_v21, %v496_v51  ;;  %v640_v54 = vadd.f32 %v620_v22, %v549_v52 }
 0x113   :  { %654 = vst [vmem:[%s1111_s3 + $0x68] sm:$0xff] %v638_v53  ;;  %656 = vst [vmem:[%s1111_s3 + $0x78] sm:$0xff] %v640_v54 }

// kernel: transformer_forward.35
= control target key start
LH: loop header
LB: loop body
LE: loop exit
PB: predicated region body
PF: predicated region fallthrough
CT: control target
= control target key end

     0   :  { %s1503_s12 = smov 0   ;;  %s1505_s13 = smov 0   ;;  %s1839_s0 = inlined_call_operand.vmem [shape: f32[32,256], index: 0, kind: input, shape index: {}]   ;;  %s1840_s1 = inlined_call_operand.vmem [shape: bf16[256,2048], index: 1, kind: input, shape index: {}]   ;;  %s1841_s2 = inlined_call_operand.vmem [shape: f32[1,2048], index: 2, kind: input, shape index: {}]   ;;  %s1842_s3 = inlined_call_operand.vmem [shape: f32[32,2048], index: 3, kind: output, shape index: {}]  }
   0x1   :  { %s1507_s14 = smov 0   ;;  %s1509_s15 = smov 0  }
   0x2   :  { %s1511_s16 = smov 0  }
   0x3 LB: > { %s28_s17 = sadd.s32 1, %s1477_s15  ;;  %s1224_s18 = sadd.s32 4294967295, %s1481_s16   ;;  %s1481_s16 = sphi %s1511_s16, %s13_s16   ;;  %s1477_s15 = sphi %s1509_s15, %s1847_s15   ;;  %s1473_s14 = sphi %s1507_s14, %s1846_s14   ;;  %s1469_s13 = sphi %s1505_s13, %s1845_s13   ;;  %s1465_s12 = sphi %s1503_s12, %s1844_s12  }
   0x4   : > { %p30_p0 = scmp.ge.s32.totalorder %s28_s17, 4  ;;  %p76_p1 = scmp.ne.s32.totalorder %s1469_s13, %s1465_s12 }
   0x5   : > { %p77_p2 = scmp.eq.s32.totalorder %s1481_s16, 0  ;;  %p134_p4 = scmp.eq.s32.totalorder %s1224_s18, 3 }
   0x6   : > { %s1849_s17 = smov (%p30_p0, %s28_s17), 0  ;;  %s69_s20 = sadd.s32 1, %s1469_s13 }
   0x7   : > { %p78_p3 = por %p77_p2, %p76_p1  ;;  %s65_s19 = ssub.s32 %s1477_s15, %s1849_s17 }
   0x8   : > { %p67_p5 = scmp.eq.s32.totalorder %s65_s19, 0  ;;  %p1538_p6 = por %p134_p4, %p76_p1 }
   0x9   : > { %p1228_p7 = scmp.ge.s32.totalorder %s1481_s16, 4 }
   0xa   : > { %s1543_s22 = scalar_select %p67_p5, %s1469_s13, %s69_s20  }
   0xb   : > { %171 = sbr.rel (%p1228_p7) target bundleno = 52 (0x34), region = 20 }
  0x10   : > { %174 = sbr.rel (!%p78_p3) target bundleno = 52 (0x34), region = 24  ;;  %s176_s23 = sand.u32 (%p78_p3), 1, %s1469_s13  }
  0x11   : > { %s1305_s24 = sshll.u32 (%p78_p3), %s1477_s15, 4  ;;  %s1229_s25 = sshll.u32 (%p78_p3), %s176_s23, 9 }
  0x12   : > { %s1551_s28 = scalar_lea.vmem (%p78_p3), %s1840_s1, %s1305_s24  ;;  %s1556_s29 = scalar_lea.vmem (%p78_p3), [#allocation3], %s1229_s25 }
  0x13   : > { %v197_v0 = vld [vmem:[%s1551_s28] sm:$0xff] (%p78_p3)  ;;  %v199_v1 = vld [vmem:[%s1551_s28 + $0x8] sm:$0xff] (%p78_p3) }
  0x14   : > { %v201_v2 = vld [vmem:[%s1551_s28 + $0x40] sm:$0xff] (%p78_p3)  ;;  %198 = vst [vmem:[%s1556_s29] sm:$0xff] (%p78_p3), %v197_v0  ;;  %200 = vst [vmem:[%s1556_s29 + $0x8] sm:$0xff] (%p78_p3), %v199_v1  ;;  %v203_v3 = vld [vmem:[%s1551_s28 + $0x48] sm:$0xff] (%p78_p3) }
  0x15   : > { %202 = vst [vmem:[%s1556_s29 + $0x10] sm:$0xff] %v201_v2  ;;  %v205_v4 = vld [vmem:[%s1551_s28 + $0x80] sm:$0xff]  ;;  %v207_v5 = vld [vmem:[%s1551_s28 + $0x88] sm:$0xff]  ;;  %204 = vst [vmem:[%s1556_s29 + $0x18] sm:$0xff] %v203_v3 }
  0x16   : > { %206 = vst [vmem:[%s1556_s29 + $0x20] sm:$0xff] %v205_v4  ;;  %208 = vst [vmem:[%s1556_s29 + $0x28] sm:$0xff] %v207_v5  ;;  %v209_v6 = vld [vmem:[%s1551_s28 + $0xc0] sm:$0xff]  ;;  %v211_v7 = vld [vmem:[%s1551_s28 + $0xc8] sm:$0xff] }
  0x17   : > { %v213_v8 = vld [vmem:[%s1551_s28 + $0x100] sm:$0xff]  ;;  %210 = vst [vmem:[%s1556_s29 + $0x30] sm:$0xff] %v209_v6  ;;  %212 = vst [vmem:[%s1556_s29 + $0x38] sm:$0xff] %v211_v7  ;;  %v215_v9 = vld [vmem:[%s1551_s28 + $0x108] sm:$0xff] }
  0x18   : > { %214 = vst [vmem:[%s1556_s29 + $0x40] sm:$0xff] %v213_v8  ;;  %v217_v10 = vld [vmem:[%s1551_s28 + $0x140] sm:$0xff]  ;;  %v219_v11 = vld [vmem:[%s1551_s28 + $0x148] sm:$0xff]  ;;  %216 = vst [vmem:[%s1556_s29 + $0x48] sm:$0xff] %v215_v9 }
  0x19   : > { %218 = vst [vmem:[%s1556_s29 + $0x50] sm:$0xff] %v217_v10  ;;  %220 = vst [vmem:[%s1556_s29 + $0x58] sm:$0xff] %v219_v11  ;;  %v221_v12 = vld [vmem:[%s1551_s28 + $0x180] sm:$0xff]  ;;  %v223_v13 = vld [vmem:[%s1551_s28 + $0x188] sm:$0xff] }
  0x1a   : > { %v225_v14 = vld [vmem:[%s1551_s28 + $0x1c0] sm:$0xff]  ;;  %222 = vst [vmem:[%s1556_s29 + $0x60] sm:$0xff] %v221_v12  ;;  %224 = vst [vmem:[%s1556_s29 + $0x68] sm:$0xff] %v223_v13  ;;  %v227_v15 = vld [vmem:[%s1551_s28 + $0x1c8] sm:$0xff] }
  0x1b   : > { %226 = vst [vmem:[%s1556_s29 + $0x70] sm:$0xff] %v225_v14  ;;  %v229_v16 = vld [vmem:[%s1551_s28 + $0x200] sm:$0xff]  ;;  %v231_v17 = vld [vmem:[%s1551_s28 + $0x208] sm:$0xff]  ;;  %228 = vst [vmem:[%s1556_s29 + $0x78] sm:$0xff] %v227_v15 }
  0x1c   : > { %230 = vst [vmem:[%s1556_s29 + $0x80] sm:$0xff] %v229_v16  ;;  %232 = vst [vmem:[%s1556_s29 + $0x88] sm:$0xff] %v231_v17  ;;  %v233_v18 = vld [vmem:[%s1551_s28 + $0x240] sm:$0xff]  ;;  %v235_v19 = vld [vmem:[%s1551_s28 + $0x248] sm:$0xff] }
  0x1d   : > { %v237_v20 = vld [vmem:[%s1551_s28 + $0x280] sm:$0xff]  ;;  %234 = vst [vmem:[%s1556_s29 + $0x90] sm:$0xff] %v233_v18  ;;  %236 = vst [vmem:[%s1556_s29 + $0x98] sm:$0xff] %v235_v19  ;;  %v239_v21 = vld [vmem:[%s1551_s28 + $0x288] sm:$0xff] }
  0x1e   : > { %238 = vst [vmem:[%s1556_s29 + $0xa0] sm:$0xff] %v237_v20  ;;  %v241_v22 = vld [vmem:[%s1551_s28 + $0x2c0] sm:$0xff]  ;;  %v243_v23 = vld [vmem:[%s1551_s28 + $0x2c8] sm:$0xff]  ;;  %240 = vst [vmem:[%s1556_s29 + $0xa8] sm:$0xff] %v239_v21 }
  0x1f   : > { %242 = vst [vmem:[%s1556_s29 + $0xb0] sm:$0xff] %v241_v22  ;;  %244 = vst [vmem:[%s1556_s29 + $0xb8] sm:$0xff] %v243_v23  ;;  %v245_v24 = vld [vmem:[%s1551_s28 + $0x300] sm:$0xff]  ;;  %v247_v25 = vld [vmem:[%s1551_s28 + $0x308] sm:$0xff] }
  0x20   : > { %v249_v26 = vld [vmem:[%s1551_s28 + $0x340] sm:$0xff]  ;;  %246 = vst [vmem:[%s1556_s29 + $0xc0] sm:$0xff] %v245_v24  ;;  %248 = vst [vmem:[%s1556_s29 + $0xc8] sm:$0xff] %v247_v25  ;;  %v251_v27 = vld [vmem:[%s1551_s28 + $0x348] sm:$0xff] }
  0x21   : > { %250 = vst [vmem:[%s1556_s29 + $0xd0] sm:$0xff] %v249_v26  ;;  %v253_v28 = vld [vmem:[%s1551_s28 + $0x380] sm:$0xff]  ;;  %v255_v29 = vld [vmem:[%s1551_s28 + $0x388] sm:$0xff]  ;;  %252 = vst [vmem:[%s1556_s29 + $0xd8] sm:$0xff] %v251_v27 }
  0x22   : > { %254 = vst [vmem:[%s1556_s29 + $0xe0] sm:$0xff] %v253_v28  ;;  %256 = vst [vmem:[%s1556_s29 + $0xe8] sm:$0xff] %v255_v29  ;;  %v257_v30 = vld [vmem:[%s1551_s28 + $0x3c0] sm:$0xff]  ;;  %v259_v31 = vld [vmem:[%s1551_s28 + $0x3c8] sm:$0xff] }
  0x23   : > { %v261_v32 = vld [vmem:[%s1551_s28 + $0x400] sm:$0xff]  ;;  %258 = vst [vmem:[%s1556_s29 + $0xf0] sm:$0xff] %v257_v30  ;;  %260 = vst [vmem:[%s1556_s29 + $0xf8] sm:$0xff] %v259_v31  ;;  %v263_v33 = vld [vmem:[%s1551_s28 + $0x408] sm:$0xff] }
  0x24   : > { %262 = vst [vmem:[%s1556_s29 + $0x100] sm:$0xff] %v261_v32  ;;  %v265_v34 = vld [vmem:[%s1551_s28 + $0x440] sm:$0xff]  ;;  %v267_v35 = vld [vmem:[%s1551_s28 + $0x448] sm:$0xff]  ;;  %264 = vst [vmem:[%s1556_s29 + $0x108] sm:$0xff] %v263_v33 }
  0x25   : > { %266 = vst [vmem:[%s1556_s29 + $0x110] sm:$0xff] %v265_v34  ;;  %268 = vst [vmem:[%s1556_s29 + $0x118] sm:$0xff] %v267_v35  ;;  %v269_v36 = vld [vmem:[%s1551_s28 + $0x480] sm:$0xff]  ;;  %v271_v37 = vld [vmem:[%s1551_s28 + $0x488] sm:$0xff] }
  0x26   : > { %v273_v38 = vld [vmem:[%s1551_s28 + $0x4c0] sm:$0xff]  ;;  %270 = vst [vmem:[%s1556_s29 + $0x120] sm:$0xff] %v269_v36  ;;  %272 = vst [vmem:[%s1556_s29 + $0x128] sm:$0xff] %v271_v37  ;;  %v275_v39 = vld [vmem:[%s1551_s28 + $0x4c8] sm:$0xff] }
  0x27   : > { %274 = vst [vmem:[%s1556_s29 + $0x130] sm:$0xff] %v273_v38  ;;  %v277_v40 = vld [vmem:[%s1551_s28 + $0x500] sm:$0xff]  ;;  %v279_v41 = vld [vmem:[%s1551_s28 + $0x508] sm:$0xff]  ;;  %276 = vst [vmem:[%s1556_s29 + $0x138] sm:$0xff] %v275_v39 }
  0x28   : > { %278 = vst [vmem:[%s1556_s29 + $0x140] sm:$0xff] %v277_v40  ;;  %280 = vst [vmem:[%s1556_s29 + $0x148] sm:$0xff] %v279_v41  ;;  %v281_v42 = vld [vmem:[%s1551_s28 + $0x540] sm:$0xff]  ;;  %v283_v43 = vld [vmem:[%s1551_s28 + $0x548] sm:$0xff] }
  0x29   : > { %v285_v44 = vld [vmem:[%s1551_s28 + $0x580] sm:$0xff]  ;;  %282 = vst [vmem:[%s1556_s29 + $0x150] sm:$0xff] %v281_v42  ;;  %284 = vst [vmem:[%s1556_s29 + $0x158] sm:$0xff] %v283_v43  ;;  %v287_v45 = vld [vmem:[%s1551_s28 + $0x588] sm:$0xff] }
  0x2a   : > { %286 = vst [vmem:[%s1556_s29 + $0x160] sm:$0xff] %v285_v44  ;;  %v289_v46 = vld [vmem:[%s1551_s28 + $0x5c0] sm:$0xff]  ;;  %v291_v47 = vld [vmem:[%s1551_s28 + $0x5c8] sm:$0xff]  ;;  %288 = vst [vmem:[%s1556_s29 + $0x168] sm:$0xff] %v287_v45 }
  0x2b   : > { %290 = vst [vmem:[%s1556_s29 + $0x170] sm:$0xff] %v289_v46  ;;  %292 = vst [vmem:[%s1556_s29 + $0x178] sm:$0xff] %v291_v47  ;;  %v293_v48 = vld [vmem:[%s1551_s28 + $0x600] sm:$0xff]  ;;  %v295_v49 = vld [vmem:[%s1551_s28 + $0x608] sm:$0xff] }
  0x2c   : > { %v297_v50 = vld [vmem:[%s1551_s28 + $0x640] sm:$0xff]  ;;  %294 = vst [vmem:[%s1556_s29 + $0x180] sm:$0xff] %v293_v48  ;;  %296 = vst [vmem:[%s1556_s29 + $0x188] sm:$0xff] %v295_v49  ;;  %v299_v51 = vld [vmem:[%s1551_s28 + $0x648] sm:$0xff] }
  0x2d   : > { %298 = vst [vmem:[%s1556_s29 + $0x190] sm:$0xff] %v297_v50  ;;  %v301_v52 = vld [vmem:[%s1551_s28 + $0x680] sm:$0xff]  ;;  %v303_v53 = vld [vmem:[%s1551_s28 + $0x688] sm:$0xff]  ;;  %300 = vst [vmem:[%s1556_s29 + $0x198] sm:$0xff] %v299_v51 }
  0x2e   : > { %302 = vst [vmem:[%s1556_s29 + $0x1a0] sm:$0xff] %v301_v52  ;;  %304 = vst [vmem:[%s1556_s29 + $0x1a8] sm:$0xff] %v303_v53  ;;  %v305_v54 = vld [vmem:[%s1551_s28 + $0x6c0] sm:$0xff]  ;;  %v307_v55 = vld [vmem:[%s1551_s28 + $0x6c8] sm:$0xff] }
  0x2f   : > { %v309_v56 = vld [vmem:[%s1551_s28 + $0x700] sm:$0xff]  ;;  %306 = vst [vmem:[%s1556_s29 + $0x1b0] sm:$0xff] %v305_v54  ;;  %308 = vst [vmem:[%s1556_s29 + $0x1b8] sm:$0xff] %v307_v55  ;;  %v311_v57 = vld [vmem:[%s1551_s28 + $0x708] sm:$0xff] }
  0x30   : > { %310 = vst [vmem:[%s1556_s29 + $0x1c0] sm:$0xff] %v309_v56  ;;  %v313_v58 = vld [vmem:[%s1551_s28 + $0x740] sm:$0xff]  ;;  %v315_v59 = vld [vmem:[%s1551_s28 + $0x748] sm:$0xff]  ;;  %312 = vst [vmem:[%s1556_s29 + $0x1c8] sm:$0xff] %v311_v57 }
  0x31   : > { %314 = vst [vmem:[%s1556_s29 + $0x1d0] sm:$0xff] %v313_v58  ;;  %316 = vst [vmem:[%s1556_s29 + $0x1d8] sm:$0xff] %v315_v59  ;;  %v317_v60 = vld [vmem:[%s1551_s28 + $0x780] sm:$0xff]  ;;  %v319_v61 = vld [vmem:[%s1551_s28 + $0x788] sm:$0xff] }
  0x32   : > { %v321_v62 = vld [vmem:[%s1551_s28 + $0x7c0] sm:$0xff]  ;;  %318 = vst [vmem:[%s1556_s29 + $0x1e0] sm:$0xff] %v317_v60  ;;  %320 = vst [vmem:[%s1556_s29 + $0x1e8] sm:$0xff] %v319_v61  ;;  %v323_v63 = vld [vmem:[%s1551_s28 + $0x7c8] sm:$0xff] }
  0x33   : > { %322 = vst [vmem:[%s1556_s29 + $0x1f0] sm:$0xff] %v321_v62  ;;  %324 = vst [vmem:[%s1556_s29 + $0x1f8] sm:$0xff] %v323_v63 }
  0x34 PF: > { %p1232_p8 = scmp.ge.s32.totalorder %s1481_s16, 1  ;;  %p337_p9 = scmp.lt.s32.totalorder %s1481_s16, 5 }
  0x36   : > { %p338_p10 = pnand %p1232_p8, %p337_p9 }
  0x37   : > { %s344_s30 = sand.u32 (!%p338_p10), 1, %s1465_s12   ;;  %s1235_s4 = sshll.u32 (!%p338_p10), %s1473_s14, 2 }
  0x38   : > { %341 = sbr.rel (%p338_p10) target bundleno = 348 (0x15c), region = 51  ;;  %s1233_s8 = sshll.u32 (!%p338_p10), %s344_s30, 9 }
  0x39   : > { %s1694_s9 = scalar_lea.vmem (!%p338_p10), [#allocation3], %s1233_s8  ;;  %p395_p11 = scmp.lt.s32.totalorder (!%p338_p10), %s1235_s4, 15 }
  0x3a   : > { %s1234_s8 = sshll.u32 (!%p338_p10), %s344_s30, 7 }
  0x3d   : > { %v422_v0 = vld [vmem:[%s1839_s0 + $0x8] sm:$0xff]  ;;  %v424_v1 = vld [vmem:[%s1839_s0 + $0x18] sm:$0xff]  ;;  %v1347_v3 = vld [vmem:[%s1694_s9 + $0xe4] ss:$16 sps:$4 sm:$0xff]   ;;  %s1851_s4 = smov (!%p395_p11, %s1235_s4), 15  ;;  %s1306_s12 = sshll.u32 (%p1538_p6), %s1473_s14, 5 }
  0x3e   : > { %v430_v2 = vpack.c.bf16 %v424_v1, %v422_v0  ;;  %v1349_v4 = vld [vmem:[%s1694_s9 + $0xec] ss:$16 sps:$4 sm:$0xff]   ;;  %833 = vmatprep.subr.bf16.mxu0 %v1347_v3  ;;  %v1351_v5 = vld [vmem:[%s1694_s9 + $0xe0] ss:$16 sps:$4 sm:$0xff]   ;;  %v1352_v6 = vld [vmem:[%s1694_s9 + $0xe8] ss:$16 sps:$4 sm:$0xff]   ;;  %s397_s7 = scalar_lea.vmem %s1841_s2, %s1851_s4  ;;  %s1072_s11 = scalar_lea.vmem (%p1538_p6), %s1842_s3, %s1306_s12 }
  0x3f   : > { %886 = vmatprep.subr.bf16.mxu1 %v1349_v4  ;;  %v1353_v7 = vld [vmem:[%s1694_s9 + $0xc4] ss:$16 sps:$4 sm:$0xff]   ;;  %834 = vmatpush1.bf16.msra.mxu0 %v1351_v5  ;;  %v1355_v8 = vld [vmem:[%s1694_s9 + $0xcc] ss:$16 sps:$4 sm:$0xff]   ;;  %v1357_v9 = vld [vmem:[%s1694_s9 + $0xc0] ss:$16 sps:$4 sm:$0xff]  }
  0x40   : > { %865 = vmatprep.mubr.bf16.mxu0 %v430_v2  ;;  %918 = vmatprep.mubr.bf16.mxu1 %v430_v2  ;;  %v1358_v10 = vld [vmem:[%s1694_s9 + $0xc8] ss:$16 sps:$4 sm:$0xff]   ;;  %v1359_v11 = vld [vmem:[%s1694_s9 + $0xa4] ss:$16 sps:$4 sm:$0xff]   ;;  %v1361_v12 = vld [vmem:[%s1694_s9 + $0xac] ss:$16 sps:$4 sm:$0xff]  }
  0x41   : > { %887 = vmatpush1.bf16.msra.mxu1 %v1352_v6  ;;  %835 = vmatprep.subr.bf16.mxu0 %v1353_v7  ;;  %v1363_v13 = vld [vmem:[%s1694_s9 + $0xa0] ss:$16 sps:$4 sm:$0xff]   ;;  %v1364_v14 = vld [vmem:[%s1694_s9 + $0xa8] ss:$16 sps:$4 sm:$0xff]   ;;  %v1365_v15 = vld [vmem:[%s1694_s9 + $0x84] ss:$16 sps:$4 sm:$0xff]  }
  0x42   : > { %888 = vmatprep.subr.bf16.mxu1 %v1355_v8  ;;  %v1367_v16 = vld [vmem:[%s1694_s9 + $0x8c] ss:$16 sps:$4 sm:$0xff]   ;;  %v1369_v17 = vld [vmem:[%s1694_s9 + $0x80] ss:$16 sps:$4 sm:$0xff]   ;;  %v1370_v18 = vld [vmem:[%s1694_s9 + $0x88] ss:$16 sps:$4 sm:$0xff]  }
  0x43   : > { %836 = vmatpush1.bf16.msra.mxu0 %v1357_v9  ;;  %v1371_v19 = vld [vmem:[%s1694_s9 + $0x64] ss:$16 sps:$4 sm:$0xff]   ;;  %v1373_v20 = vld [vmem:[%s1694_s9 + $0x6c] ss:$16 sps:$4 sm:$0xff]   ;;  %v1375_v21 = vld [vmem:[%s1694_s9 + $0x60] ss:$16 sps:$4 sm:$0xff]  }
  0x44   : > { %837 = vmatprep.subr.bf16.mxu0 %v1359_v11  ;;  %v1376_v22 = vld [vmem:[%s1694_s9 + $0x68] ss:$16 sps:$4 sm:$0xff]   ;;  %v1377_v23 = vld [vmem:[%s1694_s9 + $0x44] ss:$16 sps:$4 sm:$0xff]   ;;  %v1379_v24 = vld [vmem:[%s1694_s9 + $0x4c] ss:$16 sps:$4 sm:$0xff]  }
  0x45   : > { %889 = vmatpush1.bf16.msra.mxu1 %v1358_v10  ;;  %v1381_v25 = vld [vmem:[%s1694_s9 + $0x40] ss:$16 sps:$4 sm:$0xff]   ;;  %v1382_v26 = vld [vmem:[%s1694_s9 + $0x48] ss:$16 sps:$4 sm:$0xff]   ;;  %v1383_v27 = vld [vmem:[%s1694_s9 + $0x24] ss:$16 sps:$4 sm:$0xff]  }
  0x46   : > { %890 = vmatprep.subr.bf16.mxu1 %v1361_v12  ;;  %v1385_v28 = vld [vmem:[%s1694_s9 + $0x2c] ss:$16 sps:$4 sm:$0xff]   ;;  %v1387_v29 = vld [vmem:[%s1694_s9 + $0x20] ss:$16 sps:$4 sm:$0xff]   ;;  %v1388_v30 = vld [vmem:[%s1694_s9 + $0x28] ss:$16 sps:$4 sm:$0xff]   ;;  %v992_v12 = vlaneseq }
  0x47   : > { %838 = vmatpush1.bf16.msra.mxu0 %v1363_v13  ;;  %v1389_v31 = vld [vmem:[%s1694_s9 + $0x4] ss:$16 sps:$4 sm:$0xff]   ;;  %v1391_v32 = vld [vmem:[%s1694_s9 + $0xc] ss:$16 sps:$4 sm:$0xff]   ;;  %v1393_v33 = vld [vmem:[%s1694_s9] ss:$16 sps:$4 sm:$0xff]  }
  0x48   : > { %839 = vmatprep.subr.bf16.mxu0 %v1365_v15  ;;  %v1394_v34 = vld [vmem:[%s1694_s9 + $0x8] ss:$16 sps:$4 sm:$0xff]   ;;  %v1395_v35 = vld [vmem:[%s1694_s9 + $0x1e4] ss:$16 sps:$4 sm:$0xff]   ;;  %v1397_v36 = vld [vmem:[%s1694_s9 + $0x1ec] ss:$16 sps:$4 sm:$0xff]  }
  0x49   : > { %891 = vmatpush1.bf16.msra.mxu1 %v1364_v14  ;;  %v1399_v37 = vld [vmem:[%s1694_s9 + $0x1e0] ss:$16 sps:$4 sm:$0xff]   ;;  %v1400_v38 = vld [vmem:[%s1694_s9 + $0x1e8] ss:$16 sps:$4 sm:$0xff]   ;;  %v1401_v39 = vld [vmem:[%s1694_s9 + $0x1c4] ss:$16 sps:$4 sm:$0xff]  }
  0x4a   : > { %892 = vmatprep.subr.bf16.mxu1 %v1367_v16  ;;  %v1403_v40 = vld [vmem:[%s1694_s9 + $0x1cc] ss:$16 sps:$4 sm:$0xff]   ;;  %v1405_v41 = vld [vmem:[%s1694_s9 + $0x1c0] ss:$16 sps:$4 sm:$0xff]   ;;  %v1406_v42 = vld [vmem:[%s1694_s9 + $0x1c8] ss:$16 sps:$4 sm:$0xff]  }
  0x4b   : > { %840 = vmatpush1.bf16.msra.mxu0 %v1369_v17  ;;  %v1407_v43 = vld [vmem:[%s1694_s9 + $0x1a4] ss:$16 sps:$4 sm:$0xff]   ;;  %v1409_v44 = vld [vmem:[%s1694_s9 + $0x1ac] ss:$16 sps:$4 sm:$0xff]   ;;  %v1411_v45 = vld [vmem:[%s1694_s9 + $0x1a0] ss:$16 sps:$4 sm:$0xff]  }
  0x4c   : > { %841 = vmatprep.subr.bf16.mxu0 %v1371_v19  ;;  %v1412_v46 = vld [vmem:[%s1694_s9 + $0x1a8] ss:$16 sps:$4 sm:$0xff]   ;;  %v1413_v47 = vld [vmem:[%s1694_s9 + $0x184] ss:$16 sps:$4 sm:$0xff]   ;;  %v1415_v48 = vld [vmem:[%s1694_s9 + $0x18c] ss:$16 sps:$4 sm:$0xff]  }
  0x4d   : > { %893 = vmatpush1.bf16.msra.mxu1 %v1370_v18  ;;  %v1417_v49 = vld [vmem:[%s1694_s9 + $0x180] ss:$16 sps:$4 sm:$0xff]   ;;  %v1418_v50 = vld [vmem:[%s1694_s9 + $0x188] ss:$16 sps:$4 sm:$0xff]   ;;  %v1419_v51 = vld [vmem:[%s1694_s9 + $0x164] ss:$16 sps:$4 sm:$0xff]  }
  0x4e   : > { %894 = vmatprep.subr.bf16.mxu1 %v1373_v20  ;;  %v1421_v52 = vld [vmem:[%s1694_s9 + $0x16c] ss:$16 sps:$4 sm:$0xff]   ;;  %v1423_v53 = vld [vmem:[%s1694_s9 + $0x160] ss:$16 sps:$4 sm:$0xff]   ;;  %v1424_v54 = vld [vmem:[%s1694_s9 + $0x168] ss:$16 sps:$4 sm:$0xff]  }
  0x4f   : > { %842 = vmatpush1.bf16.msra.mxu0 %v1375_v21  ;;  %v1425_v55 = vld [vmem:[%s1694_s9 + $0x144] ss:$16 sps:$4 sm:$0xff]   ;;  %v1427_v56 = vld [vmem:[%s1694_s9 + $0x14c] ss:$16 sps:$4 sm:$0xff]   ;;  %v1429_v57 = vld [vmem:[%s1694_s9 + $0x140] ss:$16 sps:$4 sm:$0xff]  }
  0x50   : > { %843 = vmatprep.subr.bf16.mxu0 %v1377_v23  ;;  %v1430_v58 = vld [vmem:[%s1694_s9 + $0x148] ss:$16 sps:$4 sm:$0xff]   ;;  %v1431_v59 = vld [vmem:[%s1694_s9 + $0x124] ss:$16 sps:$4 sm:$0xff]   ;;  %v1433_v60 = vld [vmem:[%s1694_s9 + $0x12c] ss:$16 sps:$4 sm:$0xff]  }
  0x51   : > { %895 = vmatpush1.bf16.msra.mxu1 %v1376_v22  ;;  %v1435_v61 = vld [vmem:[%s1694_s9 + $0x120] ss:$16 sps:$4 sm:$0xff]   ;;  %v1436_v62 = vld [vmem:[%s1694_s9 + $0x128] ss:$16 sps:$4 sm:$0xff]   ;;  %v1437_v63 = vld [vmem:[%s1694_s9 + $0x104] ss:$16 sps:$4 sm:$0xff]  }
  0x52   : > { %896 = vmatprep.subr.bf16.mxu1 %v1379_v24  ;;  %v1439_v0 = vld [vmem:[%s1694_s9 + $0x10c] ss:$16 sps:$4 sm:$0xff]   ;;  %v421_v1 = vld [vmem:[%s1839_s0] sm:$0xff]  ;;  %v1442_v3 = vld [vmem:[%s1694_s9 + $0x108] ss:$16 sps:$4 sm:$0xff]   ;;  %v993_v13 = vshrl.u32 %v992_v12, 7 }
  0x53   : > { %844 = vmatpush1.bf16.msra.mxu0 %v1381_v25  ;;  %v1441_v2 = vld [vmem:[%s1694_s9 + $0x100] ss:$16 sps:$4 sm:$0xff]   ;;  %v426_v5 = vld [vmem:[%s1839_s0 + $0x28] sm:$0xff]  ;;  %v428_v6 = vld [vmem:[%s1839_s0 + $0x38] sm:$0xff]  ;;  %s1784_s9 = scalar_lea.vmem [#allocation4], %s1234_s8 }
  0x54   : > { %845 = vmatprep.subr.bf16.mxu0 %v1383_v27  ;;  %v423_v4 = vld [vmem:[%s1839_s0 + $0x10] sm:$0xff]  ;;  %v432_v8 = vpack.c.bf16 %v428_v6, %v426_v5  ;;  %v425_v9 = vld [vmem:[%s1839_s0 + $0x20] sm:$0xff]  ;;  %v994_v14 = vsub.s32 0, %v993_v13  ;;  %v1002_v15 = vsub.s32 2, %v993_v13  ;;  %v998_v17 = vsub.s32 1, %v993_v13 }
  0x55   : > { %897 = vmatpush1.bf16.msra.mxu1 %v1382_v26  ;;  %v429_v7 = vpack.c.bf16 %v423_v4, %v421_v1  ;;  %v427_v10 = vld [vmem:[%s1839_s0 + $0x30] sm:$0xff]  ;;  %v990_v16 = vld [vmem:[%s397_s7] sm:$0xf]  ;;  %v1006_v18 = vsub.s32 3, %v993_v13 }
  0x56   : > { %898 = vmatprep.subr.bf16.mxu1 %v1385_v28  ;;  %v431_v11 = vpack.c.bf16 %v427_v10, %v425_v9  ;;  %v995_v19 = vrot.slane %v990_v16, %v994_v14  ;;  %v1003_v20 = vrot.slane %v990_v16, %v1002_v15  ;;  %v999_v21 = vrot.slane %v990_v16, %v998_v17 }
  0x57   : > { %846 = vmatpush1.bf16.msra.mxu0 %v1387_v29  ;;  %v1007_v22 = vrot.slane %v990_v16, %v1006_v18 }
  0x58   : > { %847 = vmatprep.subr.bf16.mxu0 %v1389_v31 }
  0x59   : > { %899 = vmatpush1.bf16.msra.mxu1 %v1388_v30 }
  0x5a   : > { %900 = vmatprep.subr.bf16.mxu1 %v1391_v32 }
  0x5b   : > { %848 = vmatpush1.bf16.msra.mxu0 %v1393_v33 }
  0x5c   : > { %849 = vmatprep.subr.bf16.mxu0 %v1395_v35 }
  0x5d   : > { %901 = vmatpush1.bf16.msra.mxu1 %v1394_v34 }
  0x5e   : > { %902 = vmatprep.subr.bf16.mxu1 %v1397_v36 }
  0x5f   : > { %850 = vmatpush2.bf16.msra.mxu0 %v1399_v37 }
  0x60   : > { %851 = vmatprep.subr.bf16.mxu0 %v1401_v39 }
  0x61   : > { %903 = vmatpush2.bf16.msra.mxu1 %v1400_v38 }
  0x62   : > { %904 = vmatprep.subr.bf16.mxu1 %v1403_v40 }
  0x63   : > { %852 = vmatpush2.bf16.msra.mxu0 %v1405_v41 }
  0x64   : > { %853 = vmatprep.subr.bf16.mxu0 %v1407_v43 }
  0x65   : > { %905 = vmatpush2.bf16.msra.mxu1 %v1406_v42 }
  0x66   : > { %906 = vmatprep.subr.bf16.mxu1 %v1409_v44 }
  0x67   : > { %854 = vmatpush2.bf16.msra.mxu0 %v1411_v45 }
  0x68   : > { %855 = vmatprep.subr.bf16.mxu0 %v1413_v47 }
  0x69   : > { %907 = vmatpush2.bf16.msra.mxu1 %v1412_v46 }
  0x6a   : > { %908 = vmatprep.subr.bf16.mxu1 %v1415_v48 }
  0x6b   : > { %856 = vmatpush2.bf16.msra.mxu0 %v1417_v49 }
  0x6c   : > { %857 = vmatprep.subr.bf16.mxu0 %v1419_v51 }
  0x6d   : > { %909 = vmatpush2.bf16.msra.mxu1 %v1418_v50 }
  0x6e   : > { %910 = vmatprep.subr.bf16.mxu1 %v1421_v52 }
  0x6f   : > { %858 = vmatpush2.bf16.msra.mxu0 %v1423_v53 }
  0x70   : > { %859 = vmatprep.subr.bf16.mxu0 %v1425_v55 }
  0x71   : > { %911 = vmatpush2.bf16.msra.mxu1 %v1424_v54 }
  0x72   : > { %912 = vmatprep.subr.bf16.mxu1 %v1427_v56 }
  0x73   : > { %860 = vmatpush2.bf16.msra.mxu0 %v1429_v57 }
  0x74   : > { %861 = vmatprep.subr.bf16.mxu0 %v1431_v59 }
  0x75   : > { %913 = vmatpush2.bf16.msra.mxu1 %v1430_v58 }
  0x76   : > { %914 = vmatprep.subr.bf16.mxu1 %v1433_v60 }
  0x77   : > { %862 = vmatpush2.bf16.msra.mxu0 %v1435_v61 }
  0x78   : > { %863 = vmatprep.subr.bf16.mxu0 %v1437_v63 }
  0x79   : > { %915 = vmatpush2.bf16.msra.mxu1 %v1436_v62 }
  0x7a   : > { %916 = vmatprep.subr.bf16.mxu1 %v1439_v0 }
  0x7b   : > { %864 = vmatpush2.bf16.msra.mxu0 %v1441_v2 }
  0x7d   : > { %917 = vmatpush2.bf16.msra.mxu1 %v1442_v3 }
  0x7e   : > { %866 = vmatmul.mubr.bf16.vlgmr.msra.gmra.mxu0 %v429_v7 }
  0x7f   : > { %875 = vmatprep.mubr.bf16.mxu0 %v432_v8 }
  0x80   : > { %919 = vmatmul.mubr.bf16.vlgmr.msra.gmra.mxu1 %v429_v7 }
  0x81   : > { %928 = vmatprep.mubr.bf16.mxu1 %v432_v8 }
  0x86   : > { %876 = vmatmul.mubr.bf16.gmra.mxu0 %v431_v11 }
  0x88   : > { %929 = vmatmul.mubr.bf16.gmra.mxu1 %v431_v11 }
 0x13e   : > { %v867_v23 = vpop.f32.mrf.mxu0 }
 0x13f   : > { %v1012_v25 = vadd.f32 %v995_v19, %v867_v23 }
 0x140   : > { %v920_v24 = vpop.f32.mrf.mxu1  ;;  %v869_v27 = vpop.f32.mrf.mxu0 }
 0x141   : > { %v1014_v26 = vadd.f32 %v1003_v20, %v920_v24  ;;  %v1028_v29 = vmax.f32 %v1012_v25, 0.0  ;;  %v1013_v31 = vadd.f32 %v999_v21, %v869_v27 }
 0x142   : > { %v922_v28 = vpop.f32.mrf.mxu1  ;;  %v871_v33 = vpop.f32.mrf.mxu0 }
 0x143   : > { %v1030_v30 = vmax.f32 %v1014_v26, 0.0  ;;  %v1015_v32 = vadd.f32 %v1007_v22, %v922_v28  ;;  %1044 = vst [vmem:[%s1784_s9] sm:$0xff] %v1028_v29  ;;  %v1029_v35 = vmax.f32 %v1013_v31, 0.0  ;;  %v1016_v37 = vadd.f32 %v995_v19, %v871_v33 }
 0x144   : > { %v924_v34 = vpop.f32.mrf.mxu1  ;;  %v873_v39 = vpop.f32.mrf.mxu0 }
 0x145   : > { %1046 = vst [vmem:[%s1784_s9 + $0x10] sm:$0xff] %v1030_v30  ;;  %v1031_v36 = vmax.f32 %v1015_v32, 0.0  ;;  %v1018_v38 = vadd.f32 %v1003_v20, %v924_v34  ;;  %1045 = vst [vmem:[%s1784_s9 + $0x8] sm:$0xff] %v1029_v35  ;;  %v1032_v41 = vmax.f32 %v1016_v37, 0.0  ;;  %v1017_v43 = vadd.f32 %v999_v21, %v873_v39 }
 0x146   : > { %v926_v40 = vpop.f32.mrf.mxu1  ;;  %v877_v45 = vpop.f32.mrf.mxu0 }
 0x147   : > { %1047 = vst [vmem:[%s1784_s9 + $0x18] sm:$0xff] %v1031_v36  ;;  %v1034_v42 = vmax.f32 %v1018_v38, 0.0  ;;  %v1019_v44 = vadd.f32 %v1007_v22, %v926_v40  ;;  %1048 = vst [vmem:[%s1784_s9 + $0x20] sm:$0xff] %v1032_v41  ;;  %v1033_v47 = vmax.f32 %v1017_v43, 0.0  ;;  %v1020_v49 = vadd.f32 %v995_v19, %v877_v45 }
 0x148   : > { %v930_v46 = vpop.f32.mrf.mxu1  ;;  %v879_v51 = vpop.f32.mrf.mxu0 }
 0x149   : > { %1050 = vst [vmem:[%s1784_s9 + $0x30] sm:$0xff] %v1034_v42  ;;  %v1035_v48 = vmax.f32 %v1019_v44, 0.0  ;;  %v1022_v50 = vadd.f32 %v1003_v20, %v930_v46  ;;  %1049 = vst [vmem:[%s1784_s9 + $0x28] sm:$0xff] %v1033_v47  ;;  %v1036_v53 = vmax.f32 %v1020_v49, 0.0  ;;  %v1021_v55 = vadd.f32 %v999_v21, %v879_v51 }
 0x14a   : > { %v932_v52 = vpop.f32.mrf.mxu1  ;;  %v881_v57 = vpop.f32.mrf.mxu0  ;;  %v1085_v7 = vld [vmem:[%s1784_s9] sm:$0xff] (%p1538_p6) }
 0x14b   : > { %1051 = vst [vmem:[%s1784_s9 + $0x38] sm:$0xff] %v1035_v48  ;;  %v1038_v54 = vmax.f32 %v1022_v50, 0.0  ;;  %v1023_v56 = vadd.f32 %v1007_v22, %v932_v52  ;;  %1052 = vst [vmem:[%s1784_s9 + $0x40] sm:$0xff] %v1036_v53  ;;  %v1037_v59 = vmax.f32 %v1021_v55, 0.0  ;;  %v1024_v61 = vadd.f32 %v995_v19, %v881_v57 }
 0x14c   : > { %v934_v58 = vpop.f32.mrf.mxu1  ;;  %v883_v63 = vpop.f32.mrf.mxu0  ;;  %v1087_v8 = vld [vmem:[%s1784_s9 + $0x8] sm:$0xff] (%p1538_p6)  ;;  %v1089_v9 = vld [vmem:[%s1784_s9 + $0x10] sm:$0xff] (%p1538_p6)  ;;  %1086 = vst [vmem:[%s1072_s11] sm:$0xff] (%p1538_p6), %v1085_v7 }
 0x14d   : > { %1054 = vst [vmem:[%s1784_s9 + $0x50] sm:$0xff] %v1038_v54  ;;  %v1039_v60 = vmax.f32 %v1023_v56, 0.0  ;;  %v1026_v62 = vadd.f32 %v1003_v20, %v934_v58  ;;  %1053 = vst [vmem:[%s1784_s9 + $0x48] sm:$0xff] %v1037_v59  ;;  %v1040_v1 = vmax.f32 %v1024_v61, 0.0  ;;  %v1025_v3 = vadd.f32 %v999_v21, %v883_v63 }
 0x14e   : > { %v936_v0 = vpop.f32.mrf.mxu1  ;;  %v1091_v10 = vld [vmem:[%s1784_s9 + $0x18] sm:$0xff] (%p1538_p6)  ;;  %v1093_v11 = vld [vmem:[%s1784_s9 + $0x20] sm:$0xff] (%p1538_p6)  ;;  %1088 = vst [vmem:[%s1072_s11 + $0x8] sm:$0xff] (%p1538_p6), %v1087_v8  ;;  %1090 = vst [vmem:[%s1072_s11 + $0x10] sm:$0xff] (%p1538_p6), %v1089_v9 }
 0x14f   : > { %1055 = vst [vmem:[%s1784_s9 + $0x58] sm:$0xff] %v1039_v60  ;;  %v1042_v2 = vmax.f32 %v1026_v62, 0.0  ;;  %v1027_v4 = vadd.f32 %v1007_v22, %v936_v0  ;;  %1056 = vst [vmem:[%s1784_s9 + $0x60] sm:$0xff] %v1040_v1  ;;  %v1041_v5 = vmax.f32 %v1025_v3, 0.0  ;;  %1066 = sbr.rel (!%p1538_p6) target bundleno = 348 (0x15c), region = 67 }
 0x150   : > { %v1095_v12 = vld [vmem:[%s1784_s9 + $0x28] sm:$0xff] (%p1538_p6)  ;;  %1092 = vst [vmem:[%s1072_s11 + $0x18] sm:$0xff] (%p1538_p6), %v1091_v10  ;;  %1094 = vst [vmem:[%s1072_s11 + $0x80] sm:$0xff] (%p1538_p6), %v1093_v11  ;;  %v1097_v13 = vld [vmem:[%s1784_s9 + $0x30] sm:$0xff] (%p1538_p6) }
 0x151   : > { %1058 = vst [vmem:[%s1784_s9 + $0x70] sm:$0xff] %v1042_v2  ;;  %v1043_v6 = vmax.f32 %v1027_v4, 0.0  ;;  %1057 = vst [vmem:[%s1784_s9 + $0x68] sm:$0xff] %v1041_v5 }
 0x152   : > { %1096 = vst [vmem:[%s1072_s11 + $0x88] sm:$0xff] (%p1538_p6), %v1095_v12  ;;  %v1099_v14 = vld [vmem:[%s1784_s9 + $0x38] sm:$0xff] (%p1538_p6)  ;;  %v1101_v15 = vld [vmem:[%s1784_s9 + $0x40] sm:$0xff] (%p1538_p6)  ;;  %1098 = vst [vmem:[%s1072_s11 + $0x90] sm:$0xff] (%p1538_p6), %v1097_v13 }
 0x153   : > { %1059 = vst [vmem:[%s1784_s9 + $0x78] sm:$0xff] %v1043_v6  ;;  %1100 = vst [vmem:[%s1072_s11 + $0x98] sm:$0xff] (%p1538_p6), %v1099_v14 }
 0x154   : > { %1102 = vst [vmem:[%s1072_s11 + $0x100] sm:$0xff] %v1101_v15  ;;  %v1103_v16 = vld [vmem:[%s1784_s9 + $0x48] sm:$0xff]  ;;  %v1105_v17 = vld [vmem:[%s1784_s9 + $0x50] sm:$0xff] }
 0x155   : > { %1104 = vst [vmem:[%s1072_s11 + $0x108] sm:$0xff] %v1103_v16  ;;  %1106 = vst [vmem:[%s1072_s11 + $0x110] sm:$0xff] %v1105_v17 }
 0x156   : > { %v1107_v18 = vld [vmem:[%s1784_s9 + $0x58] sm:$0xff]  ;;  %v1109_v19 = vld [vmem:[%s1784_s9 + $0x60] sm:$0xff] }
 0x157   : > { %1108 = vst [vmem:[%s1072_s11 + $0x118] sm:$0xff] %v1107_v18  ;;  %1110 = vst [vmem:[%s1072_s11 + $0x180] sm:$0xff] %v1109_v19 }
 0x158   : > { %v1111_v20 = vld [vmem:[%s1784_s9 + $0x68] sm:$0xff]  ;;  %v1113_v21 = vld [vmem:[%s1784_s9 + $0x70] sm:$0xff] }
 0x159   : > { %1112 = vst [vmem:[%s1072_s11 + $0x188] sm:$0xff] %v1111_v20  ;;  %1114 = vst [vmem:[%s1072_s11 + $0x190] sm:$0xff] %v1113_v21 }
 0x15a   : > { %v1115_v22 = vld [vmem:[%s1784_s9 + $0x78] sm:$0xff] }
 0x15b   : > { %1116 = vst [vmem:[%s1072_s11 + $0x198] sm:$0xff] %v1115_v22 }
 0x15c PF: > { %s13_s16 = sadd.s32 1, %s1481_s16   ;;  %s1844_s12 = smov %s1469_s13 }
 0x15d   : > { %p10_p12 = scmp.ge.s32.totalorder %s13_s16, 6   ;;  %s1845_s13 = smov %s1543_s22 }
 0x15e   : > { %s1846_s14 = smov %s1477_s15  ;;  %s1847_s15 = smov %s1849_s17 }
 0x15f   :  { %12 = sbr.rel (!%p10_p12) target bundleno = 3 (0x3), region = 127 }

// kernel: transformer_forward.50
= control target key start
LH: loop header
LB: loop body
LE: loop exit
PB: predicated region body
PF: predicated region fallthrough
CT: control target
= control target key end

     0   :  { %v90_v45 = vlaneseq  ;;  %s241_s0 = inlined_call_operand.vmem [shape: f32[32,256], index: 0, kind: input, shape index: {}]   ;;  %s242_s1 = inlined_call_operand.vmem [shape: f32[1,256], index: 1, kind: input, shape index: {}]   ;;  %s243_s2 = inlined_call_operand.vmem [shape: f32[1,256], index: 2, kind: input, shape index: {}]   ;;  %s244_s3 = inlined_call_operand.vmem [shape: f32[32,256], index: 3, kind: output, shape index: {}]  }
   0x1   :  { %v14_v0 = vld [vmem:[%s241_s0] sm:$0xff]  ;;  %v15_v1 = vld [vmem:[%s241_s0 + $0x8] sm:$0xff]  ;;  %v16_v5 = vld [vmem:[%s241_s0 + $0x10] sm:$0xff] }
   0x2   :  { %v18_v2 = vld [vmem:[%s241_s0 + $0x20] sm:$0xff]  ;;  %v24_v3 = vadd.f32 %v15_v1, %v14_v0  ;;  %v19_v4 = vld [vmem:[%s241_s0 + $0x28] sm:$0xff]  ;;  %v17_v6 = vld [vmem:[%s241_s0 + $0x18] sm:$0xff]  ;;  %v91_v51 = vshrl.u32 %v90_v45, 7 }
   0x3   :  { %v30_v7 = vadd.f32 %v19_v4, %v18_v2  ;;  %v20_v8 = vld [vmem:[%s241_s0 + $0x30] sm:$0xff]  ;;  %v21_v9 = vld [vmem:[%s241_s0 + $0x38] sm:$0xff]  ;;  %v27_v10 = vadd.f32 %v17_v6, %v16_v5  ;;  %v22_v56 = vld [vmem:[%s242_s1] sm:$0x3] }
   0x4   :  { %25 = vadd.xlane.f32.xlu0 %v24_v3  ;;  %v33_v11 = vadd.f32 %v21_v9, %v20_v8  ;;  %v92_v54 = vsub.s32 0, %v91_v51  ;;  %v96_v55 = vsub.s32 1, %v91_v51  ;;  %v23_v57 = vld [vmem:[%s243_s2] sm:$0x3] }
   0x5   :  { %31 = vadd.xlane.f32.xlu1 %v30_v7 }
   0x6   :  { %v93_v58 = vrot.slane %v22_v56, %v92_v54  ;;  %v97_v59 = vrot.slane %v22_v56, %v96_v55  ;;  %v112_v61 = vrot.slane %v23_v57, %v92_v54  ;;  %v116_v62 = vrot.slane %v23_v57, %v96_v55 }
   0x8   :  { %28 = vadd.xlane.f32.xlu0 %v27_v10 }
   0x9   :  { %34 = vadd.xlane.f32.xlu1 %v33_v11 }
  0x8d   :  { %v26_v12 = vpop.xlane.xlu0 %25 }
  0x8e   :  { %v37_v13 = vmul.f32 0.00390625, %v26_v12  ;;  %v32_v14 = vpop.xlane.xlu1 %31 }
  0x8f   :  { %v39_v15 = vmul.f32 0.00390625, %v32_v14 }
  0x90   :  { %v41_v16 = vsub.f32 %v14_v0, %v37_v13  ;;  %v42_v17 = vsub.f32 %v15_v1, %v37_v13 }
  0x91   :  { %v191_v18 = vsub.f32 %v18_v2, %v39_v15  ;;  %v193_v19 = vsub.f32 %v19_v4, %v39_v15  ;;  %v29_v20 = vpop.xlane.xlu0 %28 }
  0x92   :  { %v38_v21 = vmul.f32 0.00390625, %v29_v20  ;;  %v35_v22 = vpop.xlane.xlu1 %34  ;;  %v49_v23 = vmul.f32 %v41_v16, %v41_v16  ;;  %v50_v24 = vmul.f32 %v42_v17, %v42_v17 }
  0x93   :  { %v40_v25 = vmul.f32 0.00390625, %v35_v22  ;;  %v53_v26 = vmul.f32 %v191_v18, %v191_v18  ;;  %v54_v27 = vmul.f32 %v193_v19, %v193_v19 }
  0x94   :  { %v43_v28 = vsub.f32 %v16_v5, %v38_v21  ;;  %v44_v29 = vsub.f32 %v17_v6, %v38_v21  ;;  %v57_v30 = vadd.f32 %v50_v24, %v49_v23 }
  0x95   :  { %v199_v31 = vsub.f32 %v20_v8, %v40_v25  ;;  %v201_v32 = vsub.f32 %v21_v9, %v40_v25  ;;  %v63_v33 = vadd.f32 %v54_v27, %v53_v26 }
  0x96   :  { %58 = vadd.xlane.f32.xlu0 %v57_v30  ;;  %v51_v34 = vmul.f32 %v43_v28, %v43_v28  ;;  %v52_v35 = vmul.f32 %v44_v29, %v44_v29 }
  0x97   :  { %v55_v36 = vmul.f32 %v199_v31, %v199_v31  ;;  %v56_v37 = vmul.f32 %v201_v32, %v201_v32 }
  0x98   :  { %v60_v38 = vadd.f32 %v52_v35, %v51_v34 }
  0x99   :  { %v66_v39 = vadd.f32 %v56_v37, %v55_v36 }
  0x9a   :  { %64 = vadd.xlane.f32.xlu0 %v63_v33  ;;  %61 = vadd.xlane.f32.xlu1 %v60_v38 }
  0x9e   :  { %67 = vadd.xlane.f32.xlu1 %v66_v39 }
 0x11f   :  { %v59_v40 = vpop.xlane.xlu0 %58 }
 0x120   :  { %v69_v41 = vmul.f32 0.00390625, %v59_v40 }
 0x122   :  { %v73_v42 = vadd.f32 1e-05, %v69_v41 }
 0x123   :  { %v62_v43 = vpop.xlane.xlu1 %61  ;;  %v65_v44 = vpop.xlane.xlu0 %64 }
 0x124   :  { %139 = vrsqrt.f32 %v73_v42  ;;  %v70_v46 = vmul.f32 0.00390625, %v62_v43  ;;  %v71_v47 = vmul.f32 0.00390625, %v65_v44 }
 0x126   :  { %v74_v48 = vadd.f32 1e-05, %v70_v46  ;;  %v75_v49 = vadd.f32 1e-05, %v71_v47 }
 0x127   :  { %v68_v50 = vpop.xlane.xlu1 %67 }
 0x128   :  { %141 = vrsqrt.f32 %v74_v48  ;;  %v72_v52 = vmul.f32 0.00390625, %v68_v50 }
 0x129   :  { %143 = vrsqrt.f32 %v75_v49 }
 0x12a   :  { %v76_v53 = vadd.f32 1e-05, %v72_v52 }
 0x12c   :  { %145 = vrsqrt.f32 %v76_v53 }
 0x131   :  { %v140_v60 = vpop.eup %139 }
 0x132   :  { %v81_v63 = vmul.f32 %v140_v60, %v41_v16  ;;  %v82_v0 = vmul.f32 %v140_v60, %v42_v17 }
 0x134   :  { %v100_v1 = vmul.f32 %v93_v58, %v81_v63  ;;  %v101_v2 = vmul.f32 %v97_v59, %v82_v0 }
 0x135   :  { %v142_v3 = vpop.eup %141 }
 0x136   :  { %v144_v4 = vpop.eup %143  ;;  %v119_v5 = vadd.f32 %v112_v61, %v100_v1  ;;  %v120_v6 = vadd.f32 %v116_v62, %v101_v2  ;;  %v83_v7 = vmul.f32 %v142_v3, %v43_v28  ;;  %v84_v8 = vmul.f32 %v142_v3, %v44_v29 }
 0x137   :  { %v85_v9 = vmul.f32 %v144_v4, %v191_v18  ;;  %v86_v10 = vmul.f32 %v144_v4, %v193_v19 }
 0x138   :  { %127 = vst [vmem:[%s244_s3] sm:$0xff] %v119_v5  ;;  %128 = vst [vmem:[%s244_s3 + $0x8] sm:$0xff] %v120_v6  ;;  %v102_v11 = vmul.f32 %v93_v58, %v83_v7  ;;  %v103_v12 = vmul.f32 %v97_v59, %v84_v8 }
 0x139   :  { %v146_v13 = vpop.eup %145  ;;  %v104_v14 = vmul.f32 %v93_v58, %v85_v9  ;;  %v105_v15 = vmul.f32 %v97_v59, %v86_v10 }
 0x13a   :  { %v121_v16 = vadd.f32 %v112_v61, %v102_v11  ;;  %v122_v17 = vadd.f32 %v116_v62, %v103_v12  ;;  %v87_v20 = vmul.f32 %v146_v13, %v199_v31  ;;  %v88_v18 = vmul.f32 %v146_v13, %v201_v32 }
 0x13b   :  { %v123_v19 = vadd.f32 %v112_v61, %v104_v14  ;;  %v124_v21 = vadd.f32 %v116_v62, %v105_v15 }
 0x13c   :  { %129 = vst [vmem:[%s244_s3 + $0x10] sm:$0xff] %v121_v16  ;;  %130 = vst [vmem:[%s244_s3 + $0x18] sm:$0xff] %v122_v17  ;;  %v106_v22 = vmul.f32 %v93_v58, %v87_v20  ;;  %v107_v23 = vmul.f32 %v97_v59, %v88_v18 }
 0x13d   :  { %131 = vst [vmem:[%s244_s3 + $0x20] sm:$0xff] %v123_v19  ;;  %132 = vst [vmem:[%s244_s3 + $0x28] sm:$0xff] %v124_v21 }
 0x13e   :  { %v125_v24 = vadd.f32 %v112_v61, %v106_v22  ;;  %v126_v25 = vadd.f32 %v116_v62, %v107_v23 }
 0x140   :  { %133 = vst [vmem:[%s244_s3 + $0x30] sm:$0xff] %v125_v24  ;;  %134 = vst [vmem:[%s244_s3 + $0x38] sm:$0xff] %v126_v25 }

// kernel: transformer_forward.36
= control target key start
LH: loop header
LB: loop body
LE: loop exit
PB: predicated region body
PF: predicated region fallthrough
CT: control target
= control target key end

     0   :  { %s1316_s12 = smov 0   ;;  %s1318_s13 = smov 0   ;;  %s1512_s0 = inlined_call_operand.vmem [shape: f32[32,2048], index: 0, kind: input, shape index: {}]   ;;  %s1513_s1 = inlined_call_operand.vmem [shape: bf16[2048,256], index: 1, kind: input, shape index: {}]   ;;  %s1514_s2 = inlined_call_operand.vmem [shape: f32[1,256], index: 2, kind: input, shape index: {}]   ;;  %s1515_s3 = inlined_call_operand.vmem [shape: f32[32,256], index: 3, kind: output, shape index: {}]  }
   0x1   :  { %s1320_s14 = smov 0   ;;  %s1322_s15 = smov 0  }
   0x2   :  { %s1324_s16 = smov 0  }
   0x3 LB: > { %s25_s17 = sadd.s32 1, %s1289_s15  ;;  %p48_p1 = scmp.ne.s32.totalorder %s1281_s13, %s1277_s12  ;;  %s1293_s16 = sphi %s1324_s16, %s13_s16   ;;  %s1289_s15 = sphi %s1322_s15, %s1519_s15   ;;  %s1285_s14 = sphi %s1320_s14, %s1518_s14   ;;  %s1281_s13 = sphi %s1318_s13, %s1517_s13   ;;  %s1277_s12 = sphi %s1316_s12, %s1516_s12  }
   0x4   : > { %p26_p0 = scmp.ge.s32.totalorder %s25_s17, 4  ;;  %p49_p2 = scmp.eq.s32.totalorder %s1293_s16, 0 }
   0x5   : > { %s41_s19 = sadd.s32 1, %s1281_s13  ;;  %p1037_p5 = scmp.ge.s32.totalorder %s1293_s16, 4 }
   0x6   : > { %s1521_s17 = smov (%p26_p0, %s25_s17), 0  ;;  %p50_p3 = por %p49_p2, %p48_p1 }
   0x7   : > { %s37_s18 = ssub.s32 %s1289_s15, %s1521_s17  ;;  %164 = sbr.rel (%p1037_p5) target bundleno = 24 (0x18), region = 20 }
   0x8   : > { %p39_p4 = scmp.eq.s32.totalorder %s37_s18, 0 }
   0xa   : > { %s1351_s20 = scalar_select %p39_p4, %s1281_s13, %s41_s19  }
   0xc   : > { %167 = sbr.rel (!%p50_p3) target bundleno = 24 (0x18), region = 24  ;;  %s169_s21 = sand.u32 (%p50_p3), 1, %s1281_s13  }
   0xd   : > { %s1116_s22 = sshll.u32 (%p50_p3), %s1289_s15, 5  ;;  %s1038_s23 = sshll.u32 (%p50_p3), %s169_s21, 7 }
   0xe   : > { %s1359_s26 = scalar_lea.vmem (%p50_p3), %s1512_s0, %s1116_s22  ;;  %s171_s27 = scalar_lea.vmem (%p50_p3), [#allocation3], %s1038_s23 }
   0xf   : > { %v190_v0 = vld [vmem:[%s1359_s26] sm:$0xff] (%p50_p3)  ;;  %v192_v1 = vld [vmem:[%s1359_s26 + $0x8] sm:$0xff] (%p50_p3)  ;;  %v194_v2 = vld [vmem:[%s1359_s26 + $0x10] sm:$0xff] (%p50_p3) }
  0x10   : > { %191 = vst [vmem:[%s171_s27] sm:$0xff] (%p50_p3), %v190_v0  ;;  %193 = vst [vmem:[%s171_s27 + $0x8] sm:$0xff] (%p50_p3), %v192_v1  ;;  %v196_v3 = vld [vmem:[%s1359_s26 + $0x18] sm:$0xff] (%p50_p3)  ;;  %v198_v4 = vld [vmem:[%s1359_s26 + $0x80] sm:$0xff] (%p50_p3) }
  0x11   : > { %195 = vst [vmem:[%s171_s27 + $0x10] sm:$0xff] %v194_v2  ;;  %v200_v5 = vld [vmem:[%s1359_s26 + $0x88] sm:$0xff]  ;;  %197 = vst [vmem:[%s171_s27 + $0x18] sm:$0xff] %v196_v3  ;;  %v202_v6 = vld [vmem:[%s1359_s26 + $0x90] sm:$0xff] }
  0x12   : > { %199 = vst [vmem:[%s171_s27 + $0x20] sm:$0xff] %v198_v4  ;;  %201 = vst [vmem:[%s171_s27 + $0x28] sm:$0xff] %v200_v5  ;;  %v204_v7 = vld [vmem:[%s1359_s26 + $0x98] sm:$0xff]  ;;  %v206_v8 = vld [vmem:[%s1359_s26 + $0x100] sm:$0xff] }
  0x13   : > { %203 = vst [vmem:[%s171_s27 + $0x30] sm:$0xff] %v202_v6  ;;  %205 = vst [vmem:[%s171_s27 + $0x38] sm:$0xff] %v204_v7  ;;  %v208_v9 = vld [vmem:[%s1359_s26 + $0x108] sm:$0xff]  ;;  %v210_v10 = vld [vmem:[%s1359_s26 + $0x110] sm:$0xff] }
  0x14   : > { %207 = vst [vmem:[%s171_s27 + $0x40] sm:$0xff] %v206_v8  ;;  %v212_v11 = vld [vmem:[%s1359_s26 + $0x118] sm:$0xff]  ;;  %209 = vst [vmem:[%s171_s27 + $0x48] sm:$0xff] %v208_v9  ;;  %v214_v12 = vld [vmem:[%s1359_s26 + $0x180] sm:$0xff] }
  0x15   : > { %211 = vst [vmem:[%s171_s27 + $0x50] sm:$0xff] %v210_v10  ;;  %213 = vst [vmem:[%s171_s27 + $0x58] sm:$0xff] %v212_v11  ;;  %v216_v13 = vld [vmem:[%s1359_s26 + $0x188] sm:$0xff]  ;;  %v218_v14 = vld [vmem:[%s1359_s26 + $0x190] sm:$0xff] }
  0x16   : > { %215 = vst [vmem:[%s171_s27 + $0x60] sm:$0xff] %v214_v12  ;;  %217 = vst [vmem:[%s171_s27 + $0x68] sm:$0xff] %v216_v13  ;;  %v220_v15 = vld [vmem:[%s1359_s26 + $0x198] sm:$0xff] }
  0x17   : > { %219 = vst [vmem:[%s171_s27 + $0x70] sm:$0xff] %v218_v14  ;;  %221 = vst [vmem:[%s171_s27 + $0x78] sm:$0xff] %v220_v15 }
  0x18 PF: > { %p1041_p6 = scmp.ge.s32.totalorder %s1293_s16, 1  ;;  %p241_p7 = scmp.lt.s32.totalorder %s1293_s16, 5 }
  0x1a   : > { %p242_p8 = pnand %p1041_p6, %p241_p7 }
  0x1b   : > { %s248_s28 = sand.u32 (!%p242_p8), 1, %s1277_s12   ;;  %s1043_s29 = sshll.u32 (!%p242_p8), %s1285_s14, 6 }
  0x1c   : > { %245 = sbr.rel (%p242_p8) target bundleno = 335 (0x14f), region = 51  ;;  %s1042_s30 = sshll.u32 (!%p242_p8), %s248_s28, 7 }
  0x1d   : > { %p294_p9 = scmp.lt.s32.totalorder (!%p242_p8), %s1043_s29, 255  ;;  %s1386_s8 = scalar_lea.vmem (!%p242_p8), [#allocation3], %s1042_s30 }
  0x1e   : > { %p1046_p10 = scmp.ne.s32.totalorder (!%p242_p8), %s1285_s14, 0 }
  0x21   : > { %s1523_s29 = smov (!%p294_p9, %s1043_s29), 255  ;;  %324 = sbr.rel (%p1046_p10) target bundleno = 43 (0x2b), region = 59 }
  0x22   : > { %s1117_s4 = sshll.u32 %s1523_s29, 3 }
  0x23   : > { %s1384_s7 = scalar_lea.vmem %s1513_s1, %s1117_s4 }
  0x26   : > { %v1295_v16 = vmov 0.0  }
  0x27   : > { %325 = vst [vmem:[#allocation2 + $0x30] sm:$0xff] %v1295_v16  ;;  %326 = vst [vmem:[#allocation2] sm:$0xff] %v1295_v16 }
  0x28   : > { %327 = vst [vmem:[#allocation2 + $0x18] sm:$0xff] %v1295_v16  ;;  %328 = vst [vmem:[#allocation2 + $0x10] sm:$0xff] %v1295_v16 }
  0x29   : > { %329 = vst [vmem:[#allocation2 + $0x8] sm:$0xff] %v1295_v16  ;;  %330 = vst [vmem:[#allocation2 + $0x20] sm:$0xff] %v1295_v16 }
  0x2a   : > { %331 = vst [vmem:[#allocation2 + $0x28] sm:$0xff] %v1295_v16  ;;  %332 = vst [vmem:[#allocation2 + $0x38] sm:$0xff] %v1295_v16 }
  0x2b PF: > { %v1159_v17 = vld [vmem:[%s1384_s7 + $0x74] ss:$8 sps:$4 sm:$0xff]   ;;  %v1163_v19 = vld [vmem:[%s1384_s7 + $0x70] ss:$8 sps:$4 sm:$0xff]   ;;  %v1165_v21 = vld [vmem:[%s1384_s7 + $0x64] ss:$8 sps:$4 sm:$0xff]  }
  0x2c   : > { %v1161_v18 = vld [vmem:[%s1384_s7 + $0x174] ss:$8 sps:$4 sm:$0xff]   ;;  %749 = vmatprep.subr.bf16.mxu0 %v1159_v17  ;;  %v1164_v20 = vld [vmem:[%s1384_s7 + $0x170] ss:$8 sps:$4 sm:$0xff]   ;;  %v1167_v22 = vld [vmem:[%s1384_s7 + $0x164] ss:$8 sps:$4 sm:$0xff]  }
  0x2d   : > { %802 = vmatprep.subr.bf16.mxu1 %v1161_v18  ;;  %750 = vmatpush1.bf16.msra.mxu0 %v1163_v19  ;;  %v1169_v23 = vld [vmem:[%s1384_s7 + $0x60] ss:$8 sps:$4 sm:$0xff]   ;;  %v1171_v25 = vld [vmem:[%s1384_s7 + $0x54] ss:$8 sps:$4 sm:$0xff]   ;;  %v1175_v27 = vld [vmem:[%s1384_s7 + $0x50] ss:$8 sps:$4 sm:$0xff]  }
  0x2e   : > { %803 = vmatpush1.bf16.msra.mxu1 %v1164_v20  ;;  %751 = vmatprep.subr.bf16.mxu0 %v1165_v21  ;;  %v1170_v24 = vld [vmem:[%s1384_s7 + $0x160] ss:$8 sps:$4 sm:$0xff]   ;;  %v1173_v26 = vld [vmem:[%s1384_s7 + $0x154] ss:$8 sps:$4 sm:$0xff]   ;;  %v1176_v28 = vld [vmem:[%s1384_s7 + $0x150] ss:$8 sps:$4 sm:$0xff]  }
  0x2f   : > { %804 = vmatprep.subr.bf16.mxu1 %v1167_v22  ;;  %v1177_v29 = vld [vmem:[%s1384_s7 + $0x44] ss:$8 sps:$4 sm:$0xff]   ;;  %v1181_v31 = vld [vmem:[%s1384_s7 + $0x40] ss:$8 sps:$4 sm:$0xff]   ;;  %v1183_v33 = vld [vmem:[%s1384_s7 + $0x34] ss:$8 sps:$4 sm:$0xff]  }
  0x30   : > { %v1179_v30 = vld [vmem:[%s1384_s7 + $0x144] ss:$8 sps:$4 sm:$0xff]   ;;  %v1182_v32 = vld [vmem:[%s1384_s7 + $0x140] ss:$8 sps:$4 sm:$0xff]   ;;  %v1185_v34 = vld [vmem:[%s1384_s7 + $0x134] ss:$8 sps:$4 sm:$0xff]  }
  0x31   : > { %752 = vmatpush1.bf16.msra.mxu0 %v1169_v23  ;;  %v1187_v35 = vld [vmem:[%s1384_s7 + $0x30] ss:$8 sps:$4 sm:$0xff]   ;;  %v1189_v37 = vld [vmem:[%s1384_s7 + $0x24] ss:$8 sps:$4 sm:$0xff]   ;;  %v1193_v39 = vld [vmem:[%s1384_s7 + $0x20] ss:$8 sps:$4 sm:$0xff]  }
  0x32   : > { %805 = vmatpush1.bf16.msra.mxu1 %v1170_v24  ;;  %753 = vmatprep.subr.bf16.mxu0 %v1171_v25  ;;  %v1188_v36 = vld [vmem:[%s1384_s7 + $0x130] ss:$8 sps:$4 sm:$0xff]   ;;  %v1191_v38 = vld [vmem:[%s1384_s7 + $0x124] ss:$8 sps:$4 sm:$0xff]   ;;  %v1194_v40 = vld [vmem:[%s1384_s7 + $0x120] ss:$8 sps:$4 sm:$0xff]  }
  0x33   : > { %806 = vmatprep.subr.bf16.mxu1 %v1173_v26  ;;  %v1195_v41 = vld [vmem:[%s1384_s7 + $0x14] ss:$8 sps:$4 sm:$0xff]   ;;  %v1199_v43 = vld [vmem:[%s1384_s7 + $0x10] ss:$8 sps:$4 sm:$0xff]   ;;  %v1201_v45 = vld [vmem:[%s1384_s7 + $0x4] ss:$8 sps:$4 sm:$0xff]  }
  0x34   : > { %v1197_v42 = vld [vmem:[%s1384_s7 + $0x114] ss:$8 sps:$4 sm:$0xff]   ;;  %v1200_v44 = vld [vmem:[%s1384_s7 + $0x110] ss:$8 sps:$4 sm:$0xff]   ;;  %v1203_v46 = vld [vmem:[%s1384_s7 + $0x104] ss:$8 sps:$4 sm:$0xff]  }
  0x35   : > { %754 = vmatpush1.bf16.msra.mxu0 %v1175_v27  ;;  %v1205_v47 = vld [vmem:[%s1384_s7] ss:$8 sps:$4 sm:$0xff]   ;;  %v1207_v49 = vld [vmem:[%s1384_s7 + $0xf4] ss:$8 sps:$4 sm:$0xff]   ;;  %v1211_v51 = vld [vmem:[%s1384_s7 + $0xf0] ss:$8 sps:$4 sm:$0xff]  }
  0x36   : > { %807 = vmatpush1.bf16.msra.mxu1 %v1176_v28  ;;  %755 = vmatprep.subr.bf16.mxu0 %v1177_v29  ;;  %v1206_v48 = vld [vmem:[%s1384_s7 + $0x100] ss:$8 sps:$4 sm:$0xff]   ;;  %v1209_v50 = vld [vmem:[%s1384_s7 + $0x1f4] ss:$8 sps:$4 sm:$0xff]   ;;  %v1212_v52 = vld [vmem:[%s1384_s7 + $0x1f0] ss:$8 sps:$4 sm:$0xff]  }
  0x37   : > { %808 = vmatprep.subr.bf16.mxu1 %v1179_v30  ;;  %v1213_v53 = vld [vmem:[%s1384_s7 + $0xe4] ss:$8 sps:$4 sm:$0xff]   ;;  %v1217_v55 = vld [vmem:[%s1384_s7 + $0xe0] ss:$8 sps:$4 sm:$0xff]   ;;  %v1219_v57 = vld [vmem:[%s1384_s7 + $0xd4] ss:$8 sps:$4 sm:$0xff]  }
  0x38   : > { %v1215_v54 = vld [vmem:[%s1384_s7 + $0x1e4] ss:$8 sps:$4 sm:$0xff]   ;;  %v1218_v56 = vld [vmem:[%s1384_s7 + $0x1e0] ss:$8 sps:$4 sm:$0xff]   ;;  %v1221_v58 = vld [vmem:[%s1384_s7 + $0x1d4] ss:$8 sps:$4 sm:$0xff]  }
  0x39   : > { %756 = vmatpush1.bf16.msra.mxu0 %v1181_v31  ;;  %v1223_v59 = vld [vmem:[%s1384_s7 + $0xd0] ss:$8 sps:$4 sm:$0xff]   ;;  %v1225_v61 = vld [vmem:[%s1384_s7 + $0xc4] ss:$8 sps:$4 sm:$0xff]   ;;  %v1229_v3 = vld [vmem:[%s1384_s7 + $0xc0] ss:$8 sps:$4 sm:$0xff]  }
  0x3a   : > { %809 = vmatpush1.bf16.msra.mxu1 %v1182_v32  ;;  %757 = vmatprep.subr.bf16.mxu0 %v1183_v33  ;;  %v1224_v60 = vld [vmem:[%s1384_s7 + $0x1d0] ss:$8 sps:$4 sm:$0xff]   ;;  %v1227_v62 = vld [vmem:[%s1384_s7 + $0x1c4] ss:$8 sps:$4 sm:$0xff]   ;;  %v1230_v4 = vld [vmem:[%s1384_s7 + $0x1c0] ss:$8 sps:$4 sm:$0xff]  }
  0x3b   : > { %810 = vmatprep.subr.bf16.mxu1 %v1185_v34  ;;  %v334_v63 = vld [vmem:[%s1386_s8 + $0x8] sm:$0xff]  ;;  %v336_v1 = vld [vmem:[%s1386_s8 + $0x18] sm:$0xff]  ;;  %v333_v23 = vld [vmem:[%s1386_s8] sm:$0xff]  ;;  %p1111_p11 = scmp.ne.s32.totalorder %s1285_s14, 3 }
  0x3c   : > { %v338_v0 = vld [vmem:[%s1386_s8 + $0x28] sm:$0xff]  ;;  %v340_v2 = vld [vmem:[%s1386_s8 + $0x38] sm:$0xff]  ;;  %v337_v24 = vld [vmem:[%s1386_s8 + $0x20] sm:$0xff] }
  0x3d   : > { %758 = vmatpush1.bf16.msra.mxu0 %v1187_v35  ;;  %v350_v5 = vpack.c.bf16 %v338_v0, %v334_v63  ;;  %v352_v6 = vpack.c.bf16 %v340_v2, %v336_v1  ;;  %v1231_v7 = vld [vmem:[%s1384_s7 + $0xb4] ss:$8 sps:$4 sm:$0xff]   ;;  %v1235_v9 = vld [vmem:[%s1384_s7 + $0xb0] ss:$8 sps:$4 sm:$0xff]   ;;  %v1237_v11 = vld [vmem:[%s1384_s7 + $0xa4] ss:$8 sps:$4 sm:$0xff]   ;;  %v349_v31 = vpack.c.bf16 %v337_v24, %v333_v23 }
  0x3e   : > { %811 = vmatpush1.bf16.msra.mxu1 %v1188_v36  ;;  %759 = vmatprep.subr.bf16.mxu0 %v1189_v37  ;;  %v1233_v8 = vld [vmem:[%s1384_s7 + $0x1b4] ss:$8 sps:$4 sm:$0xff]   ;;  %v1236_v10 = vld [vmem:[%s1384_s7 + $0x1b0] ss:$8 sps:$4 sm:$0xff]   ;;  %v1239_v12 = vld [vmem:[%s1384_s7 + $0x1a4] ss:$8 sps:$4 sm:$0xff]  }
  0x3f   : > { %812 = vmatprep.subr.bf16.mxu1 %v1191_v38  ;;  %781 = vmatprep.mubr.bf16.mxu0 %v350_v5  ;;  %v1241_v13 = vld [vmem:[%s1384_s7 + $0xa0] ss:$8 sps:$4 sm:$0xff]   ;;  %v1243_v15 = vld [vmem:[%s1384_s7 + $0x94] ss:$8 sps:$4 sm:$0xff]   ;;  %v1247_v17 = vld [vmem:[%s1384_s7 + $0x90] ss:$8 sps:$4 sm:$0xff]  }
  0x40   : > { %834 = vmatprep.mubr.bf16.mxu1 %v352_v6  ;;  %v1242_v14 = vld [vmem:[%s1384_s7 + $0x1a0] ss:$8 sps:$4 sm:$0xff]   ;;  %v1245_v16 = vld [vmem:[%s1384_s7 + $0x194] ss:$8 sps:$4 sm:$0xff]   ;;  %v1248_v18 = vld [vmem:[%s1384_s7 + $0x190] ss:$8 sps:$4 sm:$0xff]  }
  0x41   : > { %760 = vmatpush1.bf16.msra.mxu0 %v1193_v39  ;;  %v1249_v19 = vld [vmem:[%s1384_s7 + $0x84] ss:$8 sps:$4 sm:$0xff]   ;;  %v1253_v21 = vld [vmem:[%s1384_s7 + $0x80] ss:$8 sps:$4 sm:$0xff]   ;;  %v335_v25 = vld [vmem:[%s1386_s8 + $0x10] sm:$0xff] }
  0x42   : > { %813 = vmatpush1.bf16.msra.mxu1 %v1194_v40  ;;  %761 = vmatprep.subr.bf16.mxu0 %v1195_v41  ;;  %v1251_v20 = vld [vmem:[%s1384_s7 + $0x184] ss:$8 sps:$4 sm:$0xff]   ;;  %v1254_v22 = vld [vmem:[%s1384_s7 + $0x180] ss:$8 sps:$4 sm:$0xff]   ;;  %v339_v26 = vld [vmem:[%s1386_s8 + $0x30] sm:$0xff] }
  0x43   : > { %814 = vmatprep.subr.bf16.mxu1 %v1197_v42  ;;  %v342_v27 = vld [vmem:[%s1386_s8 + $0x48] sm:$0xff]  ;;  %v344_v29 = vld [vmem:[%s1386_s8 + $0x58] sm:$0xff]  ;;  %v351_v32 = vpack.c.bf16 %v339_v26, %v335_v25  ;;  %v341_v35 = vld [vmem:[%s1386_s8 + $0x40] sm:$0xff] }
  0x44   : > { %v346_v28 = vld [vmem:[%s1386_s8 + $0x68] sm:$0xff]  ;;  %v348_v30 = vld [vmem:[%s1386_s8 + $0x78] sm:$0xff]  ;;  %v345_v36 = vld [vmem:[%s1386_s8 + $0x60] sm:$0xff] }
  0x45   : > { %762 = vmatpush1.bf16.msra.mxu0 %v1199_v43  ;;  %v354_v33 = vpack.c.bf16 %v346_v28, %v342_v27  ;;  %v356_v34 = vpack.c.bf16 %v348_v30, %v344_v29  ;;  %v343_v37 = vld [vmem:[%s1386_s8 + $0x50] sm:$0xff]  ;;  %v353_v39 = vpack.c.bf16 %v345_v36, %v341_v35  ;;  %v426_v2 = vld [vmem:[#allocation2 + $0x20] sm:$0xff] }
  0x46   : > { %815 = vmatpush1.bf16.msra.mxu1 %v1200_v44  ;;  %763 = vmatprep.subr.bf16.mxu0 %v1201_v45  ;;  %v347_v38 = vld [vmem:[%s1386_s8 + $0x70] sm:$0xff] }
  0x47   : > { %816 = vmatprep.subr.bf16.mxu1 %v1203_v46  ;;  %v355_v40 = vpack.c.bf16 %v347_v38, %v343_v37  ;;  %v421_v42 = vld [vmem:[#allocation2 + $0x30] sm:$0xff]  ;;  %v422_v46 = vld [vmem:[#allocation2] sm:$0xff] }
  0x49   : > { %764 = vmatpush1.bf16.msra.mxu0 %v1205_v47 }
  0x4a   : > { %817 = vmatpush1.bf16.msra.mxu1 %v1206_v48  ;;  %765 = vmatprep.subr.bf16.mxu0 %v1207_v49 }
  0x4b   : > { %818 = vmatprep.subr.bf16.mxu1 %v1209_v50 }
  0x4d   : > { %766 = vmatpush2.bf16.msra.mxu0 %v1211_v51  ;;  %v423_v51 = vld [vmem:[#allocation2 + $0x18] sm:$0xff] }
  0x4e   : > { %819 = vmatpush2.bf16.msra.mxu1 %v1212_v52  ;;  %767 = vmatprep.subr.bf16.mxu0 %v1213_v53 }
  0x4f   : > { %820 = vmatprep.subr.bf16.mxu1 %v1215_v54 }
  0x51   : > { %768 = vmatpush2.bf16.msra.mxu0 %v1217_v55 }
  0x52   : > { %821 = vmatpush2.bf16.msra.mxu1 %v1218_v56  ;;  %769 = vmatprep.subr.bf16.mxu0 %v1219_v57  ;;  %v424_v56 = vld [vmem:[#allocation2 + $0x10] sm:$0xff] }
  0x53   : > { %822 = vmatprep.subr.bf16.mxu1 %v1221_v58 }
  0x55   : > { %770 = vmatpush2.bf16.msra.mxu0 %v1223_v59 }
  0x56   : > { %823 = vmatpush2.bf16.msra.mxu1 %v1224_v60  ;;  %771 = vmatprep.subr.bf16.mxu0 %v1225_v61  ;;  %v425_v61 = vld [vmem:[#allocation2 + $0x8] sm:$0xff] }
  0x57   : > { %824 = vmatprep.subr.bf16.mxu1 %v1227_v62 }
  0x59   : > { %772 = vmatpush2.bf16.msra.mxu0 %v1229_v3 }
  0x5a   : > { %825 = vmatpush2.bf16.msra.mxu1 %v1230_v4  ;;  %773 = vmatprep.subr.bf16.mxu0 %v1231_v7  ;;  %v427_v7 = vld [vmem:[#allocation2 + $0x28] sm:$0xff] }
  0x5b   : > { %826 = vmatprep.subr.bf16.mxu1 %v1233_v8 }
  0x5d   : > { %774 = vmatpush2.bf16.msra.mxu0 %v1235_v9 }
  0x5e   : > { %827 = vmatpush2.bf16.msra.mxu1 %v1236_v10  ;;  %775 = vmatprep.subr.bf16.mxu0 %v1237_v11 }
  0x5f   : > { %828 = vmatprep.subr.bf16.mxu1 %v1239_v12  ;;  %v428_v12 = vld [vmem:[#allocation2 + $0x38] sm:$0xff] }
  0x61   : > { %776 = vmatpush2.bf16.msra.mxu0 %v1241_v13 }
  0x62   : > { %829 = vmatpush2.bf16.msra.mxu1 %v1242_v14  ;;  %777 = vmatprep.subr.bf16.mxu0 %v1243_v15 }
  0x63   : > { %830 = vmatprep.subr.bf16.mxu1 %v1245_v16 }
  0x65   : > { %778 = vmatpush2.bf16.msra.mxu0 %v1247_v17 }
  0x66   : > { %831 = vmatpush2.bf16.msra.mxu1 %v1248_v18  ;;  %779 = vmatprep.subr.bf16.mxu0 %v1249_v19 }
  0x67   : > { %832 = vmatprep.subr.bf16.mxu1 %v1251_v20 }
  0x69   : > { %780 = vmatpush2.bf16.msra.mxu0 %v1253_v21 }
  0x6a   : > { %833 = vmatpush2.bf16.msra.mxu1 %v1254_v22 }
  0x6c   : > { %782 = vmatmul.mubr.bf16.vlgmr.msra.gmra.mxu0 %v349_v31 }
  0x6d   : > { %835 = vmatmul.mubr.bf16.vlgmr.msra.gmra.mxu1 %v351_v32  ;;  %791 = vmatprep.mubr.bf16.mxu0 %v354_v33 }
  0x6e   : > { %844 = vmatprep.mubr.bf16.mxu1 %v356_v34 }
  0x74   : > { %792 = vmatmul.mubr.bf16.gmra.mxu0 %v353_v39 }
  0x75   : > { %845 = vmatmul.mubr.bf16.gmra.mxu1 %v355_v40 }
 0x12c   : > { %v783_v41 = vpop.f32.mrf.mxu0 }
 0x12d   : > { %v836_v43 = vpop.f32.mrf.mxu1 }
 0x12e   : > { %v837_v44 = vadd.f32 %v836_v43, %v783_v41  ;;  %v785_v45 = vpop.f32.mrf.mxu0 }
 0x12f   : > { %v838_v47 = vpop.f32.mrf.mxu1 }
 0x130   : > { %v855_v48 = vadd.f32 %v837_v44, %v421_v42  ;;  %v839_v49 = vadd.f32 %v838_v47, %v785_v45  ;;  %v787_v50 = vpop.f32.mrf.mxu0 }
 0x131   : > { %v840_v52 = vpop.f32.mrf.mxu1 }
 0x132   : > { %863 = vst [vmem:[#allocation2 + $0x30] sm:$0xff] %v855_v48  ;;  %v856_v53 = vadd.f32 %v839_v49, %v422_v46  ;;  %v841_v54 = vadd.f32 %v840_v52, %v787_v50  ;;  %v789_v55 = vpop.f32.mrf.mxu0 }
 0x133   : > { %v842_v57 = vpop.f32.mrf.mxu1 }
 0x134   : > { %864 = vst [vmem:[#allocation2] sm:$0xff] %v856_v53  ;;  %v857_v58 = vadd.f32 %v841_v54, %v423_v51  ;;  %v843_v59 = vadd.f32 %v842_v57, %v789_v55  ;;  %v793_v60 = vpop.f32.mrf.mxu0 }
 0x135   : > { %v846_v62 = vpop.f32.mrf.mxu1 }
 0x136   : > { %865 = vst [vmem:[#allocation2 + $0x18] sm:$0xff] %v857_v58  ;;  %v858_v63 = vadd.f32 %v843_v59, %v424_v56  ;;  %v847_v0 = vadd.f32 %v846_v62, %v793_v60  ;;  %v795_v1 = vpop.f32.mrf.mxu0 }
 0x137   : > { %v848_v3 = vpop.f32.mrf.mxu1 }
 0x138   : > { %866 = vst [vmem:[#allocation2 + $0x10] sm:$0xff] %v858_v63  ;;  %v859_v4 = vadd.f32 %v847_v0, %v425_v61  ;;  %v849_v5 = vadd.f32 %v848_v3, %v795_v1  ;;  %v797_v6 = vpop.f32.mrf.mxu0 }
 0x139   : > { %v850_v8 = vpop.f32.mrf.mxu1 }
 0x13a   : > { %867 = vst [vmem:[#allocation2 + $0x8] sm:$0xff] %v859_v4  ;;  %v860_v9 = vadd.f32 %v849_v5, %v426_v2  ;;  %v851_v10 = vadd.f32 %v850_v8, %v797_v6  ;;  %v799_v11 = vpop.f32.mrf.mxu0 }
 0x13b   : > { %v852_v13 = vpop.f32.mrf.mxu1 }
 0x13c   : > { %868 = vst [vmem:[#allocation2 + $0x20] sm:$0xff] %v860_v9  ;;  %v861_v14 = vadd.f32 %v851_v10, %v427_v7  ;;  %v853_v15 = vadd.f32 %v852_v13, %v799_v11  ;;  %874 = sbr.rel (%p1111_p11) target bundleno = 335 (0x14f), region = 63 }
 0x13e   : > { %869 = vst [vmem:[#allocation2 + $0x28] sm:$0xff] %v861_v14  ;;  %v862_v16 = vadd.f32 %v853_v15, %v428_v12 }
 0x140   : > { %870 = vst [vmem:[#allocation2 + $0x38] sm:$0xff] %v862_v16 }
 0x141   : > { %v885_v17 = vlaneseq  ;;  %v883_v19 = vld [vmem:[%s1514_s2] sm:$0x3]  ;;  %v875_v20 = vld [vmem:[#allocation2 + $0x30] sm:$0xff]  ;;  %v877_v24 = vld [vmem:[#allocation2 + $0x18] sm:$0xff] }
 0x142   : > { %v876_v22 = vld [vmem:[#allocation2] sm:$0xff]  ;;  %v878_v25 = vld [vmem:[#allocation2 + $0x10] sm:$0xff]  ;;  %v879_v26 = vld [vmem:[#allocation2 + $0x8] sm:$0xff] }
 0x143   : > { %v886_v18 = vshrl.u32 %v885_v17, 7  ;;  %v880_v29 = vld [vmem:[#allocation2 + $0x20] sm:$0xff] }
 0x145   : > { %v887_v21 = vsub.s32 0, %v886_v18  ;;  %v891_v23 = vsub.s32 1, %v886_v18  ;;  %v881_v30 = vld [vmem:[#allocation2 + $0x28] sm:$0xff] }
 0x147   : > { %v888_v27 = vrot.slane %v883_v19, %v887_v21  ;;  %v892_v28 = vrot.slane %v883_v19, %v891_v23  ;;  %v882_v31 = vld [vmem:[#allocation2 + $0x38] sm:$0xff] }
 0x149   : > { %v895_v32 = vadd.f32 %v888_v27, %v875_v20  ;;  %v896_v33 = vadd.f32 %v892_v28, %v876_v22  ;;  %v897_v34 = vadd.f32 %v888_v27, %v877_v24  ;;  %v898_v35 = vadd.f32 %v892_v28, %v878_v25 }
 0x14a   : > { %v899_v36 = vadd.f32 %v888_v27, %v879_v26  ;;  %v900_v37 = vadd.f32 %v892_v28, %v880_v29  ;;  %v901_v38 = vadd.f32 %v888_v27, %v881_v30  ;;  %v902_v39 = vadd.f32 %v892_v28, %v882_v31 }
 0x14b   : > { %903 = vst [vmem:[%s1515_s3] sm:$0xff] %v895_v32  ;;  %904 = vst [vmem:[%s1515_s3 + $0x8] sm:$0xff] %v896_v33 }
 0x14c   : > { %905 = vst [vmem:[%s1515_s3 + $0x10] sm:$0xff] %v897_v34  ;;  %906 = vst [vmem:[%s1515_s3 + $0x18] sm:$0xff] %v898_v35 }
 0x14d   : > { %907 = vst [vmem:[%s1515_s3 + $0x20] sm:$0xff] %v899_v36  ;;  %908 = vst [vmem:[%s1515_s3 + $0x28] sm:$0xff] %v900_v37 }
 0x14e   : > { %909 = vst [vmem:[%s1515_s3 + $0x30] sm:$0xff] %v901_v38  ;;  %910 = vst [vmem:[%s1515_s3 + $0x38] sm:$0xff] %v902_v39 }
 0x14f PF: > { %s13_s16 = sadd.s32 1, %s1293_s16   ;;  %s1516_s12 = smov %s1281_s13 }
 0x150   : > { %p10_p12 = scmp.ge.s32.totalorder %s13_s16, 6   ;;  %s1517_s13 = smov %s1351_s20 }
 0x151   : > { %s1518_s14 = smov %s1289_s15  ;;  %s1519_s15 = smov %s1521_s17 }
 0x152   :  { %12 = sbr.rel (!%p10_p12) target bundleno = 3 (0x3), region = 104 }

</bundles_post_ra>
